<compile_context>
chip_gen: v7x
topology: tpu7x:2x2x1
jax: 0.10.0
libtpu: 0.0.40
codegen_flags: <defaults>
</compile_context>

<pallas_src>
import functools

import jax
import jax.numpy as jnp
from jax import lax
from jax.experimental import pallas as pl
from jax.experimental.pallas import tpu as pltpu

_KH = 5  # every LeNet5 conv is 5x5, stride 1, VALID


# ---------------------------------------------------------------------------
# Constant-matrix builders (wrapper side; traced once under jit)
# ---------------------------------------------------------------------------
def _pack_row_weights(w, w_in, dtype):
    """PyTorch conv weight [OC, C, KH, KW] -> [KH, W_in*C, OW*OC] matrices.

    Wrow[kh][w*C+c, j*OC+oc] = w[oc, c, kh, w-j] (0 outside the kernel), so
    (x2d @ Wrow[kh])[i, j*OC+oc] sums the kw/c taps of kernel row kh."""
    oc, c, kh, kw = w.shape
    ow = w_in - kw + 1
    w_t = jnp.transpose(w, (2, 3, 1, 0))                       # [KH, KW, C, OC]
    wi = jnp.arange(w_in)
    oj = jnp.arange(ow)
    kk = jnp.arange(kw)
    shift = (wi[None, None, :] == (oj[None, :, None] + kk[:, None, None]))
    shift = shift.astype(w.dtype)                               # [KW, OW, W_in]
    wrow = jnp.einsum("hkco,kjw->hwcjo", w_t, shift)            # [KH,W,C,OW,OC]
    return wrow.reshape(kh, w_in * c, ow * oc).astype(dtype)


def _pool_row_mat(tb, h, oh, dtype):
    """Block-diagonal row-pool [TB*OH//2, TB*H].  Reads only local rows < OH
    of every stacked image, so the roll / cross-image garbage rows OH..H-1
    are exactly masked out (load-bearing for correctness)."""
    ph = oh // 2
    pr = jnp.repeat(jnp.eye(ph, dtype=jnp.float32), 2, axis=1) * 0.5   # [PH,OH]
    pr = jnp.pad(pr, ((0, 0), (0, h - oh)))                            # [PH, H]
    return jnp.kron(jnp.eye(tb, dtype=jnp.float32), pr).astype(dtype)


def _pool_col_mat(ow, oc, dtype):
    """[OW*OC, (OW//2)*OC]:  y @ pc  averages width pairs, channel-minor."""
    pw = jnp.repeat(jnp.eye(ow // 2, dtype=jnp.float32), 2, axis=1) * 0.5
    return jnp.kron(pw.T, jnp.eye(oc, dtype=jnp.float32)).astype(dtype)


def _row0_selector(tb, h, dtype):
    """[TB, TB*h]: picks local row 0 of every stacked image block."""
    e0 = jnp.eye(1, h, dtype=jnp.float32)
    return jnp.kron(jnp.eye(tb, dtype=jnp.float32), e0).astype(dtype)


# ---------------------------------------------------------------------------
# Fused kernel: conv1+pool1 -> conv2+pool2 -> conv3 -> fc1 -> fc2
# Activations for the TB images of this grid step are stacked along rows:
#   x1: [TB*32, 32*C], x2: [TB*14, 14*6], x3: [TB*5, 5*16]  (channel-minor).
# ---------------------------------------------------------------------------
def _lenet5_fused_kernel(x_ref,
                         w1_ref, b1_ref, pr1_ref, pc1_ref,
                         w2_ref, b2_ref, pr2_ref, pc2_ref,
                         w3_ref, b3_ref, sel_ref,
                         wf1_ref, bf1_ref, wf2_ref, bf2_ref,
                         o_ref):
    f32 = jnp.float32
    bf16 = jnp.bfloat16

    def conv_rows(x2d, w_ref):
        # conv[i] = sum_kh (x2d @ Wrow[kh])[i + kh].  The circular roll wraps
        # rows only into local rows >= OH of each image, which the pooling /
        # selector matrices multiply by exact zeros.
        n = x2d.shape[0]
        acc = jnp.dot(x2d, w_ref[0], preferred_element_type=f32)
        for kh in range(1, _KH):
            p = jnp.dot(x2d, w_ref[kh], preferred_element_type=f32)
            acc = acc + pltpu.roll(p, n - kh, axis=0)   # rows up by kh (XLU)
        return acc

    def tanh_pool(acc, b_ref, pr_ref, pc_ref):
        y = jnp.tanh(acc + b_ref[...]).astype(bf16)     # tanh/bias in f32
        p = jnp.dot(pr_ref[...], y, preferred_element_type=f32)       # rows
        p = jnp.dot(p.astype(bf16), pc_ref[...], preferred_element_type=f32)
        return p.astype(bf16)

    x1 = x_ref[...]                                     # [TB*32, 32*C]  bf16
    a1 = conv_rows(x1, w1_ref)                          # [TB*32, 28*6]  f32
    x2 = tanh_pool(a1, b1_ref, pr1_ref, pc1_ref)        # [TB*14, 14*6]  bf16
    a2 = conv_rows(x2, w2_ref)                          # [TB*14, 10*16] f32
    x3 = tanh_pool(a2, b2_ref, pr2_ref, pc2_ref)        # [TB*5,  5*16]  bf16
    a3 = conv_rows(x3, w3_ref)                          # [TB*5,  120]   f32
    # conv3 output lives at local row 0 of every image; select + bias.
    feat = jnp.dot(sel_ref[...], a3.astype(bf16),
                   preferred_element_type=f32) + b3_ref[...]           # [TB,120]
    h1 = jnp.tanh(feat)
    h2 = jnp.tanh(jnp.dot(h1.astype(bf16), wf1_ref[...],
                          preferred_element_type=f32) + bf1_ref[...])
    out = jnp.dot(h2.astype(bf16), wf2_ref[...],
                  preferred_element_type=f32) + bf2_ref[...]
    o_ref[...] = out.astype(o_ref.dtype)


# ---------------------------------------------------------------------------
# Wrapper
# ---------------------------------------------------------------------------
def lenet5_encoder(params, x_nchw, *, block_b=8):
    """Forward pass of LeNet5Encoder.  x_nchw: [B, C, 32, 32] float32."""
    B, C, H, W = x_nchw.shape
    if H != 32 or W != 32:
        raise ValueError("LeNet5Encoder needs 32x32 inputs (fc1 expects 120).")
    TB = block_b                 # images per grid step; multiple of 8 keeps
    assert TB % 8 == 0           # every stacked row count sublane-aligned.

    OC1, OC2, OC3 = 6, 16, 120
    H1, W1 = H, W                              # 32
    OH1, OW1 = H1 - _KH + 1, W1 - _KH + 1      # 28 (even)
    H2, W2 = OH1 // 2, OW1 // 2                # 14
    OH2, OW2 = H2 - _KH + 1, W2 - _KH + 1      # 10 (even)
    H3, W3 = OH2 // 2, OW2 // 2                # 5
    assert OH1 % 2 == 0 and OW1 % 2 == 0 and OH2 % 2 == 0 and OW2 % 2 == 0
    assert H3 == _KH and W3 == _KH             # conv3 is a full contraction
    L = params["fc1_w"].shape[1]
    bf16, f32 = jnp.bfloat16, jnp.float32

    # ---- grid-invariant constants (all VMEM-resident, < 1 MiB total) ------
    w1row = _pack_row_weights(params["conv1_w"], W1, bf16)   # [5, 32*C, 168]
    w2row = _pack_row_weights(params["conv2_w"], W2, bf16)   # [5, 84, 160]
    w3row = _pack_row_weights(params["conv3_w"], W3, bf16)   # [5, 80, 120]
    b1row = jnp.tile(params["conv1_b"], OW1).reshape(1, OW1 * OC1).astype(f32)
    b2row = jnp.tile(params["conv2_b"], OW2).reshape(1, OW2 * OC2).astype(f32)
    b3row = params["conv3_b"].reshape(1, OC3).astype(f32)
    pr1 = _pool_row_mat(TB, H1, OH1, bf16)       # [TB*14, TB*32]
    pc1 = _pool_col_mat(OW1, OC1, bf16)          # [168, 84]
    pr2 = _pool_row_mat(TB, H2, OH2, bf16)       # [TB*5, TB*14]
    pc2 = _pool_col_mat(OW2, OC2, bf16)          # [160, 80]
    sel = _row0_selector(TB, H3, bf16)           # [TB, TB*5]
    wf1 = params["fc1_w"].astype(bf16)           # [120, L]
    bf1 = params["fc1_b"].reshape(1, L).astype(f32)
    wf2 = params["fc2_w"].astype(bf16)           # [L, 2L]
    bf2 = params["fc2_b"].reshape(1, 2 * L).astype(f32)

    # ---- lane-dense input layout + batch padding to a TB multiple ---------
    x = jnp.transpose(x_nchw, (0, 2, 3, 1)).reshape(B, H1, W1 * C)
    Bp = ((B + TB - 1) // TB) * TB
    if Bp != B:
        x = jnp.pad(x, ((0, Bp - B), (0, 0), (0, 0)))
    x = x.reshape(Bp * H1, W1 * C).astype(bf16)          # [Bp*32, 32*C]
    WC1 = W1 * C

    out = pl.pallas_call(
        _lenet5_fused_kernel,
        out_shape=jax.ShapeDtypeStruct((Bp, 2 * L), jnp.float32),
        grid=(Bp // TB,),
        in_specs=[
            pl.BlockSpec((TB * H1, WC1), lambda b: (b, 0)),
            pl.BlockSpec(w1row.shape, lambda b: (0, 0, 0)),
            pl.BlockSpec(b1row.shape, lambda b: (0, 0)),
            pl.BlockSpec(pr1.shape, lambda b: (0, 0)),
            pl.BlockSpec(pc1.shape, lambda b: (0, 0)),
            pl.BlockSpec(w2row.shape, lambda b: (0, 0, 0)),
            pl.BlockSpec(b2row.shape, lambda b: (0, 0)),
            pl.BlockSpec(pr2.shape, lambda b: (0, 0)),
            pl.BlockSpec(pc2.shape, lambda b: (0, 0)),
            pl.BlockSpec(w3row.shape, lambda b: (0, 0, 0)),
            pl.BlockSpec(b3row.shape, lambda b: (0, 0)),
            pl.BlockSpec(sel.shape, lambda b: (0, 0)),
            pl.BlockSpec(wf1.shape, lambda b: (0, 0)),
            pl.BlockSpec(bf1.shape, lambda b: (0, 0)),
            pl.BlockSpec(wf2.shape, lambda b: (0, 0)),
            pl.BlockSpec(bf2.shape, lambda b: (0, 0)),
        ],
        out_specs=pl.BlockSpec((TB, 2 * L), lambda b: (b, 0)),
        # On v7x, pltpu.CORE_PARALLEL on this axis is worth benchmarking.
        compiler_params=pltpu.CompilerParams(
            dimension_semantics=("parallel",)),
    )(x, w1row, b1row, pr1, pc1, w2row, b2row, pr2, pc2,
      w3row, b3row, sel, wf1, bf1, wf2, bf2)
    return out[:B]


# ---------------------------------------------------------------------------
# Parameters (PyTorch-style uniform init, fc weights stored [in, out])
# ---------------------------------------------------------------------------
def init_params(key, latent_dim, input_channels):
    ks = jax.random.split(key, 10)

    def u(k, shape, fan_in):
        bound = 1.0 / jnp.sqrt(jnp.float32(fan_in))
        return jax.random.uniform(k, shape, jnp.float32, -bound, bound)

    return {
        "conv1_w": u(ks[0], (6, input_channels, 5, 5), input_channels * 25),
        "conv1_b": u(ks[1], (6,), input_channels * 25),
        "conv2_w": u(ks[2], (16, 6, 5, 5), 6 * 25),
        "conv2_b": u(ks[3], (16,), 6 * 25),
        "conv3_w": u(ks[4], (120, 16, 5, 5), 16 * 25),
        "conv3_b": u(ks[5], (120,), 16 * 25),
        "fc1_w": u(ks[6], (120, latent_dim), 120),
        "fc1_b": u(ks[7], (latent_dim,), 120),
        "fc2_w": u(ks[8], (latent_dim, 2 * latent_dim), latent_dim),
        "fc2_b": u(ks[9], (2 * latent_dim,), latent_dim),
    }


# ---------------------------------------------------------------------------
# Pure-JAX reference (full f32 precision) for the correctness check
# ---------------------------------------------------------------------------
def _ref_conv_tanh(x, w, b):
    k = jnp.transpose(w, (2, 3, 1, 0))  # HWIO
    y = lax.conv_general_dilated(
        x, k, window_strides=(1, 1), padding="VALID",
        dimension_numbers=("NHWC", "HWIO", "NHWC"),
        precision=lax.Precision.HIGHEST,
    )
    return jnp.tanh(y + b)


def _ref_pool(x):
    B, H, W, C = x.shape
    return x.reshape(B, H // 2, 2, W // 2, 2, C).mean(axis=(2, 4))


def lenet5_encoder_ref(params, x_nchw):
    x = jnp.transpose(x_nchw, (0, 2, 3, 1))
    x = _ref_pool(_ref_conv_tanh(x, params["conv1_w"], params["conv1_b"]))
    x = _ref_pool(_ref_conv_tanh(x, params["conv2_w"], params["conv2_b"]))
    x = _ref_conv_tanh(x, params["conv3_w"], params["conv3_b"])
    x = x.reshape(x.shape[0], -1)
    x = jnp.tanh(jnp.dot(x, params["fc1_w"],
                         precision=lax.Precision.HIGHEST) + params["fc1_b"])
    x = jnp.dot(x, params["fc2_w"],
                precision=lax.Precision.HIGHEST) + params["fc2_b"]
    return x


# ---------------------------------------------------------------------------
if __name__ == "__main__":
    latent_dim = 32
    input_channels = 1
    B = 2
    key = jax.random.PRNGKey(0)
    kx, kp = jax.random.split(key)
    # LeNet5 geometry: 32x32 input so conv3 sees a 5x5 map -> 120 features.
    x = jax.random.normal(kx, (B, input_channels, 32, 32), dtype=jnp.float32)
    params = init_params(kp, latent_dim, input_channels)

    fwd = jax.jit(lenet5_encoder)
    out = jax.block_until_ready(fwd(params, x))
    assert out.shape == (B, 2 * latent_dim), out.shape

    ref = jax.block_until_ready(lenet5_encoder_ref(params, x))
    err = float(jnp.max(jnp.abs(out - ref)))
    rel = float(jnp.linalg.norm(out - ref) / (jnp.linalg.norm(ref) + 1e-12))
    # Tolerance reflects single-pass bf16 MXU precision (the reference is f32).
    assert err < 8e-2 and rel < 5e-2, (err, rel)

    print("KERNEL_OK")
</pallas_src>

<mosaic_0001>
module attributes {stable_mosaic.version = 11 : i64} {
  func.func @_lenet5_fused_kernel(%arg0: i32, %arg1: memref<256x32xbf16, #tpu.memory_space<vmem>>, %arg2: memref<5x32x168xbf16, #tpu.memory_space<vmem>>, %arg3: memref<1x168xf32, #tpu.memory_space<vmem>>, %arg4: memref<112x256xbf16, #tpu.memory_space<vmem>>, %arg5: memref<168x84xbf16, #tpu.memory_space<vmem>>, %arg6: memref<5x84x160xbf16, #tpu.memory_space<vmem>>, %arg7: memref<1x160xf32, #tpu.memory_space<vmem>>, %arg8: memref<40x112xbf16, #tpu.memory_space<vmem>>, %arg9: memref<160x80xbf16, #tpu.memory_space<vmem>>, %arg10: memref<5x80x120xbf16, #tpu.memory_space<vmem>>, %arg11: memref<1x120xf32, #tpu.memory_space<vmem>>, %arg12: memref<8x40xbf16, #tpu.memory_space<vmem>>, %arg13: memref<120x32xbf16, #tpu.memory_space<vmem>>, %arg14: memref<1x32xf32, #tpu.memory_space<vmem>>, %arg15: memref<32x64xbf16, #tpu.memory_space<vmem>>, %arg16: memref<1x64xf32, #tpu.memory_space<vmem>>, %arg17: memref<8x64xf32, #tpu.memory_space<vmem>>) attributes {dimension_semantics = [#tpu.dimension_semantics<parallel>], iteration_bounds = array<i64: 1>, scalar_prefetch = 0 : i64, scratch_operands = 0 : i64, tpu.core_type = #tpu.core_type<tc>, window_params = [{transform_indices = @transform_0, window_bounds = array<i64: 256, 32>}, {pipeline_mode = #tpu.pipeline_mode<synchronous>, transform_indices = @transform_1, window_bounds = array<i64: 5, 32, 168>}, {pipeline_mode = #tpu.pipeline_mode<synchronous>, transform_indices = @transform_2, window_bounds = array<i64: 1, 168>}, {pipeline_mode = #tpu.pipeline_mode<synchronous>, transform_indices = @transform_3, window_bounds = array<i64: 112, 256>}, {pipeline_mode = #tpu.pipeline_mode<synchronous>, transform_indices = @transform_4, window_bounds = array<i64: 168, 84>}, {pipeline_mode = #tpu.pipeline_mode<synchronous>, transform_indices = @transform_5, window_bounds = array<i64: 5, 84, 160>}, {pipeline_mode = #tpu.pipeline_mode<synchronous>, transform_indices = @transform_6, window_bounds = array<i64: 1, 160>}, {pipeline_mode = #tpu.pipeline_mode<synchronous>, transform_indices = @transform_7, window_bounds = array<i64: 40, 112>}, {pipeline_mode = #tpu.pipeline_mode<synchronous>, transform_indices = @transform_8, window_bounds = array<i64: 160, 80>}, {pipeline_mode = #tpu.pipeline_mode<synchronous>, transform_indices = @transform_9, window_bounds = array<i64: 5, 80, 120>}, {pipeline_mode = #tpu.pipeline_mode<synchronous>, transform_indices = @transform_10, window_bounds = array<i64: 1, 120>}, {pipeline_mode = #tpu.pipeline_mode<synchronous>, transform_indices = @transform_11, window_bounds = array<i64: 8, 40>}, {pipeline_mode = #tpu.pipeline_mode<synchronous>, transform_indices = @transform_12, window_bounds = array<i64: 120, 32>}, {pipeline_mode = #tpu.pipeline_mode<synchronous>, transform_indices = @transform_13, window_bounds = array<i64: 1, 32>}, {pipeline_mode = #tpu.pipeline_mode<synchronous>, transform_indices = @transform_14, window_bounds = array<i64: 32, 64>}, {pipeline_mode = #tpu.pipeline_mode<synchronous>, transform_indices = @transform_15, window_bounds = array<i64: 1, 64>}, {transform_indices = @transform_16, window_bounds = array<i64: 8, 64>}]} {
    %c0 = arith.constant 0 : index
    %c0_0 = arith.constant 0 : index
    %0 = vector.load %arg1[%c0, %c0_0] : memref<256x32xbf16, #tpu.memory_space<vmem>>, vector<256x32xbf16>
    %c0_1 = arith.constant 0 : index
    %c0_2 = arith.constant 0 : index
    %c0_3 = arith.constant 0 : index
    %1 = vector.load %arg2[%c0_1, %c0_2, %c0_3] : memref<5x32x168xbf16, #tpu.memory_space<vmem>>, vector<1x32x168xbf16>
    %2 = vector.shape_cast %1 : vector<1x32x168xbf16> to vector<32x168xbf16>
    %cst = arith.constant dense<0.000000e+00> : vector<256x168xf32>
    %3 = tpu.matmul %0, %2, %cst {dimension_numbers = #tpu.dot_dimension_numbers<[1], [0], [0], [1], [0, 0, 1, 1], [], []>} : vector<256x32xbf16>, vector<32x168xbf16>, vector<256x168xf32> -> vector<256x168xf32>
    %c1 = arith.constant 1 : index
    %c0_4 = arith.constant 0 : index
    %c0_5 = arith.constant 0 : index
    %4 = vector.load %arg2[%c1, %c0_4, %c0_5] : memref<5x32x168xbf16, #tpu.memory_space<vmem>>, vector<1x32x168xbf16>
    %5 = vector.shape_cast %4 : vector<1x32x168xbf16> to vector<32x168xbf16>
    %cst_6 = arith.constant dense<0.000000e+00> : vector<256x168xf32>
    %6 = tpu.matmul %0, %5, %cst_6 {dimension_numbers = #tpu.dot_dimension_numbers<[1], [0], [0], [1], [0, 0, 1, 1], [], []>} : vector<256x32xbf16>, vector<32x168xbf16>, vector<256x168xf32> -> vector<256x168xf32>
    %c255_i32 = arith.constant 255 : i32
    %7 = tpu.dynamic_rotate %6 by %c255_i32 dim 0 : vector<256x168xf32>, i32 -> vector<256x168xf32>
    %8 = arith.addf %3, %7 : vector<256x168xf32>
    %c2 = arith.constant 2 : index
    %c0_7 = arith.constant 0 : index
    %c0_8 = arith.constant 0 : index
    %9 = vector.load %arg2[%c2, %c0_7, %c0_8] : memref<5x32x168xbf16, #tpu.memory_space<vmem>>, vector<1x32x168xbf16>
    %10 = vector.shape_cast %9 : vector<1x32x168xbf16> to vector<32x168xbf16>
    %cst_9 = arith.constant dense<0.000000e+00> : vector<256x168xf32>
    %11 = tpu.matmul %0, %10, %cst_9 {dimension_numbers = #tpu.dot_dimension_numbers<[1], [0], [0], [1], [0, 0, 1, 1], [], []>} : vector<256x32xbf16>, vector<32x168xbf16>, vector<256x168xf32> -> vector<256x168xf32>
    %c254_i32 = arith.constant 254 : i32
    %12 = tpu.dynamic_rotate %11 by %c254_i32 dim 0 : vector<256x168xf32>, i32 -> vector<256x168xf32>
    %13 = arith.addf %8, %12 : vector<256x168xf32>
    %c3 = arith.constant 3 : index
    %c0_10 = arith.constant 0 : index
    %c0_11 = arith.constant 0 : index
    %14 = vector.load %arg2[%c3, %c0_10, %c0_11] : memref<5x32x168xbf16, #tpu.memory_space<vmem>>, vector<1x32x168xbf16>
    %15 = vector.shape_cast %14 : vector<1x32x168xbf16> to vector<32x168xbf16>
    %cst_12 = arith.constant dense<0.000000e+00> : vector<256x168xf32>
    %16 = tpu.matmul %0, %15, %cst_12 {dimension_numbers = #tpu.dot_dimension_numbers<[1], [0], [0], [1], [0, 0, 1, 1], [], []>} : vector<256x32xbf16>, vector<32x168xbf16>, vector<256x168xf32> -> vector<256x168xf32>
    %c253_i32 = arith.constant 253 : i32
    %17 = tpu.dynamic_rotate %16 by %c253_i32 dim 0 : vector<256x168xf32>, i32 -> vector<256x168xf32>
    %18 = arith.addf %13, %17 : vector<256x168xf32>
    %c4 = arith.constant 4 : index
    %c0_13 = arith.constant 0 : index
    %c0_14 = arith.constant 0 : index
    %19 = vector.load %arg2[%c4, %c0_13, %c0_14] : memref<5x32x168xbf16, #tpu.memory_space<vmem>>, vector<1x32x168xbf16>
    %20 = vector.shape_cast %19 : vector<1x32x168xbf16> to vector<32x168xbf16>
    %cst_15 = arith.constant dense<0.000000e+00> : vector<256x168xf32>
    %21 = tpu.matmul %0, %20, %cst_15 {dimension_numbers = #tpu.dot_dimension_numbers<[1], [0], [0], [1], [0, 0, 1, 1], [], []>} : vector<256x32xbf16>, vector<32x168xbf16>, vector<256x168xf32> -> vector<256x168xf32>
    %c252_i32 = arith.constant 252 : i32
    %22 = tpu.dynamic_rotate %21 by %c252_i32 dim 0 : vector<256x168xf32>, i32 -> vector<256x168xf32>
    %23 = arith.addf %18, %22 : vector<256x168xf32>
    %c0_16 = arith.constant 0 : index
    %c0_17 = arith.constant 0 : index
    %24 = vector.load %arg3[%c0_16, %c0_17] : memref<1x168xf32, #tpu.memory_space<vmem>>, vector<1x168xf32>
    %25 = vector.broadcast %24 : vector<1x168xf32> to vector<256x168xf32>
    %26 = arith.addf %23, %25 : vector<256x168xf32>
    %27 = math.tanh %26 : vector<256x168xf32>
    %28 = arith.truncf %27 : vector<256x168xf32> to vector<256x168xbf16>
    %c0_18 = arith.constant 0 : index
    %c0_19 = arith.constant 0 : index
    %29 = vector.load %arg4[%c0_18, %c0_19] : memref<112x256xbf16, #tpu.memory_space<vmem>>, vector<112x256xbf16>
    %cst_20 = arith.constant dense<0.000000e+00> : vector<112x168xf32>
    %30 = tpu.matmul %29, %28, %cst_20 {dimension_numbers = #tpu.dot_dimension_numbers<[1], [0], [0], [1], [0, 0, 1, 1], [], []>} : vector<112x256xbf16>, vector<256x168xbf16>, vector<112x168xf32> -> vector<112x168xf32>
    %31 = arith.truncf %30 : vector<112x168xf32> to vector<112x168xbf16>
    %c0_21 = arith.constant 0 : index
    %c0_22 = arith.constant 0 : index
    %32 = vector.load %arg5[%c0_21, %c0_22] : memref<168x84xbf16, #tpu.memory_space<vmem>>, vector<168x84xbf16>
    %cst_23 = arith.constant dense<0.000000e+00> : vector<112x84xf32>
    %33 = tpu.matmul %31, %32, %cst_23 {dimension_numbers = #tpu.dot_dimension_numbers<[1], [0], [0], [1], [0, 0, 1, 1], [], []>} : vector<112x168xbf16>, vector<168x84xbf16>, vector<112x84xf32> -> vector<112x84xf32>
    %34 = arith.truncf %33 : vector<112x84xf32> to vector<112x84xbf16>
    %c0_24 = arith.constant 0 : index
    %c0_25 = arith.constant 0 : index
    %c0_26 = arith.constant 0 : index
    %35 = vector.load %arg6[%c0_24, %c0_25, %c0_26] : memref<5x84x160xbf16, #tpu.memory_space<vmem>>, vector<1x84x160xbf16>
    %36 = vector.shape_cast %35 : vector<1x84x160xbf16> to vector<84x160xbf16>
    %cst_27 = arith.constant dense<0.000000e+00> : vector<112x160xf32>
    %37 = tpu.matmul %34, %36, %cst_27 {dimension_numbers = #tpu.dot_dimension_numbers<[1], [0], [0], [1], [0, 0, 1, 1], [], []>} : vector<112x84xbf16>, vector<84x160xbf16>, vector<112x160xf32> -> vector<112x160xf32>
    %c1_28 = arith.constant 1 : index
    %c0_29 = arith.constant 0 : index
    %c0_30 = arith.constant 0 : index
    %38 = vector.load %arg6[%c1_28, %c0_29, %c0_30] : memref<5x84x160xbf16, #tpu.memory_space<vmem>>, vector<1x84x160xbf16>
    %39 = vector.shape_cast %38 : vector<1x84x160xbf16> to vector<84x160xbf16>
    %cst_31 = arith.constant dense<0.000000e+00> : vector<112x160xf32>
    %40 = tpu.matmul %34, %39, %cst_31 {dimension_numbers = #tpu.dot_dimension_numbers<[1], [0], [0], [1], [0, 0, 1, 1], [], []>} : vector<112x84xbf16>, vector<84x160xbf16>, vector<112x160xf32> -> vector<112x160xf32>
    %c111_i32 = arith.constant 111 : i32
    %41 = tpu.dynamic_rotate %40 by %c111_i32 dim 0 : vector<112x160xf32>, i32 -> vector<112x160xf32>
    %42 = arith.addf %37, %41 : vector<112x160xf32>
    %c2_32 = arith.constant 2 : index
    %c0_33 = arith.constant 0 : index
    %c0_34 = arith.constant 0 : index
    %43 = vector.load %arg6[%c2_32, %c0_33, %c0_34] : memref<5x84x160xbf16, #tpu.memory_space<vmem>>, vector<1x84x160xbf16>
    %44 = vector.shape_cast %43 : vector<1x84x160xbf16> to vector<84x160xbf16>
    %cst_35 = arith.constant dense<0.000000e+00> : vector<112x160xf32>
    %45 = tpu.matmul %34, %44, %cst_35 {dimension_numbers = #tpu.dot_dimension_numbers<[1], [0], [0], [1], [0, 0, 1, 1], [], []>} : vector<112x84xbf16>, vector<84x160xbf16>, vector<112x160xf32> -> vector<112x160xf32>
    %c110_i32 = arith.constant 110 : i32
    %46 = tpu.dynamic_rotate %45 by %c110_i32 dim 0 : vector<112x160xf32>, i32 -> vector<112x160xf32>
    %47 = arith.addf %42, %46 : vector<112x160xf32>
    %c3_36 = arith.constant 3 : index
    %c0_37 = arith.constant 0 : index
    %c0_38 = arith.constant 0 : index
    %48 = vector.load %arg6[%c3_36, %c0_37, %c0_38] : memref<5x84x160xbf16, #tpu.memory_space<vmem>>, vector<1x84x160xbf16>
    %49 = vector.shape_cast %48 : vector<1x84x160xbf16> to vector<84x160xbf16>
    %cst_39 = arith.constant dense<0.000000e+00> : vector<112x160xf32>
    %50 = tpu.matmul %34, %49, %cst_39 {dimension_numbers = #tpu.dot_dimension_numbers<[1], [0], [0], [1], [0, 0, 1, 1], [], []>} : vector<112x84xbf16>, vector<84x160xbf16>, vector<112x160xf32> -> vector<112x160xf32>
    %c109_i32 = arith.constant 109 : i32
    %51 = tpu.dynamic_rotate %50 by %c109_i32 dim 0 : vector<112x160xf32>, i32 -> vector<112x160xf32>
    %52 = arith.addf %47, %51 : vector<112x160xf32>
    %c4_40 = arith.constant 4 : index
    %c0_41 = arith.constant 0 : index
    %c0_42 = arith.constant 0 : index
    %53 = vector.load %arg6[%c4_40, %c0_41, %c0_42] : memref<5x84x160xbf16, #tpu.memory_space<vmem>>, vector<1x84x160xbf16>
    %54 = vector.shape_cast %53 : vector<1x84x160xbf16> to vector<84x160xbf16>
    %cst_43 = arith.constant dense<0.000000e+00> : vector<112x160xf32>
    %55 = tpu.matmul %34, %54, %cst_43 {dimension_numbers = #tpu.dot_dimension_numbers<[1], [0], [0], [1], [0, 0, 1, 1], [], []>} : vector<112x84xbf16>, vector<84x160xbf16>, vector<112x160xf32> -> vector<112x160xf32>
    %c108_i32 = arith.constant 108 : i32
    %56 = tpu.dynamic_rotate %55 by %c108_i32 dim 0 : vector<112x160xf32>, i32 -> vector<112x160xf32>
    %57 = arith.addf %52, %56 : vector<112x160xf32>
    %c0_44 = arith.constant 0 : index
    %c0_45 = arith.constant 0 : index
    %58 = vector.load %arg7[%c0_44, %c0_45] : memref<1x160xf32, #tpu.memory_space<vmem>>, vector<1x160xf32>
    %59 = vector.broadcast %58 : vector<1x160xf32> to vector<112x160xf32>
    %60 = arith.addf %57, %59 : vector<112x160xf32>
    %61 = math.tanh %60 : vector<112x160xf32>
    %62 = arith.truncf %61 : vector<112x160xf32> to vector<112x160xbf16>
    %c0_46 = arith.constant 0 : index
    %c0_47 = arith.constant 0 : index
    %63 = vector.load %arg8[%c0_46, %c0_47] : memref<40x112xbf16, #tpu.memory_space<vmem>>, vector<40x112xbf16>
    %cst_48 = arith.constant dense<0.000000e+00> : vector<40x160xf32>
    %64 = tpu.matmul %63, %62, %cst_48 {dimension_numbers = #tpu.dot_dimension_numbers<[1], [0], [0], [1], [0, 0, 1, 1], [], []>} : vector<40x112xbf16>, vector<112x160xbf16>, vector<40x160xf32> -> vector<40x160xf32>
    %65 = arith.truncf %64 : vector<40x160xf32> to vector<40x160xbf16>
    %c0_49 = arith.constant 0 : index
    %c0_50 = arith.constant 0 : index
    %66 = vector.load %arg9[%c0_49, %c0_50] : memref<160x80xbf16, #tpu.memory_space<vmem>>, vector<160x80xbf16>
    %cst_51 = arith.constant dense<0.000000e+00> : vector<40x80xf32>
    %67 = tpu.matmul %65, %66, %cst_51 {dimension_numbers = #tpu.dot_dimension_numbers<[1], [0], [0], [1], [0, 0, 1, 1], [], []>} : vector<40x160xbf16>, vector<160x80xbf16>, vector<40x80xf32> -> vector<40x80xf32>
    %68 = arith.truncf %67 : vector<40x80xf32> to vector<40x80xbf16>
    %c0_52 = arith.constant 0 : index
    %c0_53 = arith.constant 0 : index
    %c0_54 = arith.constant 0 : index
    %69 = vector.load %arg10[%c0_52, %c0_53, %c0_54] : memref<5x80x120xbf16, #tpu.memory_space<vmem>>, vector<1x80x120xbf16>
    %70 = vector.shape_cast %69 : vector<1x80x120xbf16> to vector<80x120xbf16>
    %cst_55 = arith.constant dense<0.000000e+00> : vector<40x120xf32>
    %71 = tpu.matmul %68, %70, %cst_55 {dimension_numbers = #tpu.dot_dimension_numbers<[1], [0], [0], [1], [0, 0, 1, 1], [], []>} : vector<40x80xbf16>, vector<80x120xbf16>, vector<40x120xf32> -> vector<40x120xf32>
    %c1_56 = arith.constant 1 : index
    %c0_57 = arith.constant 0 : index
    %c0_58 = arith.constant 0 : index
    %72 = vector.load %arg10[%c1_56, %c0_57, %c0_58] : memref<5x80x120xbf16, #tpu.memory_space<vmem>>, vector<1x80x120xbf16>
    %73 = vector.shape_cast %72 : vector<1x80x120xbf16> to vector<80x120xbf16>
    %cst_59 = arith.constant dense<0.000000e+00> : vector<40x120xf32>
    %74 = tpu.matmul %68, %73, %cst_59 {dimension_numbers = #tpu.dot_dimension_numbers<[1], [0], [0], [1], [0, 0, 1, 1], [], []>} : vector<40x80xbf16>, vector<80x120xbf16>, vector<40x120xf32> -> vector<40x120xf32>
    %c39_i32 = arith.constant 39 : i32
    %75 = tpu.dynamic_rotate %74 by %c39_i32 dim 0 : vector<40x120xf32>, i32 -> vector<40x120xf32>
    %76 = arith.addf %71, %75 : vector<40x120xf32>
    %c2_60 = arith.constant 2 : index
    %c0_61 = arith.constant 0 : index
    %c0_62 = arith.constant 0 : index
    %77 = vector.load %arg10[%c2_60, %c0_61, %c0_62] : memref<5x80x120xbf16, #tpu.memory_space<vmem>>, vector<1x80x120xbf16>
    %78 = vector.shape_cast %77 : vector<1x80x120xbf16> to vector<80x120xbf16>
    %cst_63 = arith.constant dense<0.000000e+00> : vector<40x120xf32>
    %79 = tpu.matmul %68, %78, %cst_63 {dimension_numbers = #tpu.dot_dimension_numbers<[1], [0], [0], [1], [0, 0, 1, 1], [], []>} : vector<40x80xbf16>, vector<80x120xbf16>, vector<40x120xf32> -> vector<40x120xf32>
    %c38_i32 = arith.constant 38 : i32
    %80 = tpu.dynamic_rotate %79 by %c38_i32 dim 0 : vector<40x120xf32>, i32 -> vector<40x120xf32>
    %81 = arith.addf %76, %80 : vector<40x120xf32>
    %c3_64 = arith.constant 3 : index
    %c0_65 = arith.constant 0 : index
    %c0_66 = arith.constant 0 : index
    %82 = vector.load %arg10[%c3_64, %c0_65, %c0_66] : memref<5x80x120xbf16, #tpu.memory_space<vmem>>, vector<1x80x120xbf16>
    %83 = vector.shape_cast %82 : vector<1x80x120xbf16> to vector<80x120xbf16>
    %cst_67 = arith.constant dense<0.000000e+00> : vector<40x120xf32>
    %84 = tpu.matmul %68, %83, %cst_67 {dimension_numbers = #tpu.dot_dimension_numbers<[1], [0], [0], [1], [0, 0, 1, 1], [], []>} : vector<40x80xbf16>, vector<80x120xbf16>, vector<40x120xf32> -> vector<40x120xf32>
    %c37_i32 = arith.constant 37 : i32
    %85 = tpu.dynamic_rotate %84 by %c37_i32 dim 0 : vector<40x120xf32>, i32 -> vector<40x120xf32>
    %86 = arith.addf %81, %85 : vector<40x120xf32>
    %c4_68 = arith.constant 4 : index
    %c0_69 = arith.constant 0 : index
    %c0_70 = arith.constant 0 : index
    %87 = vector.load %arg10[%c4_68, %c0_69, %c0_70] : memref<5x80x120xbf16, #tpu.memory_space<vmem>>, vector<1x80x120xbf16>
    %88 = vector.shape_cast %87 : vector<1x80x120xbf16> to vector<80x120xbf16>
    %cst_71 = arith.constant dense<0.000000e+00> : vector<40x120xf32>
    %89 = tpu.matmul %68, %88, %cst_71 {dimension_numbers = #tpu.dot_dimension_numbers<[1], [0], [0], [1], [0, 0, 1, 1], [], []>} : vector<40x80xbf16>, vector<80x120xbf16>, vector<40x120xf32> -> vector<40x120xf32>
    %c36_i32 = arith.constant 36 : i32
    %90 = tpu.dynamic_rotate %89 by %c36_i32 dim 0 : vector<40x120xf32>, i32 -> vector<40x120xf32>
    %91 = arith.addf %86, %90 : vector<40x120xf32>
    %c0_72 = arith.constant 0 : index
    %c0_73 = arith.constant 0 : index
    %92 = vector.load %arg12[%c0_72, %c0_73] : memref<8x40xbf16, #tpu.memory_space<vmem>>, vector<8x40xbf16>
    %93 = arith.truncf %91 : vector<40x120xf32> to vector<40x120xbf16>
    %cst_74 = arith.constant dense<0.000000e+00> : vector<8x120xf32>
    %94 = tpu.matmul %92, %93, %cst_74 {dimension_numbers = #tpu.dot_dimension_numbers<[1], [0], [0], [1], [0, 0, 1, 1], [], []>} : vector<8x40xbf16>, vector<40x120xbf16>, vector<8x120xf32> -> vector<8x120xf32>
    %c0_75 = arith.constant 0 : index
    %c0_76 = arith.constant 0 : index
    %95 = vector.load %arg11[%c0_75, %c0_76] : memref<1x120xf32, #tpu.memory_space<vmem>>, vector<1x120xf32>
    %96 = vector.broadcast %95 : vector<1x120xf32> to vector<8x120xf32>
    %97 = arith.addf %94, %96 : vector<8x120xf32>
    %98 = math.tanh %97 : vector<8x120xf32>
    %99 = arith.truncf %98 : vector<8x120xf32> to vector<8x120xbf16>
    %c0_77 = arith.constant 0 : index
    %c0_78 = arith.constant 0 : index
    %100 = vector.load %arg13[%c0_77, %c0_78] : memref<120x32xbf16, #tpu.memory_space<vmem>>, vector<120x32xbf16>
    %cst_79 = arith.constant dense<0.000000e+00> : vector<8x32xf32>
    %101 = tpu.matmul %99, %100, %cst_79 {dimension_numbers = #tpu.dot_dimension_numbers<[1], [0], [0], [1], [0, 0, 1, 1], [], []>} : vector<8x120xbf16>, vector<120x32xbf16>, vector<8x32xf32> -> vector<8x32xf32>
    %c0_80 = arith.constant 0 : index
    %c0_81 = arith.constant 0 : index
    %102 = vector.load %arg14[%c0_80, %c0_81] : memref<1x32xf32, #tpu.memory_space<vmem>>, vector<1x32xf32>
    %103 = vector.broadcast %102 : vector<1x32xf32> to vector<8x32xf32>
    %104 = arith.addf %101, %103 : vector<8x32xf32>
    %105 = math.tanh %104 : vector<8x32xf32>
    %106 = arith.truncf %105 : vector<8x32xf32> to vector<8x32xbf16>
    %c0_82 = arith.constant 0 : index
    %c0_83 = arith.constant 0 : index
    %107 = vector.load %arg15[%c0_82, %c0_83] : memref<32x64xbf16, #tpu.memory_space<vmem>>, vector<32x64xbf16>
    %cst_84 = arith.constant dense<0.000000e+00> : vector<8x64xf32>
    %108 = tpu.matmul %106, %107, %cst_84 {dimension_numbers = #tpu.dot_dimension_numbers<[1], [0], [0], [1], [0, 0, 1, 1], [], []>} : vector<8x32xbf16>, vector<32x64xbf16>, vector<8x64xf32> -> vector<8x64xf32>
    %c0_85 = arith.constant 0 : index
    %c0_86 = arith.constant 0 : index
    %109 = vector.load %arg16[%c0_85, %c0_86] : memref<1x64xf32, #tpu.memory_space<vmem>>, vector<1x64xf32>
    %110 = vector.broadcast %109 : vector<1x64xf32> to vector<8x64xf32>
    %111 = arith.addf %108, %110 : vector<8x64xf32>
    %c0_87 = arith.constant 0 : index
    %c0_88 = arith.constant 0 : index
    %112 = vector.load %arg17[%c0_87, %c0_88] : memref<8x64xf32, #tpu.memory_space<vmem>>, vector<8x64xf32>
    tpu.vector_store %arg17[%c0_87, %c0_88], %111 {strides = array<i32>} : memref<8x64xf32, #tpu.memory_space<vmem>>, vector<8x64xf32>,
    return
  }
  func.func @transform_0(%arg0: i32) -> (i32, i32) {
    %c0_i32 = arith.constant 0 : i32
    %c0_i32_0 = arith.constant 0 : i32
    return %arg0, %c0_i32 : i32, i32
  }
  func.func @transform_1(%arg0: i32) -> (i32, i32, i32) {
    %c0_i32 = arith.constant 0 : i32
    %c0_i32_0 = arith.constant 0 : i32
    %c0_i32_1 = arith.constant 0 : i32
    %c0_i32_2 = arith.constant 0 : i32
    return %c0_i32, %c0_i32_0, %c0_i32_1 : i32, i32, i32
  }
  func.func @transform_2(%arg0: i32) -> (i32, i32) {
    %c0_i32 = arith.constant 0 : i32
    %c0_i32_0 = arith.constant 0 : i32
    %c0_i32_1 = arith.constant 0 : i32
    return %c0_i32, %c0_i32_0 : i32, i32
  }
  func.func @transform_3(%arg0: i32) -> (i32, i32) {
    %c0_i32 = arith.constant 0 : i32
    %c0_i32_0 = arith.constant 0 : i32
    %c0_i32_1 = arith.constant 0 : i32
    return %c0_i32, %c0_i32_0 : i32, i32
  }
  func.func @transform_4(%arg0: i32) -> (i32, i32) {
    %c0_i32 = arith.constant 0 : i32
    %c0_i32_0 = arith.constant 0 : i32
    %c0_i32_1 = arith.constant 0 : i32
    return %c0_i32, %c0_i32_0 : i32, i32
  }
  func.func @transform_5(%arg0: i32) -> (i32, i32, i32) {
    %c0_i32 = arith.constant 0 : i32
    %c0_i32_0 = arith.constant 0 : i32
    %c0_i32_1 = arith.constant 0 : i32
    %c0_i32_2 = arith.constant 0 : i32
    return %c0_i32, %c0_i32_0, %c0_i32_1 : i32, i32, i32
  }
  func.func @transform_6(%arg0: i32) -> (i32, i32) {
    %c0_i32 = arith.constant 0 : i32
    %c0_i32_0 = arith.constant 0 : i32
    %c0_i32_1 = arith.constant 0 : i32
    return %c0_i32, %c0_i32_0 : i32, i32
  }
  func.func @transform_7(%arg0: i32) -> (i32, i32) {
    %c0_i32 = arith.constant 0 : i32
    %c0_i32_0 = arith.constant 0 : i32
    %c0_i32_1 = arith.constant 0 : i32
    return %c0_i32, %c0_i32_0 : i32, i32
  }
  func.func @transform_8(%arg0: i32) -> (i32, i32) {
    %c0_i32 = arith.constant 0 : i32
    %c0_i32_0 = arith.constant 0 : i32
    %c0_i32_1 = arith.constant 0 : i32
    return %c0_i32, %c0_i32_0 : i32, i32
  }
  func.func @transform_9(%arg0: i32) -> (i32, i32, i32) {
    %c0_i32 = arith.constant 0 : i32
    %c0_i32_0 = arith.constant 0 : i32
    %c0_i32_1 = arith.constant 0 : i32
    %c0_i32_2 = arith.constant 0 : i32
    return %c0_i32, %c0_i32_0, %c0_i32_1 : i32, i32, i32
  }
  func.func @transform_10(%arg0: i32) -> (i32, i32) {
    %c0_i32 = arith.constant 0 : i32
    %c0_i32_0 = arith.constant 0 : i32
    %c0_i32_1 = arith.constant 0 : i32
    return %c0_i32, %c0_i32_0 : i32, i32
  }
  func.func @transform_11(%arg0: i32) -> (i32, i32) {
    %c0_i32 = arith.constant 0 : i32
    %c0_i32_0 = arith.constant 0 : i32
    %c0_i32_1 = arith.constant 0 : i32
    return %c0_i32, %c0_i32_0 : i32, i32
  }
  func.func @transform_12(%arg0: i32) -> (i32, i32) {
    %c0_i32 = arith.constant 0 : i32
    %c0_i32_0 = arith.constant 0 : i32
    %c0_i32_1 = arith.constant 0 : i32
    return %c0_i32, %c0_i32_0 : i32, i32
  }
  func.func @transform_13(%arg0: i32) -> (i32, i32) {
    %c0_i32 = arith.constant 0 : i32
    %c0_i32_0 = arith.constant 0 : i32
    %c0_i32_1 = arith.constant 0 : i32
    return %c0_i32, %c0_i32_0 : i32, i32
  }
  func.func @transform_14(%arg0: i32) -> (i32, i32) {
    %c0_i32 = arith.constant 0 : i32
    %c0_i32_0 = arith.constant 0 : i32
    %c0_i32_1 = arith.constant 0 : i32
    return %c0_i32, %c0_i32_0 : i32, i32
  }
  func.func @transform_15(%arg0: i32) -> (i32, i32) {
    %c0_i32 = arith.constant 0 : i32
    %c0_i32_0 = arith.constant 0 : i32
    %c0_i32_1 = arith.constant 0 : i32
    return %c0_i32, %c0_i32_0 : i32, i32
  }
  func.func @transform_16(%arg0: i32) -> (i32, i32) {
    %c0_i32 = arith.constant 0 : i32
    %c0_i32_0 = arith.constant 0 : i32
    return %arg0, %c0_i32 : i32, i32
  }
}

</mosaic_0001>

<bundles_post_ra>
// kernel: tile.13
= control target key start
LH: loop header
LB: loop body
LE: loop exit
PB: predicated region body
PF: predicated region fallthrough
CT: control target
= control target key end

     0   :  { %s40_s0 = inlined_call_operand.vmem [shape: f32[6], index: 0, kind: input, shape index: {}]   ;;  %s41_s1 = inlined_call_operand.vmem [shape: f32[28,6], index: 1, kind: output, shape index: {}]  }
   0x1   :  { %v4_v0 = vld [vmem:[%s40_s0] ss:$0 sm:$0xff] }
   0x2   :  { %5 = vst [vmem:[%s41_s1] sm:$0xff] %v4_v0  ;;  %12 = vst [vmem:[%s41_s1 + $0x8] sm:$0xff] %v4_v0 }
   0x3   :  { %13 = vst [vmem:[%s41_s1 + $0x10] sm:$0xff] %v4_v0  ;;  %14 = vst [vmem:[%s41_s1 + $0x18] sm:$0xff] %v4_v0 }

// kernel: tile.14
= control target key start
LH: loop header
LB: loop body
LE: loop exit
PB: predicated region body
PF: predicated region fallthrough
CT: control target
= control target key end

     0   :  { %vm9_vm0 = vcmask 15360   ;;  %s247_s12 = smov 126   ;;  %s248_s13 = smov 114   ;;  %vm3_vm1 = vcmask 48128   ;;  %vm13_vm2 = vcmask 31744   ;;  %vm16_vm3 = vcmask 1048560   ;;  %s377_s0 = inlined_call_operand.vmem [shape: f32[28,6], index: 0, kind: input, shape index: {}]   ;;  %s378_s1 = inlined_call_operand.vmem [shape: f32[1,168], index: 1, kind: output, shape index: {}]  }
   0x1   :  { %v191_v0 = vld [vmem:[%s377_s0 + $0x15] sm:$0x1]   ;;  %v194_v3 = vld [vmem:[%s377_s0 + $0x13] sm:$0x1]   ;;  %v193_v4 = vld [vmem:[%s377_s0 + $0x14] sm:$0x1]  }
   0x2   :  { %v192_v1 = vld [vmem:[%s377_s0 + $0x15] sm:$0x1]   ;;  %26 = vrot.lane.b32.xlu1 %v194_v3, %s248_s13  ;;  %v195_v5 = vld [vmem:[%s377_s0 + $0x12] sm:$0x1]   ;;  %s249_s18 = smov 120   ;;  %s250_s19 = smov 108  }
   0x3   :  { %v10_v2 = vsel %vm9_vm0, %v192_v1, %v191_v0  ;;  %v196_v6 = vld [vmem:[%s377_s0 + $0x11] sm:$0x1]   ;;  %v197_v7 = vld [vmem:[%s377_s0 + $0x10] sm:$0x1]   ;;  %s251_s24 = smov 102   ;;  %s252_s25 = smov 96  }
   0x4   :  { %11 = vrot.lane.b32.xlu0 %v10_v2, %s247_s12  ;;  %v198_v8 = vld [vmem:[%s377_s0 + $0xf] sm:$0x1]   ;;  %v199_v9 = vld [vmem:[%s377_s0 + $0xe] sm:$0x1]   ;;  %s253_s30 = smov 90   ;;  %s254_s2 = smov 84  }
   0x5   :  { %v2_v10 = vld [vmem:[%s377_s0] sm:$0x1]   ;;  %v200_v11 = vld [vmem:[%s377_s0 + $0xd] sm:$0x1]   ;;  %v201_v12 = vld [vmem:[%s377_s0 + $0xc] sm:$0x1]  }
   0x6   :  { %32 = vrot.lane.b32.xlu1 %v195_v5, %s250_s19  ;;  %4 = vst.msk [vmem:[#allocation0] sm:$0x1] %vm3_vm1, %v2_v10   ;;  %s255_s9 = smov 78   ;;  %s256_s10 = smov 72   ;;  %v202_v13 = vld [vmem:[%s377_s0 + $0xb] sm:$0x1]  }
   0x7   :  { %v203_v14 = vld [vmem:[%s377_s0 + $0xa] sm:$0x1]   ;;  %s257_s15 = smov 66   ;;  %s258_s16 = smov 60   ;;  %v204_v15 = vld [vmem:[%s377_s0 + $0x9] sm:$0x1]  }
   0x8   :  { %20 = vrot.lane.b32.xlu0 %v193_v4, %s249_s18  ;;  %v205_v16 = vld [vmem:[%s377_s0 + $0x8] sm:$0x1]   ;;  %s259_s21 = smov 54   ;;  %s260_s22 = smov 48   ;;  %v206_v17 = vld [vmem:[%s377_s0 + $0x7] sm:$0x1]  }
   0x9   :  { %v207_v18 = vld [vmem:[%s377_s0 + $0x6] sm:$0x1]   ;;  %s261_s27 = smov 42   ;;  %s262_s28 = smov 36   ;;  %v208_v19 = vld [vmem:[%s377_s0 + $0x1b] sm:$0x1]  }
   0xa   :  { %44 = vrot.lane.b32.xlu1 %v197_v7, %s252_s25  ;;  %v209_v20 = vld [vmem:[%s377_s0 + $0x5] sm:$0x1]   ;;  %s263_s4 = smov 34   ;;  %s264_s5 = smov 30   ;;  %v210_v21 = vld [vmem:[%s377_s0 + $0x1a] sm:$0x1]  }
   0xb   :  { %v211_v22 = vld [vmem:[%s377_s0 + $0x4] sm:$0x1]   ;;  %s266_s11 = smov 24   ;;  %v212_v23 = vld [vmem:[%s377_s0 + $0x19] sm:$0x1]   ;;  %s268_s17 = smov 18  }
   0xc   :  { %38 = vrot.lane.b32.xlu0 %v196_v6, %s251_s24  ;;  %v213_v24 = vld [vmem:[%s377_s0 + $0x3] sm:$0x1]   ;;  %v214_v25 = vld [vmem:[%s377_s0 + $0x18] sm:$0x1]   ;;  %v215_v26 = vld [vmem:[%s377_s0 + $0x2] sm:$0x1]  }
   0xd   :  { %s270_s23 = smov 12   ;;  %v216_v27 = vld [vmem:[%s377_s0 + $0x17] sm:$0x1]   ;;  %v217_v28 = vld [vmem:[%s377_s0 + $0x1] sm:$0x1]   ;;  %s272_s29 = smov 6  }
   0xe   :  { %56 = vrot.lane.b32.xlu1 %v199_v9, %s254_s2  ;;  %v218_v29 = vld [vmem:[%s377_s0 + $0x16] sm:$0x1]   ;;  %s273_s0 = smov 4   ;;  %vm22_vm4 = vcmask 1032128   ;;  %vm28_vm5 = vcmask 982928   ;;  %vm34_vm6 = vcmask 933728  }
   0xf   :  { %vm40_vm7 = vcmask 884528   ;;  %vm46_vm8 = vcmask 835328   ;;  %vm52_vm9 = vcmask 786128   ;;  %vm58_vm10 = vcmask 736928  }
  0x10   :  { %50 = vrot.lane.b32.xlu0 %v198_v8, %s253_s30  ;;  %vm64_vm11 = vcmask 687728   ;;  %vm70_vm12 = vcmask 638528   ;;  %vm76_vm13 = vcmask 589328   ;;  %vm82_vm14 = vcmask 540128  }
  0x11   :  { %vm88_vm15 = vcmask 490928   ;;  %vm94_vm0 = vcmask 441728   ;;  %vm100_vm1 = vcmask 392528  }
  0x12   :  { %68 = vrot.lane.b32.xlu1 %v201_v12, %s256_s10  ;;  %s265_s10 = smov 28  }
  0x14   :  { %62 = vrot.lane.b32.xlu0 %v200_v11, %s255_s9 }
  0x16   :  { %80 = vrot.lane.b32.xlu1 %v203_v14, %s258_s16  ;;  %s267_s16 = smov 22  }
  0x18   :  { %74 = vrot.lane.b32.xlu0 %v202_v13, %s257_s15 }
  0x1a   :  { %92 = vrot.lane.b32.xlu1 %v205_v16, %s260_s22  ;;  %s269_s22 = smov 16  }
  0x1c   :  { %86 = vrot.lane.b32.xlu0 %v204_v15, %s259_s21 }
  0x1e   :  { %104 = vrot.lane.b32.xlu1 %v207_v18, %s262_s28  ;;  %s271_s28 = smov 10  }
  0x20   :  { %98 = vrot.lane.b32.xlu0 %v206_v17, %s261_s27 }
  0x22   :  { %117 = vrot.lane.b32.xlu1 %v209_v20, %s264_s5 }
  0x24   :  { %110 = vrot.lane.b32.xlu0 %v208_v19, %s263_s4 }
  0x26   :  { %130 = vrot.lane.b32.xlu1 %v211_v22, %s266_s11 }
  0x28   :  { %123 = vrot.lane.b32.xlu0 %v210_v21, %s265_s10 }
  0x2a   :  { %143 = vrot.lane.b32.xlu1 %v213_v24, %s268_s17 }
  0x2c   :  { %136 = vrot.lane.b32.xlu0 %v212_v23, %s267_s16 }
  0x2e   :  { %156 = vrot.lane.b32.xlu1 %v215_v26, %s270_s23 }
  0x30   :  { %149 = vrot.lane.b32.xlu0 %v214_v25, %s269_s22 }
  0x32   :  { %169 = vrot.lane.b32.xlu1 %v217_v28, %s272_s29 }
  0x34   :  { %162 = vrot.lane.b32.xlu0 %v216_v27, %s271_s28 }
  0x38   :  { %175 = vrot.lane.b32.xlu0 %v218_v29, %s273_s0 }
  0x74   :  { %v27_v31 = vpop.permute.xlu1 %26  }
  0x76   :  { %v12_v30 = vpop.permute.xlu0 %11  }
  0x77   :  { %15 = vst.msk [vmem:[#allocation0 + $0x8] sm:$0x1] %vm13_vm2, %v12_v30   ;;  %vm106_vm2 = vcmask 343328  }
  0x78   :  { %17 = vst.msk [vmem:[#allocation0] sm:$0x1] %vm16_vm3, %v12_v30   ;;  %v33_v33 = vpop.permute.xlu1 %32   ;;  %vm112_vm3 = vcmask 326928  }
  0x7a   :  { %v21_v32 = vpop.permute.xlu0 %20  }
  0x7b   :  { %23 = vst.msk [vmem:[#allocation0] sm:$0x1] %vm22_vm4, %v21_v32   ;;  %vm119_vm4 = vcmask 294128  }
  0x7c   :  { %29 = vst.msk [vmem:[#allocation0] sm:$0x1] %vm28_vm5, %v27_v31   ;;  %v45_v35 = vpop.permute.xlu1 %44   ;;  %vm125_vm5 = vcmask 277728  }
  0x7d   :  { %35 = vst.msk [vmem:[#allocation0] sm:$0x1] %vm34_vm6, %v33_v33   ;;  %vm132_vm6 = vcmask 244928  }
  0x7e   :  { %v39_v34 = vpop.permute.xlu0 %38  }
  0x7f   :  { %41 = vst.msk [vmem:[#allocation0] sm:$0x1] %vm40_vm7, %v39_v34   ;;  %vm138_vm7 = vcmask 228528  }
  0x80   :  { %47 = vst.msk [vmem:[#allocation0] sm:$0x1] %vm46_vm8, %v45_v35   ;;  %v57_v37 = vpop.permute.xlu1 %56   ;;  %vm145_vm8 = vcmask 195728  }
  0x82   :  { %v51_v36 = vpop.permute.xlu0 %50  }
  0x83   :  { %53 = vst.msk [vmem:[#allocation0] sm:$0x1] %vm52_vm9, %v51_v36   ;;  %vm151_vm9 = vcmask 179328  }
  0x84   :  { %59 = vst.msk [vmem:[#allocation0] sm:$0x1] %vm58_vm10, %v57_v37   ;;  %v69_v39 = vpop.permute.xlu1 %68   ;;  %vm158_vm10 = vcmask 146528  }
  0x86   :  { %v63_v38 = vpop.permute.xlu0 %62  }
  0x87   :  { %65 = vst.msk [vmem:[#allocation0] sm:$0x1] %vm64_vm11, %v63_v38   ;;  %vm164_vm11 = vcmask 130128  }
  0x88   :  { %71 = vst.msk [vmem:[#allocation0] sm:$0x1] %vm70_vm12, %v69_v39   ;;  %v81_v41 = vpop.permute.xlu1 %80   ;;  %vm171_vm12 = vcmask 97328  }
  0x8a   :  { %v75_v40 = vpop.permute.xlu0 %74  }
  0x8b   :  { %77 = vst.msk [vmem:[#allocation0] sm:$0x1] %vm76_vm13, %v75_v40   ;;  %vm177_vm13 = vcmask 80928  }
  0x8c   :  { %83 = vst.msk [vmem:[#allocation0] sm:$0x1] %vm82_vm14, %v81_v41   ;;  %v93_v43 = vpop.permute.xlu1 %92  }
  0x8e   :  { %v87_v42 = vpop.permute.xlu0 %86  }
  0x8f   :  { %89 = vst.msk [vmem:[#allocation0] sm:$0x1] %vm88_vm15, %v87_v42  }
  0x90   :  { %95 = vst.msk [vmem:[#allocation0] sm:$0x1] %vm94_vm0, %v93_v43   ;;  %v105_v45 = vpop.permute.xlu1 %104  }
  0x92   :  { %v99_v44 = vpop.permute.xlu0 %98  }
  0x93   :  { %101 = vst.msk [vmem:[#allocation0] sm:$0x1] %vm100_vm1, %v99_v44  }
  0x94   :  { %107 = vst.msk [vmem:[#allocation0] sm:$0x1] %vm106_vm2, %v105_v45   ;;  %v118_v47 = vpop.permute.xlu1 %117  }
  0x95   :  { %120 = vst.msk [vmem:[#allocation0] sm:$0x1] %vm119_vm4, %v118_v47  }
  0x96   :  { %v111_v46 = vpop.permute.xlu0 %110  }
  0x97   :  { %114 = vst.msk [vmem:[#allocation0 + $0x8] sm:$0x1] %vm112_vm3, %v111_v46  }
  0x98   :  { %v131_v49 = vpop.permute.xlu1 %130  }
  0x99   :  { %133 = vst.msk [vmem:[#allocation0] sm:$0x1] %vm132_vm6, %v131_v49  }
  0x9a   :  { %v124_v48 = vpop.permute.xlu0 %123  }
  0x9b   :  { %127 = vst.msk [vmem:[#allocation0 + $0x8] sm:$0x1] %vm125_vm5, %v124_v48  }
  0x9c   :  { %v144_v51 = vpop.permute.xlu1 %143  }
  0x9d   :  { %146 = vst.msk [vmem:[#allocation0] sm:$0x1] %vm145_vm8, %v144_v51  }
  0x9e   :  { %v137_v50 = vpop.permute.xlu0 %136  }
  0x9f   :  { %140 = vst.msk [vmem:[#allocation0 + $0x8] sm:$0x1] %vm138_vm7, %v137_v50  }
  0xa0   :  { %v157_v53 = vpop.permute.xlu1 %156  }
  0xa1   :  { %159 = vst.msk [vmem:[#allocation0] sm:$0x1] %vm158_vm10, %v157_v53  }
  0xa2   :  { %v150_v52 = vpop.permute.xlu0 %149  }
  0xa3   :  { %153 = vst.msk [vmem:[#allocation0 + $0x8] sm:$0x1] %vm151_vm9, %v150_v52  }
  0xa4   :  { %v170_v55 = vpop.permute.xlu1 %169  }
  0xa5   :  { %172 = vst.msk [vmem:[#allocation0] sm:$0x1] %vm171_vm12, %v170_v55  }
  0xa6   :  { %v163_v54 = vpop.permute.xlu0 %162  }
  0xa7   :  { %166 = vst.msk [vmem:[#allocation0 + $0x8] sm:$0x1] %vm164_vm11, %v163_v54  }
  0xaa   :  { %v176_v56 = vpop.permute.xlu0 %175  }
  0xab   :  { %179 = vst.msk [vmem:[#allocation0 + $0x8] sm:$0x1] %vm177_vm13, %v176_v56  }
  0xac   :  { %v183_v57 = vld [vmem:[#allocation0] sm:$0x1] }
  0xad   :  { %185 = vst [vmem:[%s378_s1] sm:$0x1] %v183_v57 }
  0xb2   :  { %v187_v58 = vld [vmem:[#allocation0 + $0x8] sm:$0x1] }
  0xb3   :  { %219 = vst [vmem:[%s378_s1 + $0x1] sm:$0x1] %v187_v58 }

// kernel: tile.18
= control target key start
LH: loop header
LB: loop body
LE: loop exit
PB: predicated region body
PF: predicated region fallthrough
CT: control target
= control target key end

     0   :  { %s28_s0 = inlined_call_operand.vmem [shape: f32[16], index: 0, kind: input, shape index: {}]   ;;  %s29_s1 = inlined_call_operand.vmem [shape: f32[10,16], index: 1, kind: output, shape index: {}]  }
   0x1   :  { %v4_v0 = vld [vmem:[%s28_s0] ss:$0 sm:$0xff] }
   0x2   :  { %5 = vst [vmem:[%s29_s1] sm:$0xff] %v4_v0  ;;  %8 = vst [vmem:[%s29_s1 + $0x8] sm:$0xff] %v4_v0 }

// kernel: tile.19
= control target key start
LH: loop header
LB: loop body
LE: loop exit
PB: predicated region body
PF: predicated region fallthrough
CT: control target
= control target key end

     0   :  { %s75_s10 = smov 112   ;;  %s76_s11 = smov 80   ;;  %vm4_vm0 = vcmask 130048   ;;  %vm10_vm1 = vcmask 1048448   ;;  %vm16_vm2 = vcmask 917248   ;;  %vm22_vm3 = vcmask 786048   ;;  %s122_s0 = inlined_call_operand.vmem [shape: f32[10,16], index: 0, kind: input, shape index: {}]   ;;  %s123_s1 = inlined_call_operand.vmem [shape: f32[1,160], index: 1, kind: output, shape index: {}]  }
   0x1   :  { %v60_v0 = vld [vmem:[%s122_s0 + $0x7] sm:$0x1]   ;;  %v62_v1 = vld [vmem:[%s122_s0 + $0x5] sm:$0x1]   ;;  %v61_v2 = vld [vmem:[%s122_s0 + $0x6] sm:$0x1]  }
   0x2   :  { %8 = vrot.lane.b32.xlu0 %v60_v0, %s75_s10  ;;  %20 = vrot.lane.b32.xlu1 %v62_v1, %s76_s11  ;;  %v63_v3 = vld [vmem:[%s122_s0 + $0x4] sm:$0x1]   ;;  %s2_s16 = smov 3  ;;  %s77_s17 = smov 96   ;;  %v64_v5 = vld [vmem:[%s122_s0 + $0x3] sm:$0x1]  }
   0x3   :  { %s78_s18 = smov 64   ;;  %v3_v4 = vld [vmem:[%s122_s0] ss:$8 sm:%s2_s16]   ;;  %v65_v6 = vld [vmem:[%s122_s0 + $0x2] sm:$0x1]   ;;  %s43_s25 = smov 3 }
   0x4   :  { %5 = vst.msk [vmem:[#allocation0] ss:$8 sm:$0x3] %vm4_vm0, %v3_v4   ;;  %s79_s26 = smov 48   ;;  %s80_s27 = smov 32   ;;  %vm28_vm4 = vcmask 654848  }
   0x5   :  { %v66_v7 = vld [vmem:[%s122_s0 + $0x1] ss:$8 sm:%s43_s25]   ;;  %s81_s0 = smov 16   ;;  %vm34_vm5 = vcmask 523648   ;;  %vm40_vm6 = vcmask 392448   ;;  %vm47_vm7 = vcmask 261248  }
   0x6   :  { %14 = vrot.lane.b32.xlu0 %v61_v2, %s77_s17  ;;  %26 = vrot.lane.b32.xlu1 %v63_v3, %s78_s18 }
   0xa   :  { %32 = vrot.lane.b32.xlu0 %v64_v5, %s79_s26  ;;  %38 = vrot.lane.b32.xlu1 %v65_v6, %s80_s27 }
   0xe   :  { %45 = vrot.lane.b32.xlu0 %v66_v7, %s81_s0 }
  0x74   :  { %v9_v8 = vpop.permute.xlu0 %8   ;;  %v21_v9 = vpop.permute.xlu1 %20  }
  0x75   :  { %11 = vst.msk [vmem:[#allocation0] sm:$0x1] %vm10_vm1, %v9_v8  }
  0x78   :  { %v15_v10 = vpop.permute.xlu0 %14   ;;  %v27_v11 = vpop.permute.xlu1 %26  }
  0x79   :  { %17 = vst.msk [vmem:[#allocation0] sm:$0x1] %vm16_vm2, %v15_v10  }
  0x7a   :  { %23 = vst.msk [vmem:[#allocation0] sm:$0x1] %vm22_vm3, %v21_v9  }
  0x7b   :  { %29 = vst.msk [vmem:[#allocation0] sm:$0x1] %vm28_vm4, %v27_v11  }
  0x7c   :  { %v33_v12 = vpop.permute.xlu0 %32   ;;  %v39_v13 = vpop.permute.xlu1 %38  }
  0x7d   :  { %35 = vst.msk [vmem:[#allocation0] sm:$0x1] %vm34_vm5, %v33_v12  }
  0x7e   :  { %41 = vst.msk [vmem:[#allocation0] sm:$0x1] %vm40_vm6, %v39_v13  }
  0x80   :  { %v46_v14 = vpop.permute.xlu0 %45  }
  0x81   :  { %48 = vst.msk [vmem:[#allocation0] ss:$8 sm:$0x3] %vm47_vm7, %v46_v14  }
  0x88   :  { %v52_v15 = vld [vmem:[#allocation0] sm:$0x1]  ;;  %v56_v16 = vld [vmem:[#allocation0 + $0x8] sm:$0x1] }
  0x89   :  { %54 = vst [vmem:[%s123_s1] sm:$0x1] %v52_v15  ;;  %67 = vst [vmem:[%s123_s1 + $0x1] sm:$0x1] %v56_v16 }

// kernel: lenet5_encoder.1
= control target key start
LH: loop header
LB: loop body
LE: loop exit
PB: predicated region body
PF: predicated region fallthrough
CT: control target
= control target key end

     0   :  { %v8678_v1 = vmov 0   ;;  %vm195_vm0 = vcmask 261120   ;;  %v501_v37 = vlaneseq  ;;  %vm2493_vm5 = vcmask 1043456   ;;  %s8658_s1 = inlined_call_operand.vmem [shape: bf16[5,32,168], index: 1, kind: input, shape index: {}]   ;;  %s8659_s0 = inlined_call_operand.vmem [shape: bf16[256,32], index: 0, kind: input, shape index: {}]   ;;  %s8660_s2 = inlined_call_operand.vmem [shape: f32[1,168], index: 2, kind: input, shape index: {}]   ;;  %s8661_s3 = inlined_call_operand.vmem [shape: bf16[112,256], index: 3, kind: input, shape index: {}]   ;;  %s8662_s4 = inlined_call_operand.vmem [shape: bf16[168,84], index: 4, kind: input, shape index: {}]   ;;  %s8663_s5 = inlined_call_operand.vmem [shape: bf16[5,84,160], index: 5, kind: input, shape index: {}]   ;;  %s8664_s7 = inlined_call_operand.vmem [shape: bf16[40,112], index: 7, kind: input, shape index: {}]   ;;  %s8665_s8 = inlined_call_operand.vmem [shape: bf16[160,80], index: 8, kind: input, shape index: {}]   ;;  %s8666_s6 = inlined_call_operand.vmem [shape: f32[1,160], index: 6, kind: input, shape index: {}]   ;;  %s8667_s9 = inlined_call_operand.vmem [shape: bf16[5,80,120], index: 9, kind: input, shape index: {}]   ;;  %s8668_s12 = inlined_call_operand.vmem [shape: bf16[120,32], index: 12, kind: input, shape index: {}]   ;;  %s8669_s11 = inlined_call_operand.vmem [shape: bf16[8,40], index: 11, kind: input, shape index: {}]   ;;  %s8670_s10 = inlined_call_operand.vmem [shape: f32[1,120], index: 10, kind: input, shape index: {}]   ;;  %s8671_s14 = inlined_call_operand.vmem [shape: bf16[32,64], index: 14, kind: input, shape index: {}]   ;;  %s8672_s13 = inlined_call_operand.vmem [shape: f32[1,32], index: 13, kind: input, shape index: {}]   ;;  %s8673_s15 = inlined_call_operand.vmem [shape: f32[1,64], index: 15, kind: input, shape index: {}]   ;;  %s8674_s16 = inlined_call_operand.vmem [shape: f32[8,64], index: 16, kind: output, shape index: {}]  }
   0x1   :  { %8689 = sst [smem:[#allocation32_spill]] %s8658_s1  ;;  %276 = vmatprep.mubr.bf16.mxu0 %v8678_v1  ;;  %620 = vmatprep.mubr.bf16.mxu1 %v8678_v1  ;;  %v6073_v9 = vld [vmem:[%s8659_s0] sm:$0xff]   ;;  %v6090_v12 = vld [vmem:[%s8659_s0 + $0x8] sm:$0xff]   ;;  %v6107_v15 = vld [vmem:[%s8659_s0 + $0x10] sm:$0xff]   ;;  %vm2471_vm6 = vcmask 326656   ;;  %vm2693_vm7 = vcmask 1041408  }
   0x2   :  { %s8690_s23 = sld [smem:[#allocation32_spill]]  ;;  %v6133_v21 = vld [vmem:[%s8659_s0 + $0x18] sm:$0xff]   ;;  %v6144_v22 = vld [vmem:[%s8659_s0 + $0x20] sm:$0xff]   ;;  %v6155_v23 = vld [vmem:[%s8659_s0 + $0x28] sm:$0xff]   ;;  %v6345_v38 = vshrl.u32 %v501_v37, 7  ;;  %vm2671_vm8 = vcmask 687104  }
   0x3   :  { %v6166_v24 = vld [vmem:[%s8659_s0 + $0x30] sm:$0xff]   ;;  %v6177_v25 = vld [vmem:[%s8659_s0 + $0x38] sm:$0xff]   ;;  %v6188_v26 = vld [vmem:[%s8659_s0 + $0x40] sm:$0xff]   ;;  %vm3903_vm9 = vcmask 916480   ;;  %vm5958_vm10 = vmmov 0   ;;  %vm4179_vm11 = vcmask 654336  }
   0x4   :  { %v6199_v27 = vld [vmem:[%s8659_s0 + $0x48] sm:$0xff]   ;;  %v6210_v28 = vld [vmem:[%s8659_s0 + $0x50] sm:$0xff]   ;;  %v6221_v29 = vld [vmem:[%s8659_s0 + $0x58] sm:$0xff]   ;;  %vm503_vm1 = vcmp.lt.s32.totalorder %v6345_v38, 7  ;;  %vm1063_vm2 = vcmp.lt.s32.totalorder %v6345_v38, 6  ;;  %vm1474_vm3 = vcmp.lt.s32.totalorder %v6345_v38, 5 }
   0x5   :  { %v6232_v30 = vld [vmem:[%s8659_s0 + $0x60] sm:$0xff]   ;;  %v6243_v31 = vld [vmem:[%s8659_s0 + $0x68] sm:$0xff]   ;;  %v6254_v32 = vld [vmem:[%s8659_s0 + $0x70] sm:$0xff]   ;;  %vm1885_vm4 = vcmp.lt.s32.totalorder %v6345_v38, 4  ;;  %vm4803_vm12 = vcmask 982016   ;;  %vm4918_vm13 = vcmask 523264  }
   0x6   :  { %v6265_v33 = vld [vmem:[%s8659_s0 + $0x78] sm:$0xff]  }
   0x8   :  { %v5554_v0 = vld [vmem:[%s8690_s23 + $0x24] ss:$8 sps:$4 sm:$0xff]   ;;  %v5556_v2 = vld [vmem:[%s8690_s23 + $0x20] ss:$8 sps:$4 sm:$0xff]   ;;  %v5560_v5 = vld [vmem:[%s8690_s23 + $0x34] ss:$8 sps:$4 sm:$0xff]  }
   0x9   :  { %244 = vmatprep.subr.bf16.mxu0 %v5554_v0  ;;  %v5557_v3 = vld [vmem:[%s8690_s23 + $0x4] ss:$8 sps:$4 sm:$0xff]   ;;  %v5559_v4 = vld [vmem:[%s8690_s23] ss:$8 sps:$4 sm:$0xff]   ;;  %v5562_v6 = vld [vmem:[%s8690_s23 + $0x30] ss:$8 sps:$4 sm:$0xff]  }
   0xa   :  { %245 = vmatpush1.bf16.msra.mxu0 %v5556_v2  ;;  %588 = vmatprep.subr.bf16.mxu1 %v5557_v3  ;;  %v5563_v7 = vld [vmem:[%s8690_s23 + $0x14] ss:$8 sps:$4 sm:$0xff]   ;;  %v5565_v8 = vld [vmem:[%s8690_s23 + $0x10] ss:$8 sps:$4 sm:$0xff]   ;;  %v5568_v10 = vld [vmem:[%s8690_s23 + $0x40] ss:$8 sps:$4 sm:$0xff]  }
   0xb   :  { %589 = vmatpush1.bf16.msra.mxu1 %v5559_v4  ;;  %246 = vmatprep.subr.bf16.mxu0 %v5560_v5  ;;  %v5570_v11 = vld [vmem:[%s8690_s23 + $0x44] ss:$8 sps:$4 sm:$0xff]   ;;  %v5579_v13 = vld [vmem:[%s8690_s23 + $0x50] ss:$8 sps:$4 sm:$0xff]   ;;  %v5581_v14 = vld [vmem:[%s8690_s23 + $0x54] ss:$8 sps:$4 sm:$0xff]  }
   0xc   :  { %590 = vmatprep.subr.bf16.mxu1 %v5563_v7  ;;  %v5588_v16 = vld [vmem:[%s8690_s23 + $0x60] ss:$8 sps:$4 sm:$0xff]   ;;  %v5590_v17 = vld [vmem:[%s8690_s23 + $0x64] ss:$8 sps:$4 sm:$0xff]   ;;  %v5593_v18 = vld [vmem:[%s8690_s23 + $0x74] ss:$8 sps:$4 sm:$0xff]  }
   0xd   :  { %v5596_v19 = vld [vmem:[%s8690_s23 + $0x84] ss:$8 sps:$4 sm:$0xff]   ;;  %v5591_v20 = vld [vmem:[%s8690_s23 + $0x70] ss:$8 sps:$4 sm:$0xff]   ;;  %v5594_v34 = vld [vmem:[%s8690_s23 + $0x80] ss:$8 sps:$4 sm:$0xff]  }
   0xe   :  { %247 = vmatpush1.bf16.msra.mxu0 %v5562_v6  ;;  %v5599_v35 = vld [vmem:[%s8690_s23 + $0x94] ss:$8 sps:$4 sm:$0xff]   ;;  %v5597_v36 = vld [vmem:[%s8690_s23 + $0x90] ss:$8 sps:$4 sm:$0xff]  }
   0xf   :  { %591 = vmatpush1.bf16.msra.mxu1 %v5565_v8  ;;  %806 = vmatprep.subr.bf16.mxu0 %v5570_v11 }
  0x10   :  { %1217 = vmatprep.subr.bf16.mxu1 %v5590_v17 }
  0x11   :  { %4948 = vmatmul.mubr.msk.bf16.vlgmr.msra.gmra.mrb[0].mxu0 %vm195_vm0, %v6073_v9 }
  0x12   :  { %286 = vmatprep.mubr.bf16.mxu0 %v8678_v1  ;;  %807 = vmatpush1.bf16.msra.mxu0 %v5568_v10 }
  0x13   :  { %4968 = vmatmul.mubr.msk.bf16.vlgmr.msra.gmra.mrb[0].mxu1 %vm195_vm0, %v6073_v9  ;;  %808 = vmatprep.subr.bf16.mxu0 %v5581_v14 }
  0x14   :  { %630 = vmatprep.mubr.bf16.mxu1 %v8678_v1  ;;  %1218 = vmatpush1.bf16.msra.mxu1 %v5588_v16 }
  0x15   :  { %1219 = vmatprep.subr.bf16.mxu1 %v5593_v18 }
  0x16   :  { %809 = vmatpush1.bf16.msra.mxu0 %v5579_v13 }
  0x17   :  { %1628 = vmatprep.subr.bf16.mxu0 %v5596_v19 }
  0x18   :  { %1220 = vmatpush1.bf16.msra.mxu1 %v5591_v20 }
  0x19   :  { %4949 = vmatmul.mubr.msk.bf16.gmra.mrb[4].mxu0 %vm195_vm0, %v6090_v12 }
  0x1a   :  { %296 = vmatprep.mubr.bf16.mxu0 %v8678_v1 }
  0x1b   :  { %4969 = vmatmul.mubr.msk.bf16.gmra.mrb[4].mxu1 %vm195_vm0, %v6090_v12 }
  0x1c   :  { %640 = vmatprep.mubr.bf16.mxu1 %v8678_v1 }
  0x21   :  { %4950 = vmatmul.mubr.msk.bf16.gmra.mrb[8].mxu0 %vm195_vm0, %v6107_v15 }
  0x22   :  { %306 = vmatprep.mubr.bf16.mxu0 %v8678_v1 }
  0x23   :  { %4970 = vmatmul.mubr.msk.bf16.gmra.mrb[8].mxu1 %vm195_vm0, %v6107_v15 }
  0x24   :  { %650 = vmatprep.mubr.bf16.mxu1 %v8678_v1 }
  0x29   :  { %4951 = vmatmul.mubr.msk.bf16.gmra.mrb[12].mxu0 %vm195_vm0, %v6133_v21 }
  0x2a   :  { %316 = vmatprep.mubr.bf16.mxu0 %v8678_v1 }
  0x2b   :  { %4971 = vmatmul.mubr.msk.bf16.gmra.mrb[12].mxu1 %vm195_vm0, %v6133_v21 }
  0x2c   :  { %660 = vmatprep.mubr.bf16.mxu1 %v8678_v1 }
  0x31   :  { %4952 = vmatmul.mubr.msk.bf16.gmra.mrb[16].mxu0 %vm195_vm0, %v6144_v22 }
  0x32   :  { %326 = vmatprep.mubr.bf16.mxu0 %v8678_v1 }
  0x33   :  { %4972 = vmatmul.mubr.msk.bf16.gmra.mrb[16].mxu1 %vm195_vm0, %v6144_v22 }
  0x34   :  { %670 = vmatprep.mubr.bf16.mxu1 %v8678_v1 }
  0x39   :  { %4953 = vmatmul.mubr.msk.bf16.gmra.mrb[20].mxu0 %vm195_vm0, %v6155_v23 }
  0x3a   :  { %336 = vmatprep.mubr.bf16.mxu0 %v8678_v1 }
  0x3b   :  { %4973 = vmatmul.mubr.msk.bf16.gmra.mrb[20].mxu1 %vm195_vm0, %v6155_v23 }
  0x3c   :  { %680 = vmatprep.mubr.bf16.mxu1 %v8678_v1 }
  0x41   :  { %4954 = vmatmul.mubr.msk.bf16.gmra.mrb[24].mxu0 %vm195_vm0, %v6166_v24 }
  0x42   :  { %346 = vmatprep.mubr.bf16.mxu0 %v8678_v1 }
  0x43   :  { %4974 = vmatmul.mubr.msk.bf16.gmra.mrb[24].mxu1 %vm195_vm0, %v6166_v24 }
  0x44   :  { %690 = vmatprep.mubr.bf16.mxu1 %v8678_v1 }
  0x49   :  { %4955 = vmatmul.mubr.msk.bf16.gmra.mrb[28].mxu0 %vm195_vm0, %v6177_v25 }
  0x4a   :  { %356 = vmatprep.mubr.bf16.mxu0 %v8678_v1 }
  0x4b   :  { %4975 = vmatmul.mubr.msk.bf16.gmra.mrb[28].mxu1 %vm195_vm0, %v6177_v25 }
  0x4c   :  { %700 = vmatprep.mubr.bf16.mxu1 %v8678_v1 }
  0x51   :  { %4956 = vmatmul.mubr.msk.bf16.gmra.mrb[32].mxu0 %vm195_vm0, %v6188_v26 }
  0x52   :  { %366 = vmatprep.mubr.bf16.mxu0 %v8678_v1 }
  0x53   :  { %4976 = vmatmul.mubr.msk.bf16.gmra.mrb[32].mxu1 %vm195_vm0, %v6188_v26 }
  0x54   :  { %710 = vmatprep.mubr.bf16.mxu1 %v8678_v1 }
  0x59   :  { %4957 = vmatmul.mubr.msk.bf16.gmra.mrb[36].mxu0 %vm195_vm0, %v6199_v27 }
  0x5a   :  { %376 = vmatprep.mubr.bf16.mxu0 %v8678_v1 }
  0x5b   :  { %4977 = vmatmul.mubr.msk.bf16.gmra.mrb[36].mxu1 %vm195_vm0, %v6199_v27 }
  0x5c   :  { %720 = vmatprep.mubr.bf16.mxu1 %v8678_v1 }
  0x61   :  { %4958 = vmatmul.mubr.msk.bf16.gmra.mrb[40].mxu0 %vm195_vm0, %v6210_v28 }
  0x62   :  { %386 = vmatprep.mubr.bf16.mxu0 %v8678_v1 }
  0x63   :  { %4978 = vmatmul.mubr.msk.bf16.gmra.mrb[40].mxu1 %vm195_vm0, %v6210_v28 }
  0x64   :  { %730 = vmatprep.mubr.bf16.mxu1 %v8678_v1 }
  0x69   :  { %4959 = vmatmul.mubr.msk.bf16.gmra.mrb[44].mxu0 %vm195_vm0, %v6221_v29 }
  0x6a   :  { %396 = vmatprep.mubr.bf16.mxu0 %v8678_v1 }
  0x6b   :  { %4979 = vmatmul.mubr.msk.bf16.gmra.mrb[44].mxu1 %vm195_vm0, %v6221_v29 }
  0x6c   :  { %740 = vmatprep.mubr.bf16.mxu1 %v8678_v1 }
  0x71   :  { %4960 = vmatmul.mubr.msk.bf16.gmra.mrb[48].mxu0 %vm195_vm0, %v6232_v30 }
  0x72   :  { %406 = vmatprep.mubr.bf16.mxu0 %v8678_v1 }
  0x73   :  { %4980 = vmatmul.mubr.msk.bf16.gmra.mrb[48].mxu1 %vm195_vm0, %v6232_v30 }
  0x74   :  { %750 = vmatprep.mubr.bf16.mxu1 %v8678_v1 }
  0x79   :  { %4961 = vmatmul.mubr.msk.bf16.gmra.mrb[52].mxu0 %vm195_vm0, %v6243_v31 }
  0x7a   :  { %416 = vmatprep.mubr.bf16.mxu0 %v8678_v1 }
  0x7b   :  { %4981 = vmatmul.mubr.msk.bf16.gmra.mrb[52].mxu1 %vm195_vm0, %v6243_v31 }
  0x7c   :  { %760 = vmatprep.mubr.bf16.mxu1 %v8678_v1 }
  0x81   :  { %4962 = vmatmul.mubr.msk.bf16.gmra.mrb[56].mxu0 %vm195_vm0, %v6254_v32 }
  0x82   :  { %426 = vmatprep.mubr.bf16.mxu0 %v8678_v1 }
  0x83   :  { %4982 = vmatmul.mubr.msk.bf16.gmra.mrb[56].mxu1 %vm195_vm0, %v6254_v32 }
  0x84   :  { %770 = vmatprep.mubr.bf16.mxu1 %v8678_v1 }
  0x89   :  { %4963 = vmatmul.mubr.msk.bf16.gmra.mrb[60].mxu0 %vm195_vm0, %v6265_v33 }
  0x8a   :  { %838 = vmatprep.mubr.bf16.mxu0 %v8678_v1 }
  0x8b   :  { %4983 = vmatmul.mubr.msk.bf16.gmra.mrb[60].mxu1 %vm195_vm0, %v6265_v33 }
  0x8c   :  { %1249 = vmatprep.mubr.bf16.mxu1 %v8678_v1 }
  0x91   :  { %4992 = vmatmul.mubr.msk.bf16.vlgmr.msra.gmra.mrb[64].mxu0 %vm195_vm0, %v6073_v9 }
  0x92   :  { %848 = vmatprep.mubr.bf16.mxu0 %v8678_v1  ;;  %1629 = vmatpush1.bf16.msra.mxu0 %v5594_v34 }
  0x93   :  { %5016 = vmatmul.mubr.msk.bf16.vlgmr.msra.gmra.mrb[64].mxu1 %vm195_vm0, %v6073_v9  ;;  %1630 = vmatprep.subr.bf16.mxu0 %v5599_v35 }
  0x94   :  { %1259 = vmatprep.mubr.bf16.mxu1 %v8678_v1 }
  0x96   :  { %1631 = vmatpush1.bf16.msra.mxu0 %v5597_v36 }
  0x99   :  { %4993 = vmatmul.mubr.msk.bf16.gmra.mrb[68].mxu0 %vm195_vm0, %v6090_v12 }
  0x9a   :  { %858 = vmatprep.mubr.bf16.mxu0 %v8678_v1 }
  0x9b   :  { %5017 = vmatmul.mubr.msk.bf16.gmra.mrb[68].mxu1 %vm195_vm0, %v6090_v12 }
  0x9c   :  { %1269 = vmatprep.mubr.bf16.mxu1 %v8678_v1 }
  0xa1   :  { %4994 = vmatmul.mubr.msk.bf16.gmra.mrb[72].mxu0 %vm195_vm0, %v6107_v15 }
  0xa2   :  { %868 = vmatprep.mubr.bf16.mxu0 %v8678_v1 }
  0xa3   :  { %5018 = vmatmul.mubr.msk.bf16.gmra.mrb[72].mxu1 %vm195_vm0, %v6107_v15 }
  0xa4   :  { %1279 = vmatprep.mubr.bf16.mxu1 %v8678_v1 }
  0xa9   :  { %4995 = vmatmul.mubr.msk.bf16.gmra.mrb[76].mxu0 %vm195_vm0, %v6133_v21 }
  0xaa   :  { %878 = vmatprep.mubr.bf16.mxu0 %v8678_v1 }
  0xab   :  { %5019 = vmatmul.mubr.msk.bf16.gmra.mrb[76].mxu1 %vm195_vm0, %v6133_v21 }
  0xac   :  { %1289 = vmatprep.mubr.bf16.mxu1 %v8678_v1 }
  0xb1   :  { %4996 = vmatmul.mubr.msk.bf16.gmra.mrb[80].mxu0 %vm195_vm0, %v6144_v22 }
  0xb2   :  { %888 = vmatprep.mubr.bf16.mxu0 %v8678_v1 }
  0xb3   :  { %5020 = vmatmul.mubr.msk.bf16.gmra.mrb[80].mxu1 %vm195_vm0, %v6144_v22 }
  0xb4   :  { %1299 = vmatprep.mubr.bf16.mxu1 %v8678_v1 }
  0xb9   :  { %4997 = vmatmul.mubr.msk.bf16.gmra.mrb[84].mxu0 %vm195_vm0, %v6155_v23 }
  0xba   :  { %898 = vmatprep.mubr.bf16.mxu0 %v8678_v1 }
  0xbb   :  { %5021 = vmatmul.mubr.msk.bf16.gmra.mrb[84].mxu1 %vm195_vm0, %v6155_v23 }
  0xbc   :  { %1309 = vmatprep.mubr.bf16.mxu1 %v8678_v1 }
  0xc1   :  { %4998 = vmatmul.mubr.msk.bf16.gmra.mrb[88].mxu0 %vm195_vm0, %v6166_v24 }
  0xc2   :  { %908 = vmatprep.mubr.bf16.mxu0 %v8678_v1 }
  0xc3   :  { %5022 = vmatmul.mubr.msk.bf16.gmra.mrb[88].mxu1 %vm195_vm0, %v6166_v24 }
  0xc4   :  { %1319 = vmatprep.mubr.bf16.mxu1 %v8678_v1 }
  0xc9   :  { %4999 = vmatmul.mubr.msk.bf16.gmra.mrb[92].mxu0 %vm195_vm0, %v6177_v25 }
  0xca   :  { %918 = vmatprep.mubr.bf16.mxu0 %v8678_v1 }
  0xcb   :  { %5023 = vmatmul.mubr.msk.bf16.gmra.mrb[92].mxu1 %vm195_vm0, %v6177_v25 }
  0xcc   :  { %1329 = vmatprep.mubr.bf16.mxu1 %v8678_v1 }
  0xd1   :  { %5000 = vmatmul.mubr.msk.bf16.gmra.mrb[96].mxu0 %vm195_vm0, %v6188_v26 }
  0xd2   :  { %928 = vmatprep.mubr.bf16.mxu0 %v8678_v1 }
  0xd3   :  { %5024 = vmatmul.mubr.msk.bf16.gmra.mrb[96].mxu1 %vm195_vm0, %v6188_v26 }
  0xd4   :  { %1339 = vmatprep.mubr.bf16.mxu1 %v8678_v1 }
  0xd9   :  { %5001 = vmatmul.mubr.msk.bf16.gmra.mrb[100].mxu0 %vm195_vm0, %v6199_v27 }
  0xda   :  { %938 = vmatprep.mubr.bf16.mxu0 %v8678_v1 }
  0xdb   :  { %5025 = vmatmul.mubr.msk.bf16.gmra.mrb[100].mxu1 %vm195_vm0, %v6199_v27 }
  0xdc   :  { %1349 = vmatprep.mubr.bf16.mxu1 %v8678_v1 }
  0xe1   :  { %5002 = vmatmul.mubr.msk.bf16.gmra.mrb[104].mxu0 %vm195_vm0, %v6210_v28 }
  0xe2   :  { %948 = vmatprep.mubr.bf16.mxu0 %v8678_v1 }
  0xe3   :  { %5026 = vmatmul.mubr.msk.bf16.gmra.mrb[104].mxu1 %vm195_vm0, %v6210_v28 }
  0xe4   :  { %v6349_v39 = vpop.f32.mrb[0].mxu0  ;;  %1359 = vmatprep.mubr.bf16.mxu1 %v8678_v1 }
  0xe5   :  { %v6352_v40 = vpop.f32.mrb[1].mxu0  ;;  %v8677_v43 = vrot.slane %v6349_v39, 1 }
  0xe6   :  { %v282_v41 = vpop.f32.mrb[2].mxu0  ;;  %v622_v42 = vpop.f32.mrb[0].mxu1  ;;  %v8676_v47 = vrot.slane %v6352_v40, 1 }
  0xe7   :  { %v439_v44 = vrot.slane %v282_v41, 1  ;;  %v284_v45 = vpop.f32.mrb[3].mxu0  ;;  %v624_v46 = vpop.f32.mrb[1].mxu1 }
  0xe8   :  { %v440_v48 = vrot.slane %v284_v45, 1  ;;  %v626_v49 = vpop.f32.mrb[2].mxu1 }
  0xe9   :  { %v564_v50 = vsel %vm503_vm1, %v8677_v43, %v439_v44  ;;  %5003 = vmatmul.mubr.msk.bf16.gmra.mrb[108].mxu0 %vm195_vm0, %v6221_v29  ;;  %v628_v51 = vpop.f32.mrb[3].mxu1 }
  0xea   :  { %v6363_v52 = vadd.f32 %v622_v42, %v564_v50  ;;  %v565_v53 = vsel %vm503_vm1, %v8676_v47, %v440_v48  ;;  %958 = vmatprep.mubr.bf16.mxu0 %v8678_v1 }
  0xeb   :  { %v6370_v54 = vadd.f32 %v624_v46, %v565_v53  ;;  %5027 = vmatmul.mubr.msk.bf16.gmra.mrb[108].mxu1 %vm195_vm0, %v6221_v29 }
  0xec   :  { %v288_v55 = vpop.f32.mrb[4].mxu0  ;;  %1369 = vmatprep.mubr.bf16.mxu1 %v8678_v1 }
  0xed   :  { %v441_v56 = vrot.slane %v288_v55, 1  ;;  %v290_v57 = vpop.f32.mrb[5].mxu0 }
  0xee   :  { %v442_v58 = vrot.slane %v290_v57, 1  ;;  %v292_v59 = vpop.f32.mrb[6].mxu0  ;;  %v632_v60 = vpop.f32.mrb[4].mxu1 }
  0xef   :  { %v443_v61 = vrot.slane %v292_v59, 1  ;;  %v294_v62 = vpop.f32.mrb[7].mxu0  ;;  %v562_v63 = vsel %vm503_vm1, %v439_v44, %v441_v56  ;;  %v634_v0 = vpop.f32.mrb[5].mxu1 }
  0xf0   :  { %v444_v2 = vrot.slane %v294_v62, 1  ;;  %v6377_v3 = vadd.f32 %v626_v49, %v562_v63  ;;  %v563_v4 = vsel %vm503_vm1, %v440_v48, %v442_v58  ;;  %v636_v5 = vpop.f32.mrb[6].mxu1 }
  0xf1   :  { %v6381_v6 = vadd.f32 %v628_v51, %v563_v4  ;;  %v560_v7 = vsel %vm503_vm1, %v441_v56, %v443_v61  ;;  %5004 = vmatmul.mubr.msk.bf16.gmra.mrb[112].mxu0 %vm195_vm0, %v6232_v30  ;;  %v638_v8 = vpop.f32.mrb[7].mxu1 }
  0xf2   :  { %v6387_v10 = vadd.f32 %v632_v60, %v560_v7  ;;  %v561_v11 = vsel %vm503_vm1, %v442_v58, %v444_v2  ;;  %968 = vmatprep.mubr.bf16.mxu0 %v8678_v1 }
  0xf3   :  { %v6392_v13 = vadd.f32 %v634_v0, %v561_v11  ;;  %5028 = vmatmul.mubr.msk.bf16.gmra.mrb[112].mxu1 %vm195_vm0, %v6232_v30 }
  0xf4   :  { %v298_v14 = vpop.f32.mrb[8].mxu0  ;;  %1379 = vmatprep.mubr.bf16.mxu1 %v8678_v1 }
  0xf5   :  { %v445_v16 = vrot.slane %v298_v14, 1  ;;  %v300_v17 = vpop.f32.mrb[9].mxu0 }
  0xf6   :  { %v446_v18 = vrot.slane %v300_v17, 1  ;;  %v302_v19 = vpop.f32.mrb[10].mxu0  ;;  %v642_v20 = vpop.f32.mrb[8].mxu1 }
  0xf7   :  { %v447_v34 = vrot.slane %v302_v19, 1  ;;  %v304_v35 = vpop.f32.mrb[11].mxu0  ;;  %v558_v36 = vsel %vm503_vm1, %v443_v61, %v445_v16  ;;  %v644_v37 = vpop.f32.mrb[9].mxu1 }
  0xf8   :  { %v448_v41 = vrot.slane %v304_v35, 1  ;;  %v6399_v42 = vadd.f32 %v636_v5, %v558_v36  ;;  %v559_v44 = vsel %vm503_vm1, %v444_v2, %v446_v18  ;;  %v646_v45 = vpop.f32.mrb[10].mxu1 }
  0xf9   :  { %v6403_v46 = vadd.f32 %v638_v8, %v559_v44  ;;  %v556_v48 = vsel %vm503_vm1, %v445_v16, %v447_v34  ;;  %5005 = vmatmul.mubr.msk.bf16.gmra.mrb[116].mxu0 %vm195_vm0, %v6243_v31  ;;  %v648_v49 = vpop.f32.mrb[11].mxu1 }
  0xfa   :  { %v6409_v50 = vadd.f32 %v642_v20, %v556_v48  ;;  %v557_v51 = vsel %vm503_vm1, %v446_v18, %v448_v41  ;;  %978 = vmatprep.mubr.bf16.mxu0 %v8678_v1 }
  0xfb   :  { %v6414_v53 = vadd.f32 %v644_v37, %v557_v51  ;;  %5029 = vmatmul.mubr.msk.bf16.gmra.mrb[116].mxu1 %vm195_vm0, %v6243_v31 }
  0xfc   :  { %v308_v55 = vpop.f32.mrb[12].mxu0  ;;  %1389 = vmatprep.mubr.bf16.mxu1 %v8678_v1 }
  0xfd   :  { %v449_v56 = vrot.slane %v308_v55, 1  ;;  %v310_v57 = vpop.f32.mrb[13].mxu0 }
  0xfe   :  { %v450_v58 = vrot.slane %v310_v57, 1  ;;  %v312_v59 = vpop.f32.mrb[14].mxu0  ;;  %v652_v60 = vpop.f32.mrb[12].mxu1 }
  0xff   :  { %v451_v61 = vrot.slane %v312_v59, 1  ;;  %v314_v62 = vpop.f32.mrb[15].mxu0  ;;  %v554_v63 = vsel %vm503_vm1, %v447_v34, %v449_v56  ;;  %v654_v0 = vpop.f32.mrb[13].mxu1 }
 0x100   :  { %v452_v2 = vrot.slane %v314_v62, 1  ;;  %v6421_v4 = vadd.f32 %v646_v45, %v554_v63  ;;  %v555_v31 = vsel %vm503_vm1, %v448_v41, %v450_v58  ;;  %v656_v5 = vpop.f32.mrb[14].mxu1 }
 0x101   :  { %v6425_v7 = vadd.f32 %v648_v49, %v555_v31  ;;  %v552_v8 = vsel %vm503_vm1, %v449_v56, %v451_v61  ;;  %5006 = vmatmul.mubr.msk.bf16.gmra.mrb[120].mxu0 %vm195_vm0, %v6254_v32  ;;  %v658_v11 = vpop.f32.mrb[15].mxu1 }
 0x102   :  { %v6431_v14 = vadd.f32 %v652_v60, %v552_v8  ;;  %v553_v16 = vsel %vm503_vm1, %v450_v58, %v452_v2  ;;  %988 = vmatprep.mubr.bf16.mxu0 %v8678_v1 }
 0x103   :  { %v6436_v17 = vadd.f32 %v654_v0, %v553_v16  ;;  %5030 = vmatmul.mubr.msk.bf16.gmra.mrb[120].mxu1 %vm195_vm0, %v6254_v32 }
 0x104   :  { %v318_v18 = vpop.f32.mrb[16].mxu0  ;;  %1399 = vmatprep.mubr.bf16.mxu1 %v8678_v1 }
 0x105   :  { %v453_v19 = vrot.slane %v318_v18, 1  ;;  %v320_v20 = vpop.f32.mrb[17].mxu0 }
 0x106   :  { %v454_v34 = vrot.slane %v320_v20, 1  ;;  %v322_v35 = vpop.f32.mrb[18].mxu0  ;;  %v662_v36 = vpop.f32.mrb[16].mxu1 }
 0x107   :  { %v455_v37 = vrot.slane %v322_v35, 1  ;;  %v324_v41 = vpop.f32.mrb[19].mxu0  ;;  %v550_v44 = vsel %vm503_vm1, %v451_v61, %v453_v19  ;;  %v664_v45 = vpop.f32.mrb[17].mxu1 }
 0x108   :  { %v456_v48 = vrot.slane %v324_v41, 1  ;;  %v6443_v49 = vadd.f32 %v656_v5, %v550_v44  ;;  %v551_v32 = vsel %vm503_vm1, %v452_v2, %v454_v34  ;;  %v666_v51 = vpop.f32.mrb[18].mxu1 }
 0x109   :  { %v6447_v55 = vadd.f32 %v658_v11, %v551_v32  ;;  %v548_v56 = vsel %vm503_vm1, %v453_v19, %v455_v37  ;;  %5007 = vmatmul.mubr.msk.bf16.gmra.mrb[124].mxu0 %vm195_vm0, %v6265_v33  ;;  %v668_v57 = vpop.f32.mrb[19].mxu1 }
 0x10a   :  { %v6453_v58 = vadd.f32 %v662_v36, %v548_v56  ;;  %v549_v59 = vsel %vm503_vm1, %v454_v34, %v456_v48  ;;  %1660 = vmatprep.mubr.bf16.mxu0 %v8678_v1 }
 0x10b   :  { %v6458_v60 = vadd.f32 %v664_v45, %v549_v59  ;;  %5031 = vmatmul.mubr.msk.bf16.gmra.mrb[124].mxu1 %vm195_vm0, %v6265_v33 }
 0x10c   :  { %v328_v61 = vpop.f32.mrb[20].mxu0 }
 0x10d   :  { %v457_v62 = vrot.slane %v328_v61, 1  ;;  %v330_v63 = vpop.f32.mrb[21].mxu0 }
 0x10e   :  { %v458_v0 = vrot.slane %v330_v63, 1  ;;  %v332_v2 = vpop.f32.mrb[22].mxu0  ;;  %v672_v31 = vpop.f32.mrb[20].mxu1 }
 0x10f   :  { %v459_v5 = vrot.slane %v332_v2, 1  ;;  %v334_v8 = vpop.f32.mrb[23].mxu0  ;;  %v546_v11 = vsel %vm503_vm1, %v455_v37, %v457_v62  ;;  %v674_v16 = vpop.f32.mrb[21].mxu1 }
 0x110   :  { %v460_v18 = vrot.slane %v334_v8, 1  ;;  %v6464_v19 = vadd.f32 %v666_v51, %v546_v11  ;;  %v547_v20 = vsel %vm503_vm1, %v456_v48, %v458_v0  ;;  %v676_v34 = vpop.f32.mrb[22].mxu1 }
 0x111   :  { %v6468_v33 = vadd.f32 %v668_v57, %v547_v20  ;;  %v544_v35 = vsel %vm503_vm1, %v457_v62, %v459_v5  ;;  %5040 = vmatmul.mubr.msk.bf16.vlgmr.msra.gmra.mrb[128].mxu0 %vm195_vm0, %v6073_v9  ;;  %v678_v36 = vpop.f32.mrb[23].mxu1 }
 0x112   :  { %v6474_v41 = vadd.f32 %v672_v31, %v544_v35  ;;  %v545_v37 = vsel %vm503_vm1, %v458_v0, %v460_v18  ;;  %1670 = vmatprep.mubr.bf16.mxu0 %v8678_v1 }
 0x113   :  { %v6479_v44 = vadd.f32 %v674_v16, %v545_v37 }
 0x114   :  { %v338_v45 = vpop.f32.mrb[24].mxu0 }
 0x115   :  { %v461_v48 = vrot.slane %v338_v45, 1  ;;  %v340_v32 = vpop.f32.mrb[25].mxu0 }
 0x116   :  { %v462_v51 = vrot.slane %v340_v32, 1  ;;  %v342_v56 = vpop.f32.mrb[26].mxu0  ;;  %v682_v57 = vpop.f32.mrb[24].mxu1 }
 0x117   :  { %v463_v59 = vrot.slane %v342_v56, 1  ;;  %v344_v61 = vpop.f32.mrb[27].mxu0  ;;  %v542_v9 = vsel %vm503_vm1, %v459_v5, %v461_v48  ;;  %v684_v62 = vpop.f32.mrb[25].mxu1 }
 0x118   :  { %v464_v63 = vrot.slane %v344_v61, 1  ;;  %v6483_v2 = vadd.f32 %v676_v34, %v542_v9  ;;  %v543_v0 = vsel %vm503_vm1, %v460_v18, %v462_v51  ;;  %v686_v31 = vpop.f32.mrb[26].mxu1 }
 0x119   :  { %v6487_v8 = vadd.f32 %v678_v36, %v543_v0  ;;  %v540_v11 = vsel %vm503_vm1, %v461_v48, %v463_v59  ;;  %5041 = vmatmul.mubr.msk.bf16.gmra.mrb[132].mxu0 %vm195_vm0, %v6090_v12  ;;  %v688_v16 = vpop.f32.mrb[27].mxu1 }
 0x11a   :  { %v6493_v20 = vadd.f32 %v682_v57, %v540_v11  ;;  %v541_v5 = vsel %vm503_vm1, %v462_v51, %v464_v63  ;;  %1680 = vmatprep.mubr.bf16.mxu0 %v8678_v1 }
 0x11b   :  { %v6498_v34 = vadd.f32 %v684_v62, %v541_v5 }
 0x11c   :  { %v348_v18 = vpop.f32.mrb[28].mxu0 }
 0x11d   :  { %v465_v35 = vrot.slane %v348_v18, 1  ;;  %v350_v36 = vpop.f32.mrb[29].mxu0 }
 0x11e   :  { %v466_v37 = vrot.slane %v350_v36, 1  ;;  %v352_v45 = vpop.f32.mrb[30].mxu0  ;;  %v692_v32 = vpop.f32.mrb[28].mxu1 }
 0x11f   :  { %v467_v48 = vrot.slane %v352_v45, 1  ;;  %v354_v56 = vpop.f32.mrb[31].mxu0  ;;  %v538_v12 = vsel %vm503_vm1, %v463_v59, %v465_v35  ;;  %v694_v57 = vpop.f32.mrb[29].mxu1 }
 0x120   :  { %v468_v61 = vrot.slane %v354_v56, 1  ;;  %v6502_v9 = vadd.f32 %v686_v31, %v538_v12  ;;  %v539_v51 = vsel %vm503_vm1, %v464_v63, %v466_v37  ;;  %v696_v62 = vpop.f32.mrb[30].mxu1 }
 0x121   :  { %v6506_v0 = vadd.f32 %v688_v16, %v539_v51  ;;  %v536_v11 = vsel %vm503_vm1, %v465_v35, %v467_v48  ;;  %5042 = vmatmul.mubr.msk.bf16.gmra.mrb[136].mxu0 %vm195_vm0, %v6107_v15  ;;  %v698_v5 = vpop.f32.mrb[31].mxu1 }
 0x122   :  { %v6512_v18 = vadd.f32 %v692_v32, %v536_v11  ;;  %v537_v59 = vsel %vm503_vm1, %v466_v37, %v468_v61  ;;  %1690 = vmatprep.mubr.bf16.mxu0 %v8678_v1 }
 0x123   :  { %v6517_v31 = vadd.f32 %v694_v57, %v537_v59 }
 0x124   :  { %v358_v63 = vpop.f32.mrb[32].mxu0 }
 0x125   :  { %v469_v36 = vrot.slane %v358_v63, 1  ;;  %v360_v16 = vpop.f32.mrb[33].mxu0 }
 0x126   :  { %v470_v45 = vrot.slane %v360_v16, 1  ;;  %v362_v56 = vpop.f32.mrb[34].mxu0  ;;  %v702_v12 = vpop.f32.mrb[32].mxu1 }
 0x127   :  { %v471_v35 = vrot.slane %v362_v56, 1  ;;  %v364_v51 = vpop.f32.mrb[35].mxu0  ;;  %v534_v15 = vsel %vm503_vm1, %v467_v48, %v469_v36  ;;  %v704_v32 = vpop.f32.mrb[33].mxu1 }
 0x128   :  { %v472_v11 = vrot.slane %v364_v51, 1  ;;  %v6521_v47 = vadd.f32 %v696_v62, %v534_v15  ;;  %v535_v37 = vsel %vm503_vm1, %v468_v61, %v470_v45  ;;  %v706_v57 = vpop.f32.mrb[34].mxu1 }
 0x129   :  { %v6525_v59 = vadd.f32 %v698_v5, %v535_v37  ;;  %v532_v63 = vsel %vm503_vm1, %v469_v36, %v471_v35  ;;  %5043 = vmatmul.mubr.msk.bf16.gmra.mrb[140].mxu0 %vm195_vm0, %v6133_v21  ;;  %v708_v16 = vpop.f32.mrb[35].mxu1 }
 0x12a   :  { %v6531_v56 = vadd.f32 %v702_v12, %v532_v63  ;;  %v533_v48 = vsel %vm503_vm1, %v470_v45, %v472_v11  ;;  %1700 = vmatprep.mubr.bf16.mxu0 %v8678_v1 }
 0x12b   :  { %8691 = vst [vmem:[#allocation2_spill] sm:$0xff] %v6525_v59  ;;  %v6536_v62 = vadd.f32 %v704_v32, %v533_v48 }
 0x12c   :  { %8692 = vst [vmem:[#allocation3_spill] sm:$0xff] %v6531_v56  ;;  %v368_v61 = vpop.f32.mrb[36].mxu0 }
 0x12d   :  { %v473_v51 = vrot.slane %v368_v61, 1  ;;  %v370_v5 = vpop.f32.mrb[37].mxu0 }
 0x12e   :  { %v474_v15 = vrot.slane %v370_v5, 1  ;;  %v372_v37 = vpop.f32.mrb[38].mxu0  ;;  %v712_v43 = vpop.f32.mrb[36].mxu1 }
 0x12f   :  { %v475_v36 = vrot.slane %v372_v37, 1  ;;  %v374_v59 = vpop.f32.mrb[39].mxu0  ;;  %v530_v21 = vsel %vm503_vm1, %v471_v35, %v473_v51  ;;  %v714_v12 = vpop.f32.mrb[37].mxu1 }
 0x130   :  { %v476_v63 = vrot.slane %v374_v59, 1  ;;  %v6540_v56 = vadd.f32 %v706_v57, %v530_v21  ;;  %v531_v45 = vsel %vm503_vm1, %v472_v11, %v474_v15  ;;  %v716_v32 = vpop.f32.mrb[38].mxu1 }
 0x131   :  { %v6544_v48 = vadd.f32 %v708_v16, %v531_v45  ;;  %v528_v61 = vsel %vm503_vm1, %v473_v51, %v475_v36  ;;  %5044 = vmatmul.mubr.msk.bf16.gmra.mrb[144].mxu0 %vm195_vm0, %v6144_v22  ;;  %v718_v5 = vpop.f32.mrb[39].mxu1 }
 0x132   :  { %8693 = vst [vmem:[#allocation4_spill] sm:$0xff] %v6540_v56  ;;  %v6550_v37 = vadd.f32 %v712_v43, %v528_v61  ;;  %v529_v35 = vsel %vm503_vm1, %v474_v15, %v476_v63  ;;  %1710 = vmatprep.mubr.bf16.mxu0 %v8678_v1 }
 0x133   :  { %8694 = vst [vmem:[#allocation5_spill] sm:$0xff] %v6544_v48  ;;  %v6555_v57 = vadd.f32 %v714_v12, %v529_v35 }
 0x134   :  { %8695 = vst [vmem:[#allocation6_spill] sm:$0xff] %v6550_v37  ;;  %v378_v11 = vpop.f32.mrb[40].mxu0 }
 0x135   :  { %v477_v59 = vrot.slane %v378_v11, 1  ;;  %v380_v16 = vpop.f32.mrb[41].mxu0 }
 0x136   :  { %v478_v21 = vrot.slane %v380_v16, 1  ;;  %v382_v45 = vpop.f32.mrb[42].mxu0  ;;  %v722_v48 = vpop.f32.mrb[40].mxu1 }
 0x137   :  { %v479_v51 = vrot.slane %v382_v45, 1  ;;  %v384_v56 = vpop.f32.mrb[43].mxu0  ;;  %v526_v22 = vsel %vm503_vm1, %v475_v36, %v477_v59  ;;  %v724_v43 = vpop.f32.mrb[41].mxu1 }
 0x138   :  { %v480_v61 = vrot.slane %v384_v56, 1  ;;  %v6559_v37 = vadd.f32 %v716_v32, %v526_v22  ;;  %v527_v15 = vsel %vm503_vm1, %v476_v63, %v478_v21  ;;  %v726_v12 = vpop.f32.mrb[42].mxu1 }
 0x139   :  { %v6563_v35 = vadd.f32 %v718_v5, %v527_v15  ;;  %v524_v11 = vsel %vm503_vm1, %v477_v59, %v479_v51  ;;  %5045 = vmatmul.mubr.msk.bf16.gmra.mrb[148].mxu0 %vm195_vm0, %v6155_v23  ;;  %v728_v16 = vpop.f32.mrb[43].mxu1 }
 0x13a   :  { %8696 = vst [vmem:[#allocation7_spill] sm:$0xff] %v6559_v37  ;;  %v6569_v45 = vadd.f32 %v722_v48, %v524_v11  ;;  %v525_v56 = vsel %vm503_vm1, %v478_v21, %v480_v61  ;;  %1720 = vmatprep.mubr.bf16.mxu0 %v8678_v1 }
 0x13b   :  { %8697 = vst [vmem:[#allocation8_spill] sm:$0xff] %v6563_v35  ;;  %v6574_v36 = vadd.f32 %v724_v43, %v525_v56 }
 0x13c   :  { %8698 = vst [vmem:[#allocation9_spill] sm:$0xff] %v6569_v45  ;;  %v388_v63 = vpop.f32.mrb[44].mxu0 }
 0x13d   :  { %v481_v32 = vrot.slane %v388_v63, 1  ;;  %v390_v5 = vpop.f32.mrb[45].mxu0 }
 0x13e   :  { %v482_v22 = vrot.slane %v390_v5, 1  ;;  %v392_v15 = vpop.f32.mrb[46].mxu0  ;;  %v732_v35 = vpop.f32.mrb[44].mxu1 }
 0x13f   :  { %v483_v59 = vrot.slane %v392_v15, 1  ;;  %v394_v37 = vpop.f32.mrb[47].mxu0  ;;  %v522_v23 = vsel %vm503_vm1, %v479_v51, %v481_v32  ;;  %v734_v48 = vpop.f32.mrb[45].mxu1 }
 0x140   :  { %v484_v11 = vrot.slane %v394_v37, 1  ;;  %v6578_v45 = vadd.f32 %v726_v12, %v522_v23  ;;  %v523_v21 = vsel %vm503_vm1, %v480_v61, %v482_v22  ;;  %v736_v43 = vpop.f32.mrb[46].mxu1 }
 0x141   :  { %v6582_v56 = vadd.f32 %v728_v16, %v523_v21  ;;  %v520_v63 = vsel %vm503_vm1, %v481_v32, %v483_v59  ;;  %5046 = vmatmul.mubr.msk.bf16.gmra.mrb[152].mxu0 %vm195_vm0, %v6166_v24  ;;  %v738_v5 = vpop.f32.mrb[47].mxu1 }
 0x142   :  { %8699 = vst [vmem:[#allocation10_spill] sm:$0xff] %v6578_v45  ;;  %v6588_v15 = vadd.f32 %v732_v35, %v520_v63  ;;  %v521_v37 = vsel %vm503_vm1, %v482_v22, %v484_v11  ;;  %1730 = vmatprep.mubr.bf16.mxu0 %v8678_v1 }
 0x143   :  { %8700 = vst [vmem:[#allocation11_spill] sm:$0xff] %v6582_v56  ;;  %v6593_v51 = vadd.f32 %v734_v48, %v521_v37 }
 0x144   :  { %8701 = vst [vmem:[#allocation12_spill] sm:$0xff] %v6588_v15  ;;  %v398_v61 = vpop.f32.mrb[48].mxu0 }
 0x145   :  { %v485_v12 = vrot.slane %v398_v61, 1  ;;  %v400_v16 = vpop.f32.mrb[49].mxu0 }
 0x146   :  { %v486_v23 = vrot.slane %v400_v16, 1  ;;  %v402_v21 = vpop.f32.mrb[50].mxu0  ;;  %v742_v56 = vpop.f32.mrb[48].mxu1 }
 0x147   :  { %v487_v32 = vrot.slane %v402_v21, 1  ;;  %v404_v45 = vpop.f32.mrb[51].mxu0  ;;  %v518_v24 = vsel %vm503_vm1, %v483_v59, %v485_v12  ;;  %v744_v35 = vpop.f32.mrb[49].mxu1 }
 0x148   :  { %v488_v63 = vrot.slane %v404_v45, 1  ;;  %v6597_v15 = vadd.f32 %v736_v43, %v518_v24  ;;  %v519_v22 = vsel %vm503_vm1, %v484_v11, %v486_v23  ;;  %v746_v48 = vpop.f32.mrb[50].mxu1 }
 0x149   :  { %v6601_v37 = vadd.f32 %v738_v5, %v519_v22  ;;  %v516_v61 = vsel %vm503_vm1, %v485_v12, %v487_v32  ;;  %5047 = vmatmul.mubr.msk.bf16.gmra.mrb[156].mxu0 %vm195_vm0, %v6177_v25  ;;  %v748_v16 = vpop.f32.mrb[51].mxu1 }
 0x14a   :  { %8702 = vst [vmem:[#allocation13_spill] sm:$0xff] %v6597_v15  ;;  %v6607_v21 = vadd.f32 %v742_v56, %v516_v61  ;;  %v517_v45 = vsel %vm503_vm1, %v486_v23, %v488_v63  ;;  %1740 = vmatprep.mubr.bf16.mxu0 %v8678_v1 }
 0x14b   :  { %8703 = vst [vmem:[#allocation14_spill] sm:$0xff] %v6601_v37  ;;  %v6612_v59 = vadd.f32 %v744_v35, %v517_v45 }
 0x14c   :  { %8704 = vst [vmem:[#allocation15_spill] sm:$0xff] %v6607_v21  ;;  %v408_v11 = vpop.f32.mrb[52].mxu0 }
 0x14d   :  { %v489_v43 = vrot.slane %v408_v11, 1  ;;  %v410_v5 = vpop.f32.mrb[53].mxu0 }
 0x14e   :  { %v490_v24 = vrot.slane %v410_v5, 1  ;;  %v412_v22 = vpop.f32.mrb[54].mxu0  ;;  %v752_v37 = vpop.f32.mrb[52].mxu1 }
 0x14f   :  { %v491_v12 = vrot.slane %v412_v22, 1  ;;  %v414_v15 = vpop.f32.mrb[55].mxu0  ;;  %v514_v25 = vsel %vm503_vm1, %v487_v32, %v489_v43  ;;  %v754_v56 = vpop.f32.mrb[53].mxu1 }
 0x150   :  { %v492_v61 = vrot.slane %v414_v15, 1  ;;  %v6616_v21 = vadd.f32 %v746_v48, %v514_v25  ;;  %v515_v23 = vsel %vm503_vm1, %v488_v63, %v490_v24  ;;  %v756_v35 = vpop.f32.mrb[54].mxu1 }
 0x151   :  { %v6620_v45 = vadd.f32 %v748_v16, %v515_v23  ;;  %v512_v11 = vsel %vm503_vm1, %v489_v43, %v491_v12  ;;  %5048 = vmatmul.mubr.msk.bf16.gmra.mrb[160].mxu0 %vm195_vm0, %v6188_v26  ;;  %v758_v5 = vpop.f32.mrb[55].mxu1 }
 0x152   :  { %8705 = vst [vmem:[#allocation16_spill] sm:$0xff] %v6616_v21  ;;  %v6626_v22 = vadd.f32 %v752_v37, %v512_v11  ;;  %v513_v15 = vsel %vm503_vm1, %v490_v24, %v492_v61  ;;  %1750 = vmatprep.mubr.bf16.mxu0 %v8678_v1 }
 0x153   :  { %8706 = vst [vmem:[#allocation17_spill] sm:$0xff] %v6620_v45  ;;  %v6631_v32 = vadd.f32 %v754_v56, %v513_v15 }
 0x154   :  { %8707 = vst [vmem:[#allocation18_spill] sm:$0xff] %v6626_v22  ;;  %v418_v63 = vpop.f32.mrb[56].mxu0 }
 0x155   :  { %v493_v48 = vrot.slane %v418_v63, 1  ;;  %v420_v16 = vpop.f32.mrb[57].mxu0 }
 0x156   :  { %v494_v25 = vrot.slane %v420_v16, 1  ;;  %v422_v23 = vpop.f32.mrb[58].mxu0  ;;  %v762_v45 = vpop.f32.mrb[56].mxu1 }
 0x157   :  { %v495_v43 = vrot.slane %v422_v23, 1  ;;  %v424_v21 = vpop.f32.mrb[59].mxu0  ;;  %v510_v26 = vsel %vm503_vm1, %v491_v12, %v493_v48  ;;  %v764_v37 = vpop.f32.mrb[57].mxu1 }
 0x158   :  { %v496_v11 = vrot.slane %v424_v21, 1  ;;  %v6635_v22 = vadd.f32 %v756_v35, %v510_v26  ;;  %v511_v24 = vsel %vm503_vm1, %v492_v61, %v494_v25  ;;  %v766_v56 = vpop.f32.mrb[58].mxu1 }
 0x159   :  { %v6639_v15 = vadd.f32 %v758_v5, %v511_v24  ;;  %v508_v63 = vsel %vm503_vm1, %v493_v48, %v495_v43  ;;  %5049 = vmatmul.mubr.msk.bf16.gmra.mrb[164].mxu0 %vm195_vm0, %v6199_v27  ;;  %v768_v16 = vpop.f32.mrb[59].mxu1 }
 0x15a   :  { %8708 = vst [vmem:[#allocation19_spill] sm:$0xff] %v6635_v22  ;;  %v6645_v23 = vadd.f32 %v762_v45, %v508_v63  ;;  %v509_v21 = vsel %vm503_vm1, %v494_v25, %v496_v11  ;;  %1760 = vmatprep.mubr.bf16.mxu0 %v8678_v1 }
 0x15b   :  { %8709 = vst [vmem:[#allocation20_spill] sm:$0xff] %v6639_v15  ;;  %v6650_v12 = vadd.f32 %v764_v37, %v509_v21 }
 0x15c   :  { %v428_v61 = vpop.f32.mrb[60].mxu0 }
 0x15d   :  { %v497_v35 = vrot.slane %v428_v61, 1  ;;  %v430_v5 = vpop.f32.mrb[61].mxu0 }
 0x15e   :  { %v498_v26 = vrot.slane %v430_v5, 1  ;;  %v432_v24 = vpop.f32.mrb[62].mxu0  ;;  %v772_v15 = vpop.f32.mrb[60].mxu1  ;;  %v8710_v5 = vrot.slane %v6349_v39, 1  ;;  %v8714_v39 = vmov 0  }
 0x15f   :  { %v506_v48 = vsel %vm503_vm1, %v495_v43, %v497_v35  ;;  %v499_v27 = vrot.slane %v432_v24, 1  ;;  %v434_v22 = vpop.f32.mrb[63].mxu0  ;;  %v774_v45 = vpop.f32.mrb[61].mxu1 }
 0x160   :  { %v6654_v63 = vadd.f32 %v766_v56, %v506_v48  ;;  %v507_v25 = vsel %vm503_vm1, %v496_v11, %v498_v26  ;;  %v500_v1 = vrot.slane %v434_v22, 1  ;;  %v776_v37 = vpop.f32.mrb[62].mxu1 }
 0x161   :  { %v6658_v21 = vadd.f32 %v768_v16, %v507_v25  ;;  %v504_v61 = vsel %vm503_vm1, %v497_v35, %v499_v27  ;;  %v566_v43 = vsel %vm503_vm1, %v499_v27, %v8710_v5  ;;  %5050 = vmatmul.mubr.msk.bf16.gmra.mrb[168].mxu0 %vm195_vm0, %v6210_v28  ;;  %v778_v56 = vpop.f32.mrb[63].mxu1  ;;  %v8713_v16 = vrot.slane %v6352_v40, 1 }
 0x162   :  { %v6668_v24 = vadd.f32 %v772_v15, %v504_v61  ;;  %v505_v22 = vsel %vm503_vm1, %v498_v26, %v500_v1  ;;  %v6672_v11 = vadd.f32 %v776_v37, %v566_v43  ;;  %1770 = vmatprep.mubr.bf16.mxu0 %v8714_v39 }
 0x163   :  { %v567_v35 = vsel %vm503_vm1, %v500_v1, %v8713_v16  ;;  %v6679_v48 = vadd.f32 %v774_v45, %v505_v22 }
 0x164   :  { %8711 = vst [vmem:[#allocation21_spill] sm:$0xff] %v6668_v24  ;;  %8712 = vst [vmem:[#allocation22_spill] sm:$0xff] %v6672_v11  ;;  %v6681_v27 = vadd.f32 %v778_v56, %v567_v35  ;;  %v6683_v28 = vpop.f32.mrb[64].mxu0 }
 0x165   :  { %8715 = vst [vmem:[#allocation23_spill] sm:$0xff] %v6679_v48  ;;  %v6685_v15 = vpop.f32.mrb[65].mxu0  ;;  %v8680_v40 = vrot.slane %v6683_v28, 2 }
 0x166   :  { %8716 = vst [vmem:[#allocation24_spill] sm:$0xff] %v6681_v27  ;;  %8717 = vst [vmem:[#allocation25_spill] sm:$0xff] %v6685_v15  ;;  %v844_v25 = vpop.f32.mrb[66].mxu0  ;;  %v6688_v26 = vpop.f32.mrb[64].mxu1  ;;  %v8682_v45 = vrot.slane %v6685_v15, 2 }
 0x167   :  { %8718 = vst [vmem:[#allocation26_spill] sm:$0xff] %v6688_v26  ;;  %v1001_v37 = vrot.slane %v844_v25, 2  ;;  %v846_v61 = vpop.f32.mrb[67].mxu0  ;;  %v6692_v5 = vpop.f32.mrb[65].mxu1  ;;  %v8720_v48 = vrot.slane %v6688_v26, 3 }
 0x168   :  { %8719 = vst [vmem:[#allocation27_spill] sm:$0xff] %v6692_v5  ;;  %v1002_v43 = vrot.slane %v846_v61, 2  ;;  %v1255_v22 = vpop.f32.mrb[66].mxu1 }
 0x169   :  { %v1124_v16 = vsel %vm1063_vm2, %v8680_v40, %v1001_v37  ;;  %v1412_v35 = vrot.slane %v1255_v22, 3  ;;  %v1257_v25 = vpop.f32.mrb[67].mxu1  ;;  %5051 = vmatmul.mubr.msk.bf16.gmra.mrb[172].mxu0 %vm195_vm0, %v6221_v29  ;;  %v8722_v29 = vrot.slane %v6692_v5, 3 }
 0x16a   :  { %v1128_v1 = vadd.f32 %v1124_v16, %v6363_v52  ;;  %v1125_v61 = vsel %vm1063_vm2, %v8682_v45, %v1002_v43  ;;  %v1413_v56 = vrot.slane %v1257_v25, 3  ;;  %1780 = vmatprep.mubr.bf16.mxu0 %v8714_v39 }
 0x16b   :  { %v1129_v27 = vadd.f32 %v1125_v61, %v6370_v54  ;;  %v1535_v22 = vsel %vm1474_vm3, %v8720_v48, %v1412_v35 }
 0x16c   :  { %v6714_v40 = vadd.f32 %v1535_v22, %v1128_v1  ;;  %v1536_v52 = vsel %vm1474_vm3, %v8722_v29, %v1413_v56  ;;  %v850_v16 = vpop.f32.mrb[68].mxu0 }
 0x16d   :  { %v6720_v15 = vadd.f32 %v1536_v52, %v1129_v27  ;;  %v1003_v25 = vrot.slane %v850_v16, 2  ;;  %v852_v45 = vpop.f32.mrb[69].mxu0 }
 0x16e   :  { %8721 = vst [vmem:[#allocation28_spill] sm:$0xff] %v6714_v40  ;;  %v1004_v11 = vrot.slane %v852_v45, 2  ;;  %v854_v24 = vpop.f32.mrb[70].mxu0  ;;  %v1261_v54 = vpop.f32.mrb[68].mxu1 }
 0x16f   :  { %v1122_v61 = vsel %vm1063_vm2, %v1001_v37, %v1003_v25  ;;  %v1005_v26 = vrot.slane %v854_v24, 2  ;;  %v1414_v48 = vrot.slane %v1261_v54, 3  ;;  %v856_v1 = vpop.f32.mrb[71].mxu0  ;;  %v1263_v22 = vpop.f32.mrb[69].mxu1 }
 0x170   :  { %v1130_v40 = vadd.f32 %v1122_v61, %v6377_v3  ;;  %v1123_v29 = vsel %vm1063_vm2, %v1002_v43, %v1004_v11  ;;  %v1006_v5 = vrot.slane %v856_v1, 2  ;;  %v1415_v27 = vrot.slane %v1263_v22, 3  ;;  %v1265_v52 = vpop.f32.mrb[70].mxu1 }
 0x171   :  { %v1131_v16 = vadd.f32 %v1123_v29, %v6381_v6  ;;  %v1120_v45 = vsel %vm1063_vm2, %v1003_v25, %v1005_v26  ;;  %v1533_v37 = vsel %vm1474_vm3, %v1412_v35, %v1414_v48  ;;  %v1416_v24 = vrot.slane %v1265_v52, 3  ;;  %v1267_v54 = vpop.f32.mrb[71].mxu1  ;;  %5052 = vmatmul.mubr.msk.bf16.gmra.mrb[176].mxu0 %vm195_vm0, %v6232_v30 }
 0x172   :  { %v1132_v3 = vadd.f32 %v1120_v45, %v6387_v10  ;;  %v6735_v61 = vadd.f32 %v1533_v37, %v1130_v40  ;;  %v1121_v43 = vsel %vm1063_vm2, %v1004_v11, %v1006_v5  ;;  %v1534_v6 = vsel %vm1474_vm3, %v1413_v56, %v1415_v27  ;;  %1790 = vmatprep.mubr.bf16.mxu0 %v8714_v39 }
 0x173   :  { %v1133_v25 = vadd.f32 %v1121_v43, %v6392_v13  ;;  %v6743_v35 = vadd.f32 %v1534_v6, %v1131_v16  ;;  %v1531_v1 = vsel %vm1474_vm3, %v1414_v48, %v1416_v24  ;;  %v1417_v30 = vrot.slane %v1267_v54, 3 }
 0x174   :  { %v6747_v22 = vadd.f32 %v1531_v1, %v1132_v3  ;;  %v860_v10 = vpop.f32.mrb[72].mxu0 }
 0x175   :  { %v1532_v40 = vsel %vm1474_vm3, %v1415_v27, %v1417_v30  ;;  %v1007_v11 = vrot.slane %v860_v10, 2  ;;  %v862_v29 = vpop.f32.mrb[73].mxu0 }
 0x176   :  { %v6751_v52 = vadd.f32 %v1532_v40, %v1133_v25  ;;  %v1008_v56 = vrot.slane %v862_v29, 2  ;;  %v864_v45 = vpop.f32.mrb[74].mxu0  ;;  %v1271_v37 = vpop.f32.mrb[72].mxu1 }
 0x177   :  { %v1118_v13 = vsel %vm1063_vm2, %v1005_v26, %v1007_v11  ;;  %v1009_v16 = vrot.slane %v864_v45, 2  ;;  %v1418_v43 = vrot.slane %v1271_v37, 3  ;;  %v866_v48 = vpop.f32.mrb[75].mxu0  ;;  %v1273_v54 = vpop.f32.mrb[73].mxu1 }
 0x178   :  { %v1134_v3 = vadd.f32 %v1118_v13, %v6399_v42  ;;  %v1119_v6 = vsel %vm1063_vm2, %v1006_v5, %v1008_v56  ;;  %v1010_v27 = vrot.slane %v866_v48, 2  ;;  %v1419_v1 = vrot.slane %v1273_v54, 3  ;;  %v1275_v10 = vpop.f32.mrb[74].mxu1  ;;  %v5953_v42 = vld [vmem:[%s8659_s0 + $0x68] sm:$0xff]  }
 0x179   :  { %v1135_v25 = vadd.f32 %v1119_v6, %v6403_v46  ;;  %v1116_v40 = vsel %vm1063_vm2, %v1007_v11, %v1009_v16  ;;  %v1529_v26 = vsel %vm1474_vm3, %v1416_v24, %v1418_v43  ;;  %v1420_v29 = vrot.slane %v1275_v10, 3  ;;  %v1277_v45 = vpop.f32.mrb[75].mxu1  ;;  %5053 = vmatmul.mubr.msk.bf16.gmra.mrb[180].mxu0 %vm195_vm0, %v5953_v42 }
 0x17a   :  { %v1136_v5 = vadd.f32 %v1116_v40, %v6409_v50  ;;  %v6768_v37 = vadd.f32 %v1529_v26, %v1134_v3  ;;  %v1117_v46 = vsel %vm1063_vm2, %v1008_v56, %v1010_v27  ;;  %v1530_v11 = vsel %vm1474_vm3, %v1417_v30, %v1419_v1  ;;  %1800 = vmatprep.mubr.bf16.mxu0 %v8714_v39 }
 0x17b   :  { %v1137_v24 = vadd.f32 %v1117_v46, %v6414_v53  ;;  %v6776_v13 = vadd.f32 %v1530_v11, %v1135_v25  ;;  %v1527_v48 = vsel %vm1474_vm3, %v1418_v43, %v1420_v29  ;;  %v1421_v54 = vrot.slane %v1277_v45, 3 }
 0x17c   :  { %v6780_v6 = vadd.f32 %v1527_v48, %v1136_v5  ;;  %v870_v50 = vpop.f32.mrb[76].mxu0 }
 0x17d   :  { %v1528_v3 = vsel %vm1474_vm3, %v1419_v1, %v1421_v54  ;;  %v1011_v56 = vrot.slane %v870_v50, 2  ;;  %v872_v10 = vpop.f32.mrb[77].mxu0 }
 0x17e   :  { %v6784_v40 = vadd.f32 %v1528_v3, %v1137_v24  ;;  %v1012_v30 = vrot.slane %v872_v10, 2  ;;  %v874_v26 = vpop.f32.mrb[78].mxu0  ;;  %v1281_v42 = vpop.f32.mrb[76].mxu1 }
 0x17f   :  { %v1114_v53 = vsel %vm1063_vm2, %v1009_v16, %v1011_v56  ;;  %v1013_v25 = vrot.slane %v874_v26, 2  ;;  %v1422_v46 = vrot.slane %v1281_v42, 3  ;;  %v876_v43 = vpop.f32.mrb[79].mxu0  ;;  %v1283_v45 = vpop.f32.mrb[77].mxu1 }
 0x180   :  { %v1138_v5 = vadd.f32 %v1114_v53, %v6421_v4  ;;  %v1115_v11 = vsel %vm1063_vm2, %v1010_v27, %v1012_v30  ;;  %v1014_v1 = vrot.slane %v876_v43, 2  ;;  %v1423_v48 = vrot.slane %v1283_v45, 3  ;;  %v1285_v50 = vpop.f32.mrb[78].mxu1  ;;  %v5954_v4 = vld [vmem:[%s8659_s0 + $0x70] sm:$0xff]  }
 0x181   :  { %v1139_v24 = vadd.f32 %v1115_v11, %v6425_v7  ;;  %v1112_v3 = vsel %vm1063_vm2, %v1011_v56, %v1013_v25  ;;  %v1525_v16 = vsel %vm1474_vm3, %v1420_v29, %v1422_v46  ;;  %v1424_v10 = vrot.slane %v1285_v50, 3  ;;  %v1287_v26 = vpop.f32.mrb[79].mxu1  ;;  %5054 = vmatmul.mubr.msk.bf16.gmra.mrb[184].mxu0 %vm195_vm0, %v5954_v4 }
 0x182   :  { %v1140_v27 = vadd.f32 %v1112_v3, %v6431_v14  ;;  %v6801_v42 = vadd.f32 %v1525_v16, %v1138_v5  ;;  %v1113_v7 = vsel %vm1063_vm2, %v1012_v30, %v1014_v1  ;;  %v1526_v56 = vsel %vm1474_vm3, %v1421_v54, %v1423_v48  ;;  %1810 = vmatprep.mubr.bf16.mxu0 %v8714_v39 }
 0x183   :  { %v1141_v29 = vadd.f32 %v1113_v7, %v6436_v17  ;;  %v6809_v53 = vadd.f32 %v1526_v56, %v1139_v24  ;;  %v1523_v43 = vsel %vm1474_vm3, %v1422_v46, %v1424_v10  ;;  %v1425_v45 = vrot.slane %v1287_v26, 3 }
 0x184   :  { %v6813_v11 = vadd.f32 %v1523_v43, %v1140_v27  ;;  %v880_v14 = vpop.f32.mrb[80].mxu0 }
 0x185   :  { %v1524_v5 = vsel %vm1474_vm3, %v1423_v48, %v1425_v45  ;;  %v1015_v30 = vrot.slane %v880_v14, 2  ;;  %v882_v50 = vpop.f32.mrb[81].mxu0 }
 0x186   :  { %v6817_v3 = vadd.f32 %v1524_v5, %v1141_v29  ;;  %v1016_v54 = vrot.slane %v882_v50, 2  ;;  %v884_v16 = vpop.f32.mrb[82].mxu0  ;;  %v1291_v4 = vpop.f32.mrb[80].mxu1 }
 0x187   :  { %v1110_v17 = vsel %vm1063_vm2, %v1013_v25, %v1015_v30  ;;  %v1017_v24 = vrot.slane %v884_v16, 2  ;;  %v1426_v7 = vrot.slane %v1291_v4, 3  ;;  %v886_v46 = vpop.f32.mrb[83].mxu0  ;;  %v1293_v26 = vpop.f32.mrb[81].mxu1 }
 0x188   :  { %v1142_v27 = vadd.f32 %v1110_v17, %v6443_v49  ;;  %v1111_v56 = vsel %vm1063_vm2, %v1014_v1, %v1016_v54  ;;  %v1018_v48 = vrot.slane %v886_v46, 2  ;;  %v1427_v43 = vrot.slane %v1293_v26, 3  ;;  %v1295_v14 = vpop.f32.mrb[82].mxu1  ;;  %v5955_v49 = vld [vmem:[%s8659_s0 + $0x78] sm:$0xff]  }
 0x189   :  { %v1143_v29 = vadd.f32 %v1111_v56, %v6447_v55  ;;  %v1108_v5 = vsel %vm1063_vm2, %v1015_v30, %v1017_v24  ;;  %v1521_v25 = vsel %vm1474_vm3, %v1424_v10, %v1426_v7  ;;  %v1428_v50 = vrot.slane %v1295_v14, 3  ;;  %v1297_v16 = vpop.f32.mrb[83].mxu1  ;;  %5055 = vmatmul.mubr.msk.bf16.gmra.mrb[188].mxu0 %vm195_vm0, %v5955_v49 }
 0x18a   :  { %v1144_v1 = vadd.f32 %v1108_v5, %v6453_v58  ;;  %v6834_v4 = vadd.f32 %v1521_v25, %v1142_v27  ;;  %v1109_v55 = vsel %vm1063_vm2, %v1016_v54, %v1018_v48  ;;  %v1522_v30 = vsel %vm1474_vm3, %v1425_v45, %v1427_v43  ;;  %2952 = vmatprep.mubr.bf16.mxu0 %v8714_v39 }
 0x18b   :  { %v1145_v10 = vadd.f32 %v1109_v55, %v6458_v60  ;;  %v6842_v17 = vadd.f32 %v1522_v30, %v1143_v29  ;;  %v1519_v46 = vsel %vm1474_vm3, %v1426_v7, %v1428_v50  ;;  %v1429_v26 = vrot.slane %v1297_v16, 3 }
 0x18c   :  { %v6846_v56 = vadd.f32 %v1519_v46, %v1144_v1  ;;  %v890_v58 = vpop.f32.mrb[84].mxu0 }
 0x18d   :  { %v1520_v27 = vsel %vm1474_vm3, %v1427_v43, %v1429_v26  ;;  %v1019_v54 = vrot.slane %v890_v58, 2  ;;  %v892_v14 = vpop.f32.mrb[85].mxu0 }
 0x18e   :  { %v6850_v5 = vadd.f32 %v1520_v27, %v1145_v10  ;;  %v1020_v45 = vrot.slane %v892_v14, 2  ;;  %v894_v25 = vpop.f32.mrb[86].mxu0  ;;  %v1301_v49 = vpop.f32.mrb[84].mxu1 }
 0x18f   :  { %v1106_v60 = vsel %vm1063_vm2, %v1017_v24, %v1019_v54  ;;  %v1021_v29 = vrot.slane %v894_v25, 2  ;;  %v1430_v55 = vrot.slane %v1301_v49, 3  ;;  %v896_v7 = vpop.f32.mrb[87].mxu0  ;;  %v1303_v16 = vpop.f32.mrb[85].mxu1 }
 0x190   :  { %v1146_v1 = vadd.f32 %v1106_v60, %v6464_v19  ;;  %v1107_v30 = vsel %vm1063_vm2, %v1018_v48, %v1020_v45  ;;  %v1022_v43 = vrot.slane %v896_v7, 2  ;;  %v1431_v46 = vrot.slane %v1303_v16, 3  ;;  %v1305_v58 = vpop.f32.mrb[86].mxu1 }
 0x191   :  { %v1147_v10 = vadd.f32 %v1107_v30, %v6468_v33  ;;  %v1104_v27 = vsel %vm1063_vm2, %v1019_v54, %v1021_v29  ;;  %v1517_v24 = vsel %vm1474_vm3, %v1428_v50, %v1430_v55  ;;  %v1432_v14 = vrot.slane %v1305_v58, 3  ;;  %v1307_v25 = vpop.f32.mrb[87].mxu1 }
 0x192   :  { %v1148_v49 = vadd.f32 %v1104_v27, %v6474_v41  ;;  %v6863_v39 = vadd.f32 %v1517_v24, %v1146_v1  ;;  %v1105_v19 = vsel %vm1063_vm2, %v1020_v45, %v1022_v43  ;;  %v1518_v48 = vsel %vm1474_vm3, %v1429_v26, %v1431_v46 }
 0x193   :  { %v1149_v33 = vadd.f32 %v1105_v19, %v6479_v44  ;;  %v6870_v60 = vadd.f32 %v1518_v48, %v1147_v10  ;;  %v1515_v54 = vsel %vm1474_vm3, %v1430_v55, %v1432_v14  ;;  %v1433_v50 = vrot.slane %v1307_v25, 3 }
 0x194   :  { %v6874_v7 = vadd.f32 %v1515_v54, %v1148_v49  ;;  %v900_v16 = vpop.f32.mrb[88].mxu0 }
 0x195   :  { %v1516_v41 = vsel %vm1474_vm3, %v1431_v46, %v1433_v50  ;;  %v1023_v1 = vrot.slane %v900_v16, 2  ;;  %v902_v30 = vpop.f32.mrb[89].mxu0 }
 0x196   :  { %v6878_v45 = vadd.f32 %v1516_v41, %v1149_v33  ;;  %v1024_v58 = vrot.slane %v902_v30, 2  ;;  %v904_v26 = vpop.f32.mrb[90].mxu0  ;;  %v1311_v27 = vpop.f32.mrb[88].mxu1 }
 0x197   :  { %v1102_v44 = vsel %vm1063_vm2, %v1021_v29, %v1023_v1  ;;  %v1025_v10 = vrot.slane %v904_v26, 2  ;;  %v1434_v24 = vrot.slane %v1311_v27, 3  ;;  %v906_v55 = vpop.f32.mrb[91].mxu0  ;;  %v1313_v25 = vpop.f32.mrb[89].mxu1 }
 0x198   :  { %v1150_v49 = vadd.f32 %v1102_v44, %v6483_v2  ;;  %v1103_v19 = vsel %vm1063_vm2, %v1022_v43, %v1024_v58  ;;  %v1026_v46 = vrot.slane %v906_v55, 2  ;;  %v1435_v48 = vrot.slane %v1313_v25, 3  ;;  %v1315_v54 = vpop.f32.mrb[90].mxu1 }
 0x199   :  { %v1151_v33 = vadd.f32 %v1103_v19, %v6487_v8  ;;  %v1100_v16 = vsel %vm1063_vm2, %v1023_v1, %v1025_v10  ;;  %v1513_v29 = vsel %vm1474_vm3, %v1432_v14, %v1434_v24  ;;  %v1436_v41 = vrot.slane %v1315_v54, 3  ;;  %v1317_v30 = vpop.f32.mrb[91].mxu1 }
 0x19a   :  { %v1152_v26 = vadd.f32 %v1100_v16, %v6493_v20  ;;  %v6891_v27 = vadd.f32 %v1513_v29, %v1150_v49  ;;  %v1101_v2 = vsel %vm1063_vm2, %v1024_v58, %v1026_v46  ;;  %v1514_v43 = vsel %vm1474_vm3, %v1433_v50, %v1435_v48 }
 0x19b   :  { %v1153_v8 = vadd.f32 %v1101_v2, %v6498_v34  ;;  %v6898_v44 = vadd.f32 %v1514_v43, %v1151_v33  ;;  %v1511_v1 = vsel %vm1474_vm3, %v1434_v24, %v1436_v41  ;;  %v1437_v14 = vrot.slane %v1317_v30, 3 }
 0x19c   :  { %v6902_v55 = vadd.f32 %v1511_v1, %v1152_v26  ;;  %v910_v25 = vpop.f32.mrb[92].mxu0 }
 0x19d   :  { %v1512_v20 = vsel %vm1474_vm3, %v1435_v48, %v1437_v14  ;;  %v1027_v49 = vrot.slane %v910_v25, 2  ;;  %v912_v19 = vpop.f32.mrb[93].mxu0 }
 0x19e   :  { %v6906_v58 = vadd.f32 %v1512_v20, %v1153_v8  ;;  %v1028_v54 = vrot.slane %v912_v19, 2  ;;  %v914_v50 = vpop.f32.mrb[94].mxu0  ;;  %v1321_v16 = vpop.f32.mrb[92].mxu1 }
 0x19f   :  { %v1098_v34 = vsel %vm1063_vm2, %v1025_v10, %v1027_v49  ;;  %v1029_v33 = vrot.slane %v914_v50, 2  ;;  %v1438_v29 = vrot.slane %v1321_v16, 3  ;;  %v916_v24 = vpop.f32.mrb[95].mxu0  ;;  %v1323_v30 = vpop.f32.mrb[93].mxu1 }
 0x1a0   :  { %v1154_v26 = vadd.f32 %v1098_v34, %v6502_v9  ;;  %v1099_v2 = vsel %vm1063_vm2, %v1026_v46, %v1028_v54  ;;  %v1030_v48 = vrot.slane %v916_v24, 2  ;;  %v1439_v43 = vrot.slane %v1323_v30, 3  ;;  %v1325_v1 = vpop.f32.mrb[94].mxu1 }
 0x1a1   :  { %v1155_v8 = vadd.f32 %v1099_v2, %v6506_v0  ;;  %v1096_v25 = vsel %vm1063_vm2, %v1027_v49, %v1029_v33  ;;  %v1509_v10 = vsel %vm1474_vm3, %v1436_v41, %v1438_v29  ;;  %v1440_v20 = vrot.slane %v1325_v1, 3  ;;  %v1327_v19 = vpop.f32.mrb[95].mxu1 }
 0x1a2   :  { %v1156_v50 = vadd.f32 %v1096_v25, %v6512_v18  ;;  %v6919_v16 = vadd.f32 %v1509_v10, %v1154_v26  ;;  %v1097_v9 = vsel %vm1063_vm2, %v1028_v54, %v1030_v48  ;;  %v1510_v46 = vsel %vm1474_vm3, %v1437_v14, %v1439_v43 }
 0x1a3   :  { %v1157_v0 = vadd.f32 %v1097_v9, %v6517_v31  ;;  %v6926_v34 = vadd.f32 %v1510_v46, %v1155_v8  ;;  %v1507_v49 = vsel %vm1474_vm3, %v1438_v29, %v1440_v20  ;;  %v1441_v41 = vrot.slane %v1327_v19, 3 }
 0x1a4   :  { %v6930_v24 = vadd.f32 %v1507_v49, %v1156_v50  ;;  %v920_v30 = vpop.f32.mrb[96].mxu0 }
 0x1a5   :  { %v1508_v18 = vsel %vm1474_vm3, %v1439_v43, %v1441_v41  ;;  %v1031_v26 = vrot.slane %v920_v30, 2  ;;  %v922_v2 = vpop.f32.mrb[97].mxu0 }
 0x1a6   :  { %8723 = vst [vmem:[#allocation29_spill] sm:$0xff] %v6930_v24  ;;  %v6934_v54 = vadd.f32 %v1508_v18, %v1157_v0  ;;  %v1032_v1 = vrot.slane %v922_v2, 2  ;;  %v924_v14 = vpop.f32.mrb[98].mxu0  ;;  %v1331_v25 = vpop.f32.mrb[96].mxu1  ;;  %v8725_v0 = vld [vmem:[#allocation2_spill] sm:$0xff] }
 0x1a7   :  { %v1094_v31 = vsel %vm1063_vm2, %v1029_v33, %v1031_v26  ;;  %v1033_v8 = vrot.slane %v924_v14, 2  ;;  %v1442_v10 = vrot.slane %v1331_v25, 3  ;;  %v926_v29 = vpop.f32.mrb[99].mxu0  ;;  %v1333_v19 = vpop.f32.mrb[97].mxu1  ;;  %v8726_v25 = vld [vmem:[#allocation3_spill] sm:$0xff] }
 0x1a8   :  { %8724 = vst [vmem:[#allocation30_spill] sm:$0xff] %v6934_v54  ;;  %v1158_v50 = vadd.f32 %v1094_v31, %v6521_v47  ;;  %v1095_v9 = vsel %vm1063_vm2, %v1030_v48, %v1032_v1  ;;  %v1034_v43 = vrot.slane %v926_v29, 2  ;;  %v1443_v46 = vrot.slane %v1333_v19, 3  ;;  %v1335_v49 = vpop.f32.mrb[98].mxu1 }
 0x1a9   :  { %v1159_v30 = vadd.f32 %v1095_v9, %v8725_v0  ;;  %v1092_v18 = vsel %vm1063_vm2, %v1031_v26, %v1033_v8  ;;  %v1505_v33 = vsel %vm1474_vm3, %v1440_v20, %v1442_v10  ;;  %v1444_v2 = vrot.slane %v1335_v49, 3  ;;  %v1337_v14 = vpop.f32.mrb[99].mxu1 }
 0x1aa   :  { %v1160_v54 = vadd.f32 %v1092_v18, %v8726_v25  ;;  %v6947_v24 = vadd.f32 %v1505_v33, %v1158_v50  ;;  %v1093_v47 = vsel %vm1063_vm2, %v1032_v1, %v1034_v43  ;;  %v1506_v48 = vsel %vm1474_vm3, %v1441_v41, %v1443_v46 }
 0x1ab   :  { %v1161_v31 = vadd.f32 %v1093_v47, %v6536_v62  ;;  %v6954_v29 = vadd.f32 %v1506_v48, %v1159_v30  ;;  %v1503_v26 = vsel %vm1474_vm3, %v1442_v10, %v1444_v2  ;;  %v1445_v20 = vrot.slane %v1337_v14, 3 }
 0x1ac   :  { %v6958_v19 = vadd.f32 %v1503_v26, %v1160_v54  ;;  %v930_v9 = vpop.f32.mrb[100].mxu0  ;;  %v8730_v54 = vld [vmem:[#allocation4_spill] sm:$0xff] }
 0x1ad   :  { %8727 = vst [vmem:[#allocation2_spill] sm:$0xff] %v6954_v29  ;;  %v1504_v50 = vsel %vm1474_vm3, %v1443_v46, %v1445_v20  ;;  %v1035_v49 = vrot.slane %v930_v9, 2  ;;  %v932_v0 = vpop.f32.mrb[101].mxu0 }
 0x1ae   :  { %8728 = vst [vmem:[#allocation3_spill] sm:$0xff] %v6958_v19  ;;  %v6962_v1 = vadd.f32 %v1504_v50, %v1161_v31  ;;  %v1036_v18 = vrot.slane %v932_v0, 2  ;;  %v934_v41 = vpop.f32.mrb[102].mxu0  ;;  %v1341_v33 = vpop.f32.mrb[100].mxu1  ;;  %v8731_v31 = vld [vmem:[#allocation5_spill] sm:$0xff] }
 0x1af   :  { %v1090_v62 = vsel %vm1063_vm2, %v1033_v8, %v1035_v49  ;;  %v1037_v30 = vrot.slane %v934_v41, 2  ;;  %v1446_v25 = vrot.slane %v1341_v33, 3  ;;  %v936_v10 = vpop.f32.mrb[103].mxu0  ;;  %v1343_v14 = vpop.f32.mrb[101].mxu1 }
 0x1b0   :  { %8729 = vst [vmem:[#allocation31_spill] sm:$0xff] %v6962_v1  ;;  %v1162_v47 = vadd.f32 %v1090_v62, %v8730_v54  ;;  %v1091_v48 = vsel %vm1063_vm2, %v1034_v43, %v1036_v18  ;;  %v1038_v46 = vrot.slane %v936_v10, 2  ;;  %v1447_v26 = vrot.slane %v1343_v14, 3  ;;  %v1345_v9 = vpop.f32.mrb[102].mxu1  ;;  %v8732_v1 = vld [vmem:[#allocation6_spill] sm:$0xff] }
 0x1b1   :  { %v1163_v50 = vadd.f32 %v1091_v48, %v8731_v31  ;;  %v1088_v0 = vsel %vm1063_vm2, %v1035_v49, %v1037_v30  ;;  %v1501_v8 = vsel %vm1474_vm3, %v1444_v2, %v1446_v25  ;;  %v1448_v41 = vrot.slane %v1345_v9, 3  ;;  %v1347_v33 = vpop.f32.mrb[103].mxu1 }
 0x1b2   :  { %v1164_v19 = vadd.f32 %v1088_v0, %v8732_v1  ;;  %v6975_v29 = vadd.f32 %v1501_v8, %v1162_v47  ;;  %v1089_v43 = vsel %vm1063_vm2, %v1036_v18, %v1038_v46  ;;  %v1502_v62 = vsel %vm1474_vm3, %v1445_v20, %v1447_v26 }
 0x1b3   :  { %v1165_v10 = vadd.f32 %v1089_v43, %v6555_v57  ;;  %v6982_v14 = vadd.f32 %v1502_v62, %v1163_v50  ;;  %v1499_v49 = vsel %vm1474_vm3, %v1446_v25, %v1448_v41  ;;  %v1449_v2 = vrot.slane %v1347_v33, 3 }
 0x1b4   :  { %v6986_v54 = vadd.f32 %v1499_v49, %v1164_v19  ;;  %v940_v48 = vpop.f32.mrb[104].mxu0  ;;  %v8736_v19 = vld [vmem:[#allocation7_spill] sm:$0xff] }
 0x1b5   :  { %8733 = vst [vmem:[#allocation4_spill] sm:$0xff] %v6982_v14  ;;  %v1500_v1 = vsel %vm1474_vm3, %v1447_v26, %v1449_v2  ;;  %v1039_v47 = vrot.slane %v940_v48, 2  ;;  %v942_v9 = vpop.f32.mrb[105].mxu0 }
 0x1b6   :  { %8734 = vst [vmem:[#allocation5_spill] sm:$0xff] %v6986_v54  ;;  %v6990_v18 = vadd.f32 %v1500_v1, %v1165_v10  ;;  %v1040_v31 = vrot.slane %v942_v9, 2  ;;  %v944_v20 = vpop.f32.mrb[106].mxu0  ;;  %v1351_v0 = vpop.f32.mrb[104].mxu1  ;;  %v8737_v10 = vld [vmem:[#allocation8_spill] sm:$0xff] }
 0x1b7   :  { %v1086_v57 = vsel %vm1063_vm2, %v1037_v30, %v1039_v47  ;;  %v1041_v50 = vrot.slane %v944_v20, 2  ;;  %v1450_v8 = vrot.slane %v1351_v0, 3  ;;  %v946_v25 = vpop.f32.mrb[107].mxu0  ;;  %v1353_v33 = vpop.f32.mrb[105].mxu1 }
 0x1b8   :  { %8735 = vst [vmem:[#allocation6_spill] sm:$0xff] %v6990_v18  ;;  %v1166_v43 = vadd.f32 %v1086_v57, %v8736_v19  ;;  %v1087_v62 = vsel %vm1063_vm2, %v1038_v46, %v1040_v31  ;;  %v1042_v26 = vrot.slane %v946_v25, 2  ;;  %v1451_v49 = vrot.slane %v1353_v33, 3  ;;  %v1355_v48 = vpop.f32.mrb[106].mxu1  ;;  %v8738_v18 = vld [vmem:[#allocation9_spill] sm:$0xff] }
 0x1b9   :  { %v1167_v1 = vadd.f32 %v1087_v62, %v8737_v10  ;;  %v1084_v9 = vsel %vm1063_vm2, %v1039_v47, %v1041_v50  ;;  %v1497_v30 = vsel %vm1474_vm3, %v1448_v41, %v1450_v8  ;;  %v1452_v20 = vrot.slane %v1355_v48, 3  ;;  %v1357_v0 = vpop.f32.mrb[107].mxu1 }
 0x1ba   :  { %v1168_v54 = vadd.f32 %v1084_v9, %v8738_v18  ;;  %v7003_v14 = vadd.f32 %v1497_v30, %v1166_v43  ;;  %v1085_v46 = vsel %vm1063_vm2, %v1040_v31, %v1042_v26  ;;  %v1498_v57 = vsel %vm1474_vm3, %v1449_v2, %v1451_v49 }
 0x1bb   :  { %v1169_v25 = vadd.f32 %v1085_v46, %v6574_v36  ;;  %v7010_v33 = vadd.f32 %v1498_v57, %v1167_v1  ;;  %v1495_v47 = vsel %vm1474_vm3, %v1450_v8, %v1452_v20  ;;  %v1453_v41 = vrot.slane %v1357_v0, 3 }
 0x1bc   :  { %v7014_v19 = vadd.f32 %v1495_v47, %v1168_v54  ;;  %v950_v62 = vpop.f32.mrb[108].mxu0  ;;  %v8742_v54 = vld [vmem:[#allocation10_spill] sm:$0xff] }
 0x1bd   :  { %8739 = vst [vmem:[#allocation7_spill] sm:$0xff] %v7010_v33  ;;  %v1496_v18 = vsel %vm1474_vm3, %v1451_v49, %v1453_v41  ;;  %v1043_v43 = vrot.slane %v950_v62, 2  ;;  %v952_v48 = vpop.f32.mrb[109].mxu0 }
 0x1be   :  { %8740 = vst [vmem:[#allocation8_spill] sm:$0xff] %v7014_v19  ;;  %v7018_v31 = vadd.f32 %v1496_v18, %v1169_v25  ;;  %v1044_v10 = vrot.slane %v952_v48, 2  ;;  %v954_v2 = vpop.f32.mrb[110].mxu0  ;;  %v1361_v9 = vpop.f32.mrb[108].mxu1  ;;  %v8743_v25 = vld [vmem:[#allocation11_spill] sm:$0xff] }
 0x1bf   :  { %v1082_v36 = vsel %vm1063_vm2, %v1041_v50, %v1043_v43  ;;  %v1045_v1 = vrot.slane %v954_v2, 2  ;;  %v1454_v30 = vrot.slane %v1361_v9, 3  ;;  %v956_v8 = vpop.f32.mrb[111].mxu0  ;;  %v1363_v0 = vpop.f32.mrb[109].mxu1 }
 0x1c0   :  { %8741 = vst [vmem:[#allocation9_spill] sm:$0xff] %v7018_v31  ;;  %v1170_v46 = vadd.f32 %v1082_v36, %v8742_v54  ;;  %v1083_v57 = vsel %vm1063_vm2, %v1042_v26, %v1044_v10  ;;  %v1046_v49 = vrot.slane %v956_v8, 2  ;;  %v1455_v47 = vrot.slane %v1363_v0, 3  ;;  %v1365_v62 = vpop.f32.mrb[110].mxu1  ;;  %v8744_v31 = vld [vmem:[#allocation12_spill] sm:$0xff] }
 0x1c1   :  { %v1171_v18 = vadd.f32 %v1083_v57, %v8743_v25  ;;  %v1080_v48 = vsel %vm1063_vm2, %v1043_v43, %v1045_v1  ;;  %v1493_v50 = vsel %vm1474_vm3, %v1452_v20, %v1454_v30  ;;  %v1456_v2 = vrot.slane %v1365_v62, 3  ;;  %v1367_v9 = vpop.f32.mrb[111].mxu1 }
 0x1c2   :  { %v1172_v19 = vadd.f32 %v1080_v48, %v8744_v31  ;;  %v7031_v33 = vadd.f32 %v1493_v50, %v1170_v46  ;;  %v1081_v26 = vsel %vm1063_vm2, %v1044_v10, %v1046_v49  ;;  %v1494_v36 = vsel %vm1474_vm3, %v1453_v41, %v1455_v47 }
 0x1c3   :  { %v1173_v8 = vadd.f32 %v1081_v26, %v6593_v51  ;;  %v7038_v0 = vadd.f32 %v1494_v36, %v1171_v18  ;;  %v1491_v43 = vsel %vm1474_vm3, %v1454_v30, %v1456_v2  ;;  %v1457_v20 = vrot.slane %v1367_v9, 3 }
 0x1c4   :  { %v7042_v54 = vadd.f32 %v1491_v43, %v1172_v19  ;;  %v960_v57 = vpop.f32.mrb[112].mxu0  ;;  %v8748_v19 = vld [vmem:[#allocation13_spill] sm:$0xff] }
 0x1c5   :  { %8745 = vst [vmem:[#allocation10_spill] sm:$0xff] %v7038_v0  ;;  %v1492_v31 = vsel %vm1474_vm3, %v1455_v47, %v1457_v20  ;;  %v1047_v46 = vrot.slane %v960_v57, 2  ;;  %v962_v62 = vpop.f32.mrb[113].mxu0 }
 0x1c6   :  { %8746 = vst [vmem:[#allocation11_spill] sm:$0xff] %v7042_v54  ;;  %v7046_v10 = vadd.f32 %v1492_v31, %v1173_v8  ;;  %v1048_v25 = vrot.slane %v962_v62, 2  ;;  %v964_v41 = vpop.f32.mrb[114].mxu0  ;;  %v1371_v48 = vpop.f32.mrb[112].mxu1  ;;  %v8749_v8 = vld [vmem:[#allocation14_spill] sm:$0xff] }
 0x1c7   :  { %v1078_v51 = vsel %vm1063_vm2, %v1045_v1, %v1047_v46  ;;  %v1049_v18 = vrot.slane %v964_v41, 2  ;;  %v1458_v50 = vrot.slane %v1371_v48, 3  ;;  %v966_v30 = vpop.f32.mrb[115].mxu0  ;;  %v1373_v9 = vpop.f32.mrb[113].mxu1 }
 0x1c8   :  { %8747 = vst [vmem:[#allocation12_spill] sm:$0xff] %v7046_v10  ;;  %v1174_v26 = vadd.f32 %v1078_v51, %v8748_v19  ;;  %v1079_v36 = vsel %vm1063_vm2, %v1046_v49, %v1048_v25  ;;  %v1050_v47 = vrot.slane %v966_v30, 2  ;;  %v1459_v43 = vrot.slane %v1373_v9, 3  ;;  %v1375_v57 = vpop.f32.mrb[114].mxu1  ;;  %v8750_v10 = vld [vmem:[#allocation15_spill] sm:$0xff] }
 0x1c9   :  { %v1175_v31 = vadd.f32 %v1079_v36, %v8749_v8  ;;  %v1076_v62 = vsel %vm1063_vm2, %v1047_v46, %v1049_v18  ;;  %v1489_v1 = vsel %vm1474_vm3, %v1456_v2, %v1458_v50  ;;  %v1460_v41 = vrot.slane %v1375_v57, 3  ;;  %v1377_v48 = vpop.f32.mrb[115].mxu1 }
 0x1ca   :  { %v1176_v54 = vadd.f32 %v1076_v62, %v8750_v10  ;;  %v7059_v0 = vadd.f32 %v1489_v1, %v1174_v26  ;;  %v1077_v49 = vsel %vm1063_vm2, %v1048_v25, %v1050_v47  ;;  %v1490_v51 = vsel %vm1474_vm3, %v1457_v20, %v1459_v43 }
 0x1cb   :  { %v1177_v30 = vadd.f32 %v1077_v49, %v6612_v59  ;;  %v7066_v9 = vadd.f32 %v1490_v51, %v1175_v31  ;;  %v1487_v46 = vsel %vm1474_vm3, %v1458_v50, %v1460_v41  ;;  %v1461_v2 = vrot.slane %v1377_v48, 3 }
 0x1cc   :  { %v7070_v19 = vadd.f32 %v1487_v46, %v1176_v54  ;;  %v970_v36 = vpop.f32.mrb[116].mxu0  ;;  %v8754_v54 = vld [vmem:[#allocation16_spill] sm:$0xff] }
 0x1cd   :  { %8751 = vst [vmem:[#allocation13_spill] sm:$0xff] %v7066_v9  ;;  %v1488_v10 = vsel %vm1474_vm3, %v1459_v43, %v1461_v2  ;;  %v1051_v26 = vrot.slane %v970_v36, 2  ;;  %v972_v57 = vpop.f32.mrb[117].mxu0 }
 0x1ce   :  { %8752 = vst [vmem:[#allocation14_spill] sm:$0xff] %v7070_v19  ;;  %v7074_v25 = vadd.f32 %v1488_v10, %v1177_v30  ;;  %v1052_v8 = vrot.slane %v972_v57, 2  ;;  %v974_v20 = vpop.f32.mrb[118].mxu0  ;;  %v1381_v62 = vpop.f32.mrb[116].mxu1  ;;  %v8755_v30 = vld [vmem:[#allocation17_spill] sm:$0xff] }
 0x1cf   :  { %v1074_v59 = vsel %vm1063_vm2, %v1049_v18, %v1051_v26  ;;  %v1053_v31 = vrot.slane %v974_v20, 2  ;;  %v1462_v1 = vrot.slane %v1381_v62, 3  ;;  %v976_v50 = vpop.f32.mrb[119].mxu0  ;;  %v1383_v48 = vpop.f32.mrb[117].mxu1 }
 0x1d0   :  { %8753 = vst [vmem:[#allocation15_spill] sm:$0xff] %v7074_v25  ;;  %v1178_v49 = vadd.f32 %v1074_v59, %v8754_v54  ;;  %v1075_v51 = vsel %vm1063_vm2, %v1050_v47, %v1052_v8  ;;  %v1054_v43 = vrot.slane %v976_v50, 2  ;;  %v1463_v46 = vrot.slane %v1383_v48, 3  ;;  %v1385_v36 = vpop.f32.mrb[118].mxu1  ;;  %v8756_v25 = vld [vmem:[#allocation18_spill] sm:$0xff] }
 0x1d1   :  { %v1179_v10 = vadd.f32 %v1075_v51, %v8755_v30  ;;  %v1072_v57 = vsel %vm1063_vm2, %v1051_v26, %v1053_v31  ;;  %v1485_v18 = vsel %vm1474_vm3, %v1460_v41, %v1462_v1  ;;  %v1464_v20 = vrot.slane %v1385_v36, 3  ;;  %v1387_v62 = vpop.f32.mrb[119].mxu1 }
 0x1d2   :  { %v1180_v19 = vadd.f32 %v1072_v57, %v8756_v25  ;;  %v7087_v9 = vadd.f32 %v1485_v18, %v1178_v49  ;;  %v1073_v47 = vsel %vm1063_vm2, %v1052_v8, %v1054_v43  ;;  %v1486_v59 = vsel %vm1474_vm3, %v1461_v2, %v1463_v46 }
 0x1d3   :  { %v1181_v50 = vadd.f32 %v1073_v47, %v6631_v32  ;;  %v7094_v48 = vadd.f32 %v1486_v59, %v1179_v10  ;;  %v1483_v26 = vsel %vm1474_vm3, %v1462_v1, %v1464_v20  ;;  %v1465_v41 = vrot.slane %v1387_v62, 3 }
 0x1d4   :  { %v7098_v54 = vadd.f32 %v1483_v26, %v1180_v19  ;;  %v980_v51 = vpop.f32.mrb[120].mxu0  ;;  %v8759_v19 = vld [vmem:[#allocation19_spill] sm:$0xff] }
 0x1d5   :  { %v1484_v25 = vsel %vm1474_vm3, %v1463_v46, %v1465_v41  ;;  %v1055_v49 = vrot.slane %v980_v51, 2  ;;  %v982_v36 = vpop.f32.mrb[121].mxu0 }
 0x1d6   :  { %8757 = vst [vmem:[#allocation16_spill] sm:$0xff] %v7098_v54  ;;  %v7102_v8 = vadd.f32 %v1484_v25, %v1181_v50  ;;  %v1056_v30 = vrot.slane %v982_v36, 2  ;;  %v984_v2 = vpop.f32.mrb[122].mxu0  ;;  %v1391_v57 = vpop.f32.mrb[120].mxu1  ;;  %v8760_v50 = vld [vmem:[#allocation20_spill] sm:$0xff] }
 0x1d7   :  { %v1070_v32 = vsel %vm1063_vm2, %v1053_v31, %v1055_v49  ;;  %v1057_v10 = vrot.slane %v984_v2, 2  ;;  %v1466_v18 = vrot.slane %v1391_v57, 3  ;;  %v986_v1 = vpop.f32.mrb[123].mxu0  ;;  %v1393_v62 = vpop.f32.mrb[121].mxu1 }
 0x1d8   :  { %8758 = vst [vmem:[#allocation17_spill] sm:$0xff] %v7102_v8  ;;  %v1182_v47 = vadd.f32 %v1070_v32, %v8759_v19  ;;  %v1071_v59 = vsel %vm1063_vm2, %v1054_v43, %v1056_v30  ;;  %v1058_v46 = vrot.slane %v986_v1, 2  ;;  %v1467_v26 = vrot.slane %v1393_v62, 3  ;;  %v1395_v51 = vpop.f32.mrb[122].mxu1 }
 0x1d9   :  { %v1183_v25 = vadd.f32 %v1071_v59, %v8760_v50  ;;  %v1068_v36 = vsel %vm1063_vm2, %v1055_v49, %v1057_v10  ;;  %v1481_v31 = vsel %vm1474_vm3, %v1464_v20, %v1466_v18  ;;  %v1468_v2 = vrot.slane %v1395_v51, 3  ;;  %v1397_v57 = vpop.f32.mrb[123].mxu1 }
 0x1da   :  { %v1184_v8 = vadd.f32 %v1068_v36, %v6645_v23  ;;  %v7115_v54 = vadd.f32 %v1481_v31, %v1182_v47  ;;  %v1069_v43 = vsel %vm1063_vm2, %v1056_v30, %v1058_v46  ;;  %v1482_v32 = vsel %vm1474_vm3, %v1465_v41, %v1467_v26 }
 0x1db   :  { %v1185_v1 = vadd.f32 %v1069_v43, %v6650_v12  ;;  %v7122_v62 = vadd.f32 %v1482_v32, %v1183_v25  ;;  %v1479_v49 = vsel %vm1474_vm3, %v1466_v18, %v1468_v2  ;;  %v1469_v20 = vrot.slane %v1397_v57, 3 }
 0x1dc   :  { %v7126_v19 = vadd.f32 %v1479_v49, %v1184_v8  ;;  %v990_v59 = vpop.f32.mrb[124].mxu0 }
 0x1dd   :  { %v1480_v23 = vsel %vm1474_vm3, %v1467_v26, %v1469_v20  ;;  %v1059_v47 = vrot.slane %v990_v59, 2  ;;  %v992_v51 = vpop.f32.mrb[125].mxu0 }
 0x1de   :  { %v7130_v30 = vadd.f32 %v1480_v23, %v1185_v1  ;;  %v1060_v50 = vrot.slane %v992_v51, 2  ;;  %v994_v41 = vpop.f32.mrb[126].mxu0  ;;  %v1401_v36 = vpop.f32.mrb[124].mxu1  ;;  %v8762_v23 = vrot.slane %v6683_v28, 2 }
 0x1df   :  { %v1066_v12 = vsel %vm1063_vm2, %v1057_v10, %v1059_v47  ;;  %v1061_v25 = vrot.slane %v994_v41, 2  ;;  %v1470_v31 = vrot.slane %v1401_v36, 3  ;;  %v996_v18 = vpop.f32.mrb[127].mxu0  ;;  %v1403_v57 = vpop.f32.mrb[125].mxu1  ;;  %v8763_v41 = vld [vmem:[#allocation21_spill] sm:$0xff] }
 0x1e0   :  { %8761 = vst [vmem:[#allocation18_spill] sm:$0xff] %v7130_v30  ;;  %v1186_v8 = vadd.f32 %v1066_v12, %v6654_v63  ;;  %v1067_v43 = vsel %vm1063_vm2, %v1058_v46, %v1060_v50  ;;  %v1062_v26 = vrot.slane %v996_v18, 2  ;;  %v1471_v32 = vrot.slane %v1403_v57, 3  ;;  %v1405_v49 = vpop.f32.mrb[126].mxu1  ;;  %v8764_v46 = vld [vmem:[#allocation22_spill] sm:$0xff]  ;;  %v8765_v57 = vld [vmem:[#allocation25_spill] sm:$0xff] }
 0x1e1   :  { %v1187_v1 = vadd.f32 %v1067_v43, %v6658_v21  ;;  %v1064_v59 = vsel %vm1063_vm2, %v1059_v47, %v1061_v25  ;;  %v1126_v10 = vsel %vm1063_vm2, %v1061_v25, %v8762_v23  ;;  %v1477_v51 = vsel %vm1474_vm3, %v1468_v2, %v1470_v31  ;;  %v1407_v63 = vpop.f32.mrb[127].mxu1  ;;  %v8767_v43 = vld [vmem:[#allocation23_spill] sm:$0xff]  ;;  %v8768_v30 = vld [vmem:[#allocation24_spill] sm:$0xff] }
 0x1e2   :  { %v1188_v36 = vadd.f32 %v1064_v59, %v8763_v41  ;;  %v1190_v12 = vadd.f32 %v1126_v10, %v8764_v46  ;;  %v7148_v18 = vadd.f32 %v1477_v51, %v1186_v8  ;;  %v1065_v21 = vsel %vm1063_vm2, %v1060_v50, %v1062_v26  ;;  %v8769_v51 = vld [vmem:[#allocation26_spill] sm:$0xff] }
 0x1e3   :  { %v8766_v47 = vrot.slane %v8765_v57, 2  ;;  %v1189_v25 = vadd.f32 %v1065_v21, %v8767_v43  ;;  %v1478_v2 = vsel %vm1474_vm3, %v1469_v20, %v1471_v32  ;;  %v1472_v23 = vrot.slane %v1405_v49, 3  ;;  %v8771_v57 = vld [vmem:[#allocation27_spill] sm:$0xff] }
 0x1e4   :  { %v7160_v41 = vadd.f32 %v1478_v2, %v1187_v1  ;;  %v1473_v8 = vrot.slane %v1407_v63, 3  ;;  %v7162_v10 = vpop.f32.mrb[128].mxu0  ;;  %v8686_v20 = vsub.s32 0, %v6345_v38 }
 0x1e5   :  { %v1127_v28 = vsel %vm1063_vm2, %v1062_v26, %v8766_v47  ;;  %v1475_v50 = vsel %vm1474_vm3, %v1470_v31, %v1472_v23  ;;  %v8770_v26 = vrot.slane %v8769_v51, 3  ;;  %v7171_v21 = vpop.f32.mrb[129].mxu0  ;;  %v8772_v31 = vrot.slane %v8771_v57, 3 }
 0x1e6   :  { %v1191_v59 = vadd.f32 %v1127_v28, %v8768_v30  ;;  %v2022_v30 = vsub.s32 1, %v6345_v38  ;;  %v7175_v49 = vadd.f32 %v1475_v50, %v1188_v36  ;;  %v1476_v63 = vsel %vm1474_vm3, %v1471_v32, %v1473_v8  ;;  %v1666_v28 = vpop.f32.mrb[130].mxu0  ;;  %v2014_v36 = vld [vmem:[%s8660_s2] sm:$0x3] }
 0x1e7   :  { %v1537_v46 = vsel %vm1474_vm3, %v1472_v23, %v8770_v26  ;;  %v1538_v47 = vsel %vm1474_vm3, %v1473_v8, %v8772_v31  ;;  %v7185_v43 = vadd.f32 %v1476_v63, %v1189_v25  ;;  %v8687_v23 = vrot.slane %v7162_v10, 4  ;;  %v8774_v25 = vld [vmem:[#allocation28_spill] sm:$0xff] }
 0x1e8   :  { %v7177_v1 = vadd.f32 %v1537_v46, %v1190_v12  ;;  %v7187_v2 = vadd.f32 %v1538_v47, %v1191_v59  ;;  %v1823_v51 = vrot.slane %v1666_v28, 4  ;;  %v1668_v12 = vpop.f32.mrb[131].mxu0  ;;  %v8688_v32 = vrot.slane %v7171_v21, 4 }
 0x1e9   :  { %v1824_v50 = vrot.slane %v1668_v12, 4  ;;  %v7201_v59 = vrot.slane %v2014_v36, %v8686_v20  ;;  %v7210_v57 = vrot.slane %v2014_v36, %v2022_v30 }
 0x1ea   :  { %8773 = vst [vmem:[#allocation19_spill] sm:$0xff] %v7187_v2  ;;  %v1946_v8 = vsel %vm1885_vm4, %v8687_v23, %v1823_v51 }
 0x1eb   :  { %v1950_v26 = vadd.f32 %v1946_v8, %v8774_v25  ;;  %v1947_v46 = vsel %vm1885_vm4, %v8688_v32, %v1824_v50 }
 0x1ec   :  { %v1951_v63 = vadd.f32 %v1947_v46, %v6720_v15  ;;  %v1672_v31 = vpop.f32.mrb[132].mxu0 }
 0x1ed   :  { %v1825_v47 = vrot.slane %v1672_v31, 4  ;;  %v1674_v28 = vpop.f32.mrb[133].mxu0  ;;  %v2026_v12 = vadd.f32 %v7201_v59, %v1950_v26 }
 0x1ee   :  { %v1826_v8 = vrot.slane %v1674_v28, 4  ;;  %v1676_v25 = vpop.f32.mrb[134].mxu0  ;;  %v2027_v20 = vadd.f32 %v7210_v57, %v1951_v63 }
 0x1ef   :  { %v1944_v23 = vsel %vm1885_vm4, %v1823_v51, %v1825_v47  ;;  %v1827_v2 = vrot.slane %v1676_v25, 4  ;;  %v1678_v32 = vpop.f32.mrb[135].mxu0  ;;  %5765 = vtanh.f32 %v2026_v12 }
 0x1f0   :  { %v1952_v15 = vadd.f32 %v1944_v23, %v6735_v61  ;;  %v1945_v36 = vsel %vm1885_vm4, %v1824_v50, %v1826_v8  ;;  %v1828_v46 = vrot.slane %v1678_v32, 4  ;;  %5767 = vtanh.f32 %v2027_v20 }
 0x1f1   :  { %v1953_v31 = vadd.f32 %v1945_v36, %v6743_v35  ;;  %v1942_v26 = vsel %vm1885_vm4, %v1825_v47, %v1827_v2 }
 0x1f2   :  { %v2028_v28 = vadd.f32 %v7201_v59, %v1952_v15  ;;  %v1954_v63 = vadd.f32 %v1942_v26, %v6747_v22  ;;  %v1943_v51 = vsel %vm1885_vm4, %v1826_v8, %v1828_v46 }
 0x1f3   :  { %v2029_v61 = vadd.f32 %v7210_v57, %v1953_v31  ;;  %v1955_v23 = vadd.f32 %v1943_v51, %v6751_v52 }
 0x1f4   :  { %5769 = vtanh.f32 %v2028_v28  ;;  %v1682_v32 = vpop.f32.mrb[136].mxu0  ;;  %v2030_v47 = vadd.f32 %v7201_v59, %v1954_v63  ;;  %v5602_v63 = vld [vmem:[%s8661_s3 + $0x4] ss:$8 sps:$4 sm:$0xff]  }
 0x1f5   :  { %5771 = vtanh.f32 %v2029_v61  ;;  %v1829_v35 = vrot.slane %v1682_v32, 4  ;;  %v1684_v50 = vpop.f32.mrb[137].mxu0  ;;  %v2031_v15 = vadd.f32 %v7210_v57, %v1955_v23  ;;  %2302 = vmatprep.mubr.bf16.mxu1 %v5602_v63 }
 0x1f6   :  { %v1830_v12 = vrot.slane %v1684_v50, 4  ;;  %v1686_v25 = vpop.f32.mrb[138].mxu0  ;;  %5773 = vtanh.f32 %v2030_v47 }
 0x1f7   :  { %v1940_v22 = vsel %vm1885_vm4, %v1827_v2, %v1829_v35  ;;  %v1831_v8 = vrot.slane %v1686_v25, 4  ;;  %v1688_v20 = vpop.f32.mrb[139].mxu0  ;;  %5775 = vtanh.f32 %v2031_v15 }
 0x1f8   :  { %v1956_v36 = vadd.f32 %v1940_v22, %v6768_v37  ;;  %v1941_v52 = vsel %vm1885_vm4, %v1828_v46, %v1830_v12  ;;  %v1832_v31 = vrot.slane %v1688_v20, 4 }
 0x1f9   :  { %v1957_v26 = vadd.f32 %v1941_v52, %v6776_v13  ;;  %v1938_v28 = vsel %vm1885_vm4, %v1829_v35, %v1831_v8  ;;  %v5766_v61 = vpop.eup %5765 }
 0x1fa   :  { %v2032_v2 = vadd.f32 %v7201_v59, %v1956_v36  ;;  %v1958_v51 = vadd.f32 %v1938_v28, %v6780_v6  ;;  %v1939_v37 = vsel %vm1885_vm4, %v1830_v12, %v1832_v31  ;;  %v5768_v32 = vpop.eup %5767 }
 0x1fb   :  { %v2033_v46 = vadd.f32 %v7210_v57, %v1957_v26  ;;  %v1959_v13 = vadd.f32 %v1939_v37, %v6784_v40 }
 0x1fc   :  { %5777 = vtanh.f32 %v2032_v2  ;;  %v1692_v23 = vpop.f32.mrb[140].mxu0  ;;  %v2034_v25 = vadd.f32 %v7201_v59, %v1958_v51 }
 0x1fd   :  { %5779 = vtanh.f32 %v2033_v46  ;;  %v1833_v35 = vrot.slane %v1692_v23, 4  ;;  %v1694_v50 = vpop.f32.mrb[141].mxu0  ;;  %v2035_v12 = vadd.f32 %v7210_v57, %v1959_v13 }
 0x1fe   :  { %v5770_v47 = vpop.eup %5769  ;;  %v1834_v6 = vrot.slane %v1694_v50, 4  ;;  %v1696_v22 = vpop.f32.mrb[142].mxu0  ;;  %5781 = vtanh.f32 %v2034_v25 }
 0x1ff   :  { %v5772_v20 = vpop.eup %5771  ;;  %v1936_v15 = vsel %vm1885_vm4, %v1831_v8, %v1833_v35  ;;  %v1835_v40 = vrot.slane %v1696_v22, 4  ;;  %v1698_v36 = vpop.f32.mrb[143].mxu0  ;;  %v2154_v52 = vpack.c.bf16 %v5770_v47, %v5766_v61  ;;  %5783 = vtanh.f32 %v2035_v12 }
 0x200   :  { %v1960_v26 = vadd.f32 %v1936_v15, %v6801_v42  ;;  %v1937_v28 = vsel %vm1885_vm4, %v1832_v31, %v1834_v6  ;;  %v1836_v63 = vrot.slane %v1698_v36, 4  ;;  %v2155_v2 = vpack.c.bf16 %v5772_v20, %v5768_v32  ;;  %v5774_v61 = vpop.eup %5773 }
 0x201   :  { %v1961_v51 = vadd.f32 %v1937_v28, %v6809_v53  ;;  %v1934_v37 = vsel %vm1885_vm4, %v1833_v35, %v1835_v40  ;;  %v5776_v23 = vpop.eup %5775 }
 0x202   :  { %v2036_v46 = vadd.f32 %v7201_v59, %v1960_v26  ;;  %v1962_v8 = vadd.f32 %v1934_v37, %v6813_v11  ;;  %v1935_v13 = vsel %vm1885_vm4, %v1834_v6, %v1836_v63  ;;  %2270 = vmatprep.subr.bf16.mxu1 %v2155_v2 }
 0x203   :  { %v2037_v42 = vadd.f32 %v7210_v57, %v1961_v51  ;;  %v1963_v31 = vadd.f32 %v1935_v13, %v6817_v3  ;;  %2271 = vmatpush1.bf16.msra.mxu1 %v2154_v52 }
 0x204   :  { %5785 = vtanh.f32 %v2036_v46  ;;  %v1702_v53 = vpop.f32.mrb[144].mxu0  ;;  %v2038_v11 = vadd.f32 %v7201_v59, %v1962_v8 }
 0x205   :  { %5787 = vtanh.f32 %v2037_v42  ;;  %v1837_v32 = vrot.slane %v1702_v53, 4  ;;  %v1704_v35 = vpop.f32.mrb[145].mxu0  ;;  %v2039_v22 = vadd.f32 %v7210_v57, %v1963_v31 }
 0x206   :  { %v5778_v50 = vpop.eup %5777  ;;  %v1838_v47 = vrot.slane %v1704_v35, 4  ;;  %v1706_v25 = vpop.f32.mrb[146].mxu0  ;;  %5789 = vtanh.f32 %v2038_v11 }
 0x207   :  { %v5780_v6 = vpop.eup %5779  ;;  %v1932_v20 = vsel %vm1885_vm4, %v1835_v40, %v1837_v32  ;;  %v1839_v3 = vrot.slane %v1706_v25, 4  ;;  %v1708_v12 = vpop.f32.mrb[147].mxu0  ;;  %v2156_v15 = vpack.c.bf16 %v5778_v50, %v5774_v61  ;;  %5791 = vtanh.f32 %v2039_v22 }
 0x208   :  { %v1964_v36 = vadd.f32 %v1932_v20, %v6834_v4  ;;  %v1933_v52 = vsel %vm1885_vm4, %v1836_v63, %v1838_v47  ;;  %v1840_v26 = vrot.slane %v1708_v12, 4  ;;  %v2157_v28 = vpack.c.bf16 %v5780_v6, %v5776_v23  ;;  %v5782_v8 = vpop.eup %5781 }
 0x209   :  { %v1965_v2 = vadd.f32 %v1933_v52, %v6842_v17  ;;  %v1930_v51 = vsel %vm1885_vm4, %v1837_v32, %v1839_v3  ;;  %v5784_v13 = vpop.eup %5783 }
 0x20a   :  { %v2040_v37 = vadd.f32 %v7201_v59, %v1964_v36  ;;  %v1966_v40 = vadd.f32 %v1930_v51, %v6846_v56  ;;  %v1931_v46 = vsel %vm1885_vm4, %v1838_v47, %v1840_v26  ;;  %2272 = vmatprep.subr.bf16.mxu1 %v2157_v28 }
 0x20b   :  { %v2041_v4 = vadd.f32 %v7210_v57, %v1965_v2  ;;  %v1967_v63 = vadd.f32 %v1931_v46, %v6850_v5  ;;  %2273 = vmatpush1.bf16.msra.mxu1 %v2156_v15 }
 0x20c   :  { %5793 = vtanh.f32 %v2040_v37  ;;  %v1712_v17 = vpop.f32.mrb[148].mxu0  ;;  %v2042_v56 = vadd.f32 %v7201_v59, %v1966_v40 }
 0x20d   :  { %5795 = vtanh.f32 %v2041_v4  ;;  %v1841_v42 = vrot.slane %v1712_v17, 4  ;;  %v1714_v31 = vpop.f32.mrb[149].mxu0  ;;  %v2043_v35 = vadd.f32 %v7210_v57, %v1967_v63 }
 0x20e   :  { %v5786_v61 = vpop.eup %5785  ;;  %v1842_v53 = vrot.slane %v1714_v31, 4  ;;  %v1716_v23 = vpop.f32.mrb[150].mxu0  ;;  %5797 = vtanh.f32 %v2042_v56 }
 0x20f   :  { %v5788_v32 = vpop.eup %5787  ;;  %v1928_v50 = vsel %vm1885_vm4, %v1839_v3, %v1841_v42  ;;  %v1843_v5 = vrot.slane %v1716_v23, 4  ;;  %v1718_v11 = vpop.f32.mrb[151].mxu0  ;;  %v2158_v47 = vpack.c.bf16 %v5786_v61, %v5782_v8  ;;  %5799 = vtanh.f32 %v2043_v35 }
 0x210   :  { %v1968_v25 = vadd.f32 %v1928_v50, %v6863_v39  ;;  %v1929_v6 = vsel %vm1885_vm4, %v1840_v26, %v1842_v53  ;;  %v1844_v22 = vrot.slane %v1718_v11, 4  ;;  %v2159_v20 = vpack.c.bf16 %v5788_v32, %v5784_v13  ;;  %v5790_v28 = vpop.eup %5789 }
 0x211   :  { %v1969_v12 = vadd.f32 %v1929_v6, %v6870_v60  ;;  %v1926_v15 = vsel %vm1885_vm4, %v1841_v42, %v1843_v5  ;;  %v5792_v2 = vpop.eup %5791 }
 0x212   :  { %v2044_v36 = vadd.f32 %v7201_v59, %v1968_v25  ;;  %v1970_v3 = vadd.f32 %v1926_v15, %v6874_v7  ;;  %v1927_v52 = vsel %vm1885_vm4, %v1842_v53, %v1844_v22  ;;  %2274 = vmatprep.subr.bf16.mxu1 %v2159_v20 }
 0x213   :  { %v2045_v39 = vadd.f32 %v7210_v57, %v1969_v12  ;;  %v1971_v26 = vadd.f32 %v1927_v52, %v6878_v45  ;;  %2275 = vmatpush1.bf16.msra.mxu1 %v2158_v47 }
 0x214   :  { %5801 = vtanh.f32 %v2044_v36  ;;  %v1722_v60 = vpop.f32.mrb[152].mxu0  ;;  %v2046_v7 = vadd.f32 %v7201_v59, %v1970_v3 }
 0x215   :  { %5803 = vtanh.f32 %v2045_v39  ;;  %v1845_v51 = vrot.slane %v1722_v60, 4  ;;  %v1724_v37 = vpop.f32.mrb[153].mxu0  ;;  %v2047_v8 = vadd.f32 %v7210_v57, %v1971_v26 }
 0x216   :  { %v5794_v40 = vpop.eup %5793  ;;  %v1846_v46 = vrot.slane %v1724_v37, 4  ;;  %v1726_v4 = vpop.f32.mrb[154].mxu0  ;;  %5805 = vtanh.f32 %v2046_v7 }
 0x217   :  { %v5796_v63 = vpop.eup %5795  ;;  %v1924_v17 = vsel %vm1885_vm4, %v1843_v5, %v1845_v51  ;;  %v1847_v45 = vrot.slane %v1726_v4, 4  ;;  %v1728_v13 = vpop.f32.mrb[155].mxu0  ;;  %v2160_v42 = vpack.c.bf16 %v5794_v40, %v5790_v28  ;;  %5807 = vtanh.f32 %v2047_v8  ;;  %v8776_v8 = vld [vmem:[#allocation30_spill] sm:$0xff] }
 0x218   :  { %v1972_v31 = vadd.f32 %v1924_v17, %v6891_v27  ;;  %v1925_v61 = vsel %vm1885_vm4, %v1844_v22, %v1846_v46  ;;  %v1848_v56 = vrot.slane %v1728_v13, 4  ;;  %v2161_v53 = vpack.c.bf16 %v5796_v63, %v5792_v2  ;;  %v5798_v47 = vpop.eup %5797 }
 0x219   :  { %v1973_v23 = vadd.f32 %v1925_v61, %v6898_v44  ;;  %v1922_v32 = vsel %vm1885_vm4, %v1845_v51, %v1847_v45  ;;  %v5800_v25 = vpop.eup %5799 }
 0x21a   :  { %v2048_v35 = vadd.f32 %v7201_v59, %v1972_v31  ;;  %v1974_v50 = vadd.f32 %v1922_v32, %v6902_v55  ;;  %v1923_v5 = vsel %vm1885_vm4, %v1846_v46, %v1848_v56  ;;  %2276 = vmatprep.subr.bf16.mxu1 %v2161_v53  ;;  %v8775_v46 = vld [vmem:[#allocation29_spill] sm:$0xff] }
 0x21b   :  { %v2049_v27 = vadd.f32 %v7210_v57, %v1973_v23  ;;  %v1975_v11 = vadd.f32 %v1923_v5, %v6906_v58  ;;  %2277 = vmatpush1.bf16.msra.mxu1 %v2160_v42 }
 0x21c   :  { %5809 = vtanh.f32 %v2048_v35  ;;  %v1732_v44 = vpop.f32.mrb[156].mxu0  ;;  %v2050_v55 = vadd.f32 %v7201_v59, %v1974_v50 }
 0x21d   :  { %5811 = vtanh.f32 %v2049_v27  ;;  %v1849_v6 = vrot.slane %v1732_v44, 4  ;;  %v1734_v22 = vpop.f32.mrb[157].mxu0  ;;  %v2051_v3 = vadd.f32 %v7210_v57, %v1975_v11 }
 0x21e   :  { %v5802_v20 = vpop.eup %5801  ;;  %v1850_v12 = vrot.slane %v1734_v22, 4  ;;  %v1736_v15 = vpop.f32.mrb[158].mxu0  ;;  %5813 = vtanh.f32 %v2050_v55  ;;  %v8777_v22 = vld [vmem:[#allocation2_spill] sm:$0xff] }
 0x21f   :  { %v5804_v36 = vpop.eup %5803  ;;  %v1920_v52 = vsel %vm1885_vm4, %v1847_v45, %v1849_v6  ;;  %v1851_v58 = vrot.slane %v1736_v15, 4  ;;  %v1738_v39 = vpop.f32.mrb[159].mxu0  ;;  %v2162_v26 = vpack.c.bf16 %v5802_v20, %v5798_v47  ;;  %5815 = vtanh.f32 %v2051_v3  ;;  %v8778_v15 = vld [vmem:[#allocation3_spill] sm:$0xff] }
 0x220   :  { %v1976_v28 = vadd.f32 %v1920_v52, %v6919_v16  ;;  %v1921_v60 = vsel %vm1885_vm4, %v1848_v56, %v1850_v12  ;;  %v1852_v2 = vrot.slane %v1738_v39, 4  ;;  %v2163_v51 = vpack.c.bf16 %v5804_v36, %v5800_v25  ;;  %v5806_v45 = vpop.eup %5805  ;;  %v8779_v52 = vld [vmem:[#allocation31_spill] sm:$0xff] }
 0x221   :  { %v1977_v37 = vadd.f32 %v1921_v60, %v6926_v34  ;;  %v1918_v40 = vsel %vm1885_vm4, %v1849_v6, %v1851_v58  ;;  %v5808_v13 = vpop.eup %5807 }
 0x222   :  { %v2052_v7 = vadd.f32 %v7201_v59, %v1976_v28  ;;  %v1978_v4 = vadd.f32 %v1918_v40, %v8775_v46  ;;  %v1919_v63 = vsel %vm1885_vm4, %v1850_v12, %v1852_v2  ;;  %2278 = vmatprep.subr.bf16.mxu1 %v2163_v51 }
 0x223   :  { %v2053_v16 = vadd.f32 %v7210_v57, %v1977_v37  ;;  %v1979_v17 = vadd.f32 %v1919_v63, %v8776_v8  ;;  %2279 = vmatpush1.bf16.msra.mxu1 %v2162_v26 }
 0x224   :  { %5817 = vtanh.f32 %v2052_v7  ;;  %v1742_v34 = vpop.f32.mrb[160].mxu0  ;;  %v2054_v56 = vadd.f32 %v7201_v59, %v1978_v4 }
 0x225   :  { %5819 = vtanh.f32 %v2053_v16  ;;  %v1853_v42 = vrot.slane %v1742_v34, 4  ;;  %v1744_v31 = vpop.f32.mrb[161].mxu0  ;;  %v2055_v35 = vadd.f32 %v7210_v57, %v1979_v17 }
 0x226   :  { %v5810_v61 = vpop.eup %5809  ;;  %v1854_v53 = vrot.slane %v1744_v31, 4  ;;  %v1746_v23 = vpop.f32.mrb[162].mxu0  ;;  %5821 = vtanh.f32 %v2054_v56  ;;  %v8780_v31 = vld [vmem:[#allocation4_spill] sm:$0xff] }
 0x227   :  { %v5812_v32 = vpop.eup %5811  ;;  %v1916_v50 = vsel %vm1885_vm4, %v1851_v58, %v1853_v42  ;;  %v1855_v5 = vrot.slane %v1746_v23, 4  ;;  %v1748_v27 = vpop.f32.mrb[163].mxu0  ;;  %v2164_v11 = vpack.c.bf16 %v5810_v61, %v5806_v45  ;;  %5823 = vtanh.f32 %v2055_v35  ;;  %v8781_v23 = vld [vmem:[#allocation5_spill] sm:$0xff] }
 0x228   :  { %v1980_v47 = vadd.f32 %v1916_v50, %v6947_v24  ;;  %v1917_v44 = vsel %vm1885_vm4, %v1852_v2, %v1854_v53  ;;  %v1856_v25 = vrot.slane %v1748_v27, 4  ;;  %v2165_v6 = vpack.c.bf16 %v5812_v32, %v5808_v13  ;;  %v5814_v39 = vpop.eup %5813  ;;  %v8782_v50 = vld [vmem:[#allocation6_spill] sm:$0xff] }
 0x229   :  { %v1981_v20 = vadd.f32 %v1917_v44, %v8777_v22  ;;  %v1914_v55 = vsel %vm1885_vm4, %v1853_v42, %v1855_v5  ;;  %v5816_v28 = vpop.eup %5815 }
 0x22a   :  { %v2056_v12 = vadd.f32 %v7201_v59, %v1980_v47  ;;  %v1982_v36 = vadd.f32 %v1914_v55, %v8778_v15  ;;  %v1915_v3 = vsel %vm1885_vm4, %v1854_v53, %v1856_v25  ;;  %2280 = vmatprep.subr.bf16.mxu1 %v2165_v6 }
 0x22b   :  { %v2057_v24 = vadd.f32 %v7210_v57, %v1981_v20  ;;  %v1983_v58 = vadd.f32 %v1915_v3, %v8779_v52  ;;  %2281 = vmatpush1.bf16.msra.mxu1 %v2164_v11 }
 0x22c   :  { %5825 = vtanh.f32 %v2056_v12  ;;  %v1752_v26 = vpop.f32.mrb[164].mxu0  ;;  %v2058_v37 = vadd.f32 %v7201_v59, %v1982_v36 }
 0x22d   :  { %5827 = vtanh.f32 %v2057_v24  ;;  %v1857_v60 = vrot.slane %v1752_v26, 4  ;;  %v1754_v2 = vpop.f32.mrb[165].mxu0  ;;  %v2059_v4 = vadd.f32 %v7210_v57, %v1983_v58 }
 0x22e   :  { %v5818_v51 = vpop.eup %5817  ;;  %v1858_v40 = vrot.slane %v1754_v2, 4  ;;  %v1756_v7 = vpop.f32.mrb[166].mxu0  ;;  %5829 = vtanh.f32 %v2058_v37 }
 0x22f   :  { %v5820_v46 = vpop.eup %5819  ;;  %v1912_v63 = vsel %vm1885_vm4, %v1855_v5, %v1857_v60  ;;  %v1859_v16 = vrot.slane %v1756_v7, 4  ;;  %v1758_v8 = vpop.f32.mrb[167].mxu0  ;;  %v2166_v17 = vpack.c.bf16 %v5818_v51, %v5814_v39  ;;  %5831 = vtanh.f32 %v2059_v4  ;;  %v8785_v4 = vld [vmem:[#allocation9_spill] sm:$0xff] }
 0x230   :  { %v1984_v45 = vadd.f32 %v1912_v63, %v6975_v29  ;;  %v1913_v34 = vsel %vm1885_vm4, %v1856_v25, %v1858_v40  ;;  %v1860_v13 = vrot.slane %v1758_v8, 4  ;;  %v2167_v42 = vpack.c.bf16 %v5820_v46, %v5816_v28  ;;  %v5822_v27 = vpop.eup %5821 }
 0x231   :  { %v1985_v61 = vadd.f32 %v1913_v34, %v8780_v31  ;;  %v1910_v56 = vsel %vm1885_vm4, %v1857_v60, %v1859_v16  ;;  %v5824_v47 = vpop.eup %5823  ;;  %v8783_v60 = vld [vmem:[#allocation7_spill] sm:$0xff] }
 0x232   :  { %v2060_v53 = vadd.f32 %v7201_v59, %v1984_v45  ;;  %v1986_v32 = vadd.f32 %v1910_v56, %v8781_v23  ;;  %v1911_v35 = vsel %vm1885_vm4, %v1858_v40, %v1860_v13  ;;  %2282 = vmatprep.subr.bf16.mxu1 %v2167_v42  ;;  %v8784_v40 = vld [vmem:[#allocation8_spill] sm:$0xff] }
 0x233   :  { %v2061_v29 = vadd.f32 %v7210_v57, %v1985_v61  ;;  %v1987_v5 = vadd.f32 %v1911_v35, %v8782_v50  ;;  %2283 = vmatpush1.bf16.msra.mxu1 %v2166_v17 }
 0x234   :  { %5833 = vtanh.f32 %v2060_v53  ;;  %v1762_v11 = vpop.f32.mrb[168].mxu0  ;;  %v2062_v22 = vadd.f32 %v7201_v59, %v1986_v32 }
 0x235   :  { %5835 = vtanh.f32 %v2061_v29  ;;  %v1861_v44 = vrot.slane %v1762_v11, 4  ;;  %v1764_v25 = vpop.f32.mrb[169].mxu0  ;;  %v2063_v15 = vadd.f32 %v7210_v57, %v1987_v5 }
 0x236   :  { %v5826_v6 = vpop.eup %5825  ;;  %v1862_v20 = vrot.slane %v1764_v25, 4  ;;  %v1766_v55 = vpop.f32.mrb[170].mxu0  ;;  %5837 = vtanh.f32 %v2062_v22  ;;  %v8787_v22 = vld [vmem:[#allocation11_spill] sm:$0xff] }
 0x237   :  { %v5828_v12 = vpop.eup %5827  ;;  %v1908_v36 = vsel %vm1885_vm4, %v1859_v16, %v1861_v44  ;;  %v1863_v3 = vrot.slane %v1766_v55, 4  ;;  %v1768_v24 = vpop.f32.mrb[171].mxu0  ;;  %v2168_v52 = vpack.c.bf16 %v5826_v6, %v5822_v27  ;;  %5839 = vtanh.f32 %v2063_v15 }
 0x238   :  { %v1988_v58 = vadd.f32 %v1908_v36, %v7003_v14  ;;  %v1909_v39 = vsel %vm1885_vm4, %v1860_v13, %v1862_v20  ;;  %v1864_v26 = vrot.slane %v1768_v24, 4  ;;  %v2169_v28 = vpack.c.bf16 %v5828_v12, %v5824_v47  ;;  %v5830_v16 = vpop.eup %5829  ;;  %v8786_v47 = vld [vmem:[#allocation10_spill] sm:$0xff]  ;;  %v8788_v12 = vld [vmem:[#allocation12_spill] sm:$0xff] }
 0x239   :  { %v1989_v2 = vadd.f32 %v1909_v39, %v8783_v60  ;;  %v1906_v51 = vsel %vm1885_vm4, %v1861_v44, %v1863_v3  ;;  %v5832_v17 = vpop.eup %5831 }
 0x23a   :  { %v2064_v37 = vadd.f32 %v7201_v59, %v1988_v58  ;;  %v1990_v7 = vadd.f32 %v1906_v51, %v8784_v40  ;;  %v1907_v46 = vsel %vm1885_vm4, %v1862_v20, %v1864_v26  ;;  %2284 = vmatprep.subr.bf16.mxu1 %v2169_v28 }
 0x23b   :  { %v2065_v14 = vadd.f32 %v7210_v57, %v1989_v2  ;;  %v1991_v63 = vadd.f32 %v1907_v46, %v8785_v4  ;;  %2285 = vmatpush1.bf16.msra.mxu1 %v2168_v52 }
 0x23c   :  { %5841 = vtanh.f32 %v2064_v37  ;;  %v1772_v8 = vpop.f32.mrb[172].mxu0  ;;  %v2066_v42 = vadd.f32 %v7201_v59, %v1990_v7 }
 0x23d   :  { %5843 = vtanh.f32 %v2065_v14  ;;  %v1865_v45 = vrot.slane %v1772_v8, 4  ;;  %v1774_v34 = vpop.f32.mrb[173].mxu0  ;;  %v2067_v53 = vadd.f32 %v7210_v57, %v1991_v63  ;;  %v8789_v8 = vld [vmem:[#allocation13_spill] sm:$0xff] }
 0x23e   :  { %v5834_v13 = vpop.eup %5833  ;;  %v1866_v31 = vrot.slane %v1774_v34, 4  ;;  %v1776_v61 = vpop.f32.mrb[174].mxu0  ;;  %5845 = vtanh.f32 %v2066_v42 }
 0x23f   :  { %v5836_v56 = vpop.eup %5835  ;;  %v1904_v23 = vsel %vm1885_vm4, %v1863_v3, %v1865_v45  ;;  %v1867_v32 = vrot.slane %v1776_v61, 4  ;;  %v1778_v35 = vpop.f32.mrb[175].mxu0  ;;  %v2170_v29 = vpack.c.bf16 %v5834_v13, %v5830_v16  ;;  %5847 = vtanh.f32 %v2067_v53  ;;  %v8790_v13 = vld [vmem:[#allocation14_spill] sm:$0xff]  ;;  %v8791_v61 = vld [vmem:[#allocation15_spill] sm:$0xff] }
 0x240   :  { %v1992_v50 = vadd.f32 %v1904_v23, %v7031_v33  ;;  %v1905_v5 = vsel %vm1885_vm4, %v1864_v26, %v1866_v31  ;;  %v1868_v27 = vrot.slane %v1778_v35, 4  ;;  %v2171_v11 = vpack.c.bf16 %v5836_v56, %v5832_v17  ;;  %v5838_v36 = vpop.eup %5837 }
 0x241   :  { %v1993_v44 = vadd.f32 %v1905_v5, %v8786_v47  ;;  %v1902_v25 = vsel %vm1885_vm4, %v1865_v45, %v1867_v32  ;;  %v5840_v24 = vpop.eup %5839 }
 0x242   :  { %v2068_v6 = vadd.f32 %v7201_v59, %v1992_v50  ;;  %v1994_v20 = vadd.f32 %v1902_v25, %v8787_v22  ;;  %v1903_v55 = vsel %vm1885_vm4, %v1866_v31, %v1868_v27  ;;  %2286 = vmatprep.subr.bf16.mxu1 %v2171_v11 }
 0x243   :  { %v2069_v33 = vadd.f32 %v7210_v57, %v1993_v44  ;;  %v1995_v15 = vadd.f32 %v1903_v55, %v8788_v12  ;;  %2287 = vmatpush1.bf16.msra.mxu1 %v2170_v29 }
 0x244   :  { %5849 = vtanh.f32 %v2068_v6  ;;  %v1782_v3 = vpop.f32.mrb[176].mxu0  ;;  %v2070_v26 = vadd.f32 %v7201_v59, %v1994_v20 }
 0x245   :  { %5851 = vtanh.f32 %v2069_v33  ;;  %v1869_v52 = vrot.slane %v1782_v3, 4  ;;  %v1784_v58 = vpop.f32.mrb[177].mxu0  ;;  %v2071_v51 = vadd.f32 %v7210_v57, %v1995_v15 }
 0x246   :  { %v5842_v39 = vpop.eup %5841  ;;  %v1870_v28 = vrot.slane %v1784_v58, 4  ;;  %v1786_v60 = vpop.f32.mrb[178].mxu0  ;;  %5853 = vtanh.f32 %v2070_v26  ;;  %v8793_v26 = vld [vmem:[#allocation17_spill] sm:$0xff] }
 0x247   :  { %v5844_v2 = vpop.eup %5843  ;;  %v1900_v37 = vsel %vm1885_vm4, %v1867_v32, %v1869_v52  ;;  %v1871_v40 = vrot.slane %v1786_v60, 4  ;;  %v1788_v7 = vpop.f32.mrb[179].mxu0  ;;  %v2172_v46 = vpack.c.bf16 %v5842_v39, %v5838_v36  ;;  %5855 = vtanh.f32 %v2071_v51 }
 0x248   :  { %v1996_v14 = vadd.f32 %v1900_v37, %v7059_v0  ;;  %v1901_v4 = vsel %vm1885_vm4, %v1868_v27, %v1870_v28  ;;  %v1872_v63 = vrot.slane %v1788_v7, 4  ;;  %v2173_v16 = vpack.c.bf16 %v5844_v2, %v5840_v24  ;;  %v5846_v53 = vpop.eup %5845 }
 0x249   :  { %v1997_v17 = vadd.f32 %v1901_v4, %v8789_v8  ;;  %v1898_v45 = vsel %vm1885_vm4, %v1869_v52, %v1871_v40  ;;  %v5848_v32 = vpop.eup %5847  ;;  %v8792_v52 = vld [vmem:[#allocation16_spill] sm:$0xff] }
 0x24a   :  { %v2072_v34 = vadd.f32 %v7201_v59, %v1996_v14  ;;  %v1998_v42 = vadd.f32 %v1898_v45, %v8790_v13  ;;  %v1899_v31 = vsel %vm1885_vm4, %v1870_v28, %v1872_v63  ;;  %2288 = vmatprep.subr.bf16.mxu1 %v2173_v16 }
 0x24b   :  { %v2073_v0 = vadd.f32 %v7210_v57, %v1997_v17  ;;  %v1999_v56 = vadd.f32 %v1899_v31, %v8791_v61  ;;  %2289 = vmatpush1.bf16.msra.mxu1 %v2172_v46 }
 0x24c   :  { %5857 = vtanh.f32 %v2072_v34  ;;  %v1792_v23 = vpop.f32.mrb[180].mxu0  ;;  %v2074_v5 = vadd.f32 %v7201_v59, %v1998_v42 }
 0x24d   :  { %5859 = vtanh.f32 %v2073_v0  ;;  %v1873_v35 = vrot.slane %v1792_v23, 4  ;;  %v1794_v29 = vpop.f32.mrb[181].mxu0  ;;  %v2075_v44 = vadd.f32 %v7210_v57, %v1999_v56 }
 0x24e   :  { %v5850_v50 = vpop.eup %5849  ;;  %v1874_v27 = vrot.slane %v1794_v29, 4  ;;  %v1796_v11 = vpop.f32.mrb[182].mxu0  ;;  %5861 = vtanh.f32 %v2074_v5 }
 0x24f   :  { %v5852_v47 = vpop.eup %5851  ;;  %v1896_v25 = vsel %vm1885_vm4, %v1871_v40, %v1873_v35  ;;  %v1875_v6 = vrot.slane %v1796_v11, 4  ;;  %v1798_v22 = vpop.f32.mrb[183].mxu0  ;;  %v2174_v20 = vpack.c.bf16 %v5850_v50, %v5846_v53  ;;  %5863 = vtanh.f32 %v2075_v44 }
 0x250   :  { %v2000_v55 = vadd.f32 %v1896_v25, %v7087_v9  ;;  %v1897_v33 = vsel %vm1885_vm4, %v1872_v63, %v1874_v27  ;;  %v1876_v12 = vrot.slane %v1798_v22, 4  ;;  %v2175_v15 = vpack.c.bf16 %v5852_v47, %v5848_v32  ;;  %v5854_v60 = vpop.eup %5853  ;;  %v8794_v32 = vld [vmem:[#allocation18_spill] sm:$0xff] }
 0x251   :  { %v2001_v36 = vadd.f32 %v1897_v33, %v7094_v48  ;;  %v1894_v3 = vsel %vm1885_vm4, %v1873_v35, %v1875_v6  ;;  %v5856_v2 = vpop.eup %5855 }
 0x252   :  { %v2076_v24 = vadd.f32 %v7201_v59, %v2000_v55  ;;  %v2002_v58 = vadd.f32 %v1894_v3, %v8792_v52  ;;  %v1895_v39 = vsel %vm1885_vm4, %v1874_v27, %v1876_v12  ;;  %2290 = vmatprep.subr.bf16.mxu1 %v2175_v15 }
 0x253   :  { %v2077_v9 = vadd.f32 %v7210_v57, %v2001_v36  ;;  %v2003_v28 = vadd.f32 %v1895_v39, %v8793_v26  ;;  %2291 = vmatpush1.bf16.msra.mxu1 %v2174_v20 }
 0x254   :  { %5865 = vtanh.f32 %v2076_v24  ;;  %v1802_v48 = vpop.f32.mrb[184].mxu0  ;;  %v2078_v7 = vadd.f32 %v7201_v59, %v2002_v58  ;;  %v8795_v58 = vrot.slane %v7162_v10, 4 }
 0x255   :  { %5867 = vtanh.f32 %v2077_v9  ;;  %v1877_v51 = vrot.slane %v1802_v48, 4  ;;  %v1804_v37 = vpop.f32.mrb[185].mxu0  ;;  %v2079_v63 = vadd.f32 %v7210_v57, %v2003_v28 }
 0x256   :  { %v5858_v40 = vpop.eup %5857  ;;  %v1878_v46 = vrot.slane %v1804_v37, 4  ;;  %v1806_v14 = vpop.f32.mrb[186].mxu0  ;;  %5869 = vtanh.f32 %v2078_v7 }
 0x257   :  { %v5860_v4 = vpop.eup %5859  ;;  %v1892_v16 = vsel %vm1885_vm4, %v1875_v6, %v1877_v51  ;;  %v1879_v8 = vrot.slane %v1806_v14, 4  ;;  %v1808_v17 = vpop.f32.mrb[187].mxu0  ;;  %v2176_v45 = vpack.c.bf16 %v5858_v40, %v5854_v60  ;;  %5871 = vtanh.f32 %v2079_v63 }
 0x258   :  { %v2004_v34 = vadd.f32 %v1892_v16, %v7115_v54  ;;  %v1893_v13 = vsel %vm1885_vm4, %v1876_v12, %v1878_v46  ;;  %v1880_v42 = vrot.slane %v1808_v17, 4  ;;  %v2177_v31 = vpack.c.bf16 %v5860_v4, %v5856_v2  ;;  %v5862_v29 = vpop.eup %5861 }
 0x259   :  { %v2005_v0 = vadd.f32 %v1893_v13, %v7122_v62  ;;  %v1890_v61 = vsel %vm1885_vm4, %v1877_v51, %v1879_v8  ;;  %v5864_v50 = vpop.eup %5863  ;;  %v8796_v60 = vrot.slane %v7171_v21, 4  ;;  %v8797_v51 = vld [vmem:[#allocation19_spill] sm:$0xff] }
 0x25a   :  { %v2080_v56 = vadd.f32 %v7201_v59, %v2004_v34  ;;  %v2006_v53 = vadd.f32 %v1890_v61, %v7126_v19  ;;  %v1891_v23 = vsel %vm1885_vm4, %v1878_v46, %v1880_v42  ;;  %2292 = vmatprep.subr.bf16.mxu1 %v2177_v31  ;;  %v5600_v61 = vld [vmem:[%s8661_s3] ss:$8 sps:$4 sm:$0xff]  }
 0x25b   :  { %v2081_v54 = vadd.f32 %v7210_v57, %v2005_v0  ;;  %v2007_v35 = vadd.f32 %v1891_v23, %v8794_v32  ;;  %2293 = vmatpush1.bf16.msra.mxu1 %v2176_v45  ;;  %v8798_v23 = vmov 0   ;;  %v5605_v32 = vld [vmem:[%s8661_s3 + $0x10] ss:$8 sps:$4 sm:$0xff]  }
 0x25c   :  { %5873 = vtanh.f32 %v2080_v56  ;;  %v1812_v62 = vpop.f32.mrb[188].mxu0  ;;  %v2082_v5 = vadd.f32 %v7201_v59, %v2006_v53  ;;  %v5603_v56 = vld [vmem:[%s8661_s3 + $0x14] ss:$8 sps:$4 sm:$0xff]   ;;  %v5621_v53 = vld [vmem:[%s8662_s4] sm:$0xff]  }
 0x25d   :  { %5875 = vtanh.f32 %v2081_v54  ;;  %v1881_v27 = vrot.slane %v1812_v62, 4  ;;  %v1814_v11 = vpop.f32.mrb[189].mxu0  ;;  %v2083_v6 = vadd.f32 %v7210_v57, %v2007_v35  ;;  %v5622_v54 = vld [vmem:[%s8662_s4 + $0x8] sm:$0xff]   ;;  %v5624_v62 = vld [vmem:[%s8662_s4 + $0x18] sm:$0xff]  }
 0x25e   :  { %v5866_v19 = vpop.eup %5865  ;;  %v1882_v47 = vrot.slane %v1814_v11, 4  ;;  %v1816_v44 = vpop.f32.mrb[190].mxu0  ;;  %5877 = vtanh.f32 %v2082_v5  ;;  %v5606_v35 = vld [vmem:[%s8661_s3 + $0x24] ss:$8 sps:$4 sm:$0xff]   ;;  %v5609_v5 = vld [vmem:[%s8661_s3 + $0x34] ss:$8 sps:$4 sm:$0xff]  }
 0x25f   :  { %v5868_v25 = vpop.eup %5867  ;;  %v1888_v22 = vsel %vm1885_vm4, %v1879_v8, %v1881_v27  ;;  %v1883_v20 = vrot.slane %v1816_v44, 4  ;;  %v1818_v55 = vpop.f32.mrb[191].mxu0  ;;  %v2178_v33 = vpack.c.bf16 %v5866_v19, %v5862_v29  ;;  %5879 = vtanh.f32 %v2083_v6  ;;  %v5623_v29 = vld [vmem:[%s8662_s4 + $0x10] sm:$0xff]   ;;  %v5626_v11 = vld [vmem:[%s8662_s4 + $0x28] sm:$0xff]  }
 0x260   :  { %v2008_v12 = vadd.f32 %v1888_v22, %v7148_v18  ;;  %v1889_v15 = vsel %vm1885_vm4, %v1880_v42, %v1882_v47  ;;  %v1884_v36 = vrot.slane %v1818_v55, 4  ;;  %v2179_v3 = vpack.c.bf16 %v5868_v25, %v5864_v50  ;;  %v5870_v2 = vpop.eup %5869  ;;  %v5608_v50 = vld [vmem:[%s8661_s3 + $0x20] ss:$8 sps:$4 sm:$0xff]   ;;  %v5611_v19 = vld [vmem:[%s8661_s3 + $0x30] ss:$8 sps:$4 sm:$0xff]  }
 0x261   :  { %v2009_v24 = vadd.f32 %v1889_v15, %v7160_v41  ;;  %v1886_v52 = vsel %vm1885_vm4, %v1881_v27, %v1883_v20  ;;  %v1948_v39 = vsel %vm1885_vm4, %v1883_v20, %v8795_v58  ;;  %v5872_v40 = vpop.eup %5871  ;;  %v5625_v27 = vld [vmem:[%s8662_s4 + $0x20] sm:$0xff]   ;;  %v5627_v44 = vld [vmem:[%s8662_s4 + $0x30] sm:$0xff]   ;;  %v5628_v25 = vld [vmem:[%s8662_s4 + $0x38] sm:$0xff]  }
 0x262   :  { %v2084_v9 = vadd.f32 %v7201_v59, %v2008_v12  ;;  %v2010_v18 = vadd.f32 %v1886_v52, %v7175_v49  ;;  %v2012_v26 = vadd.f32 %v1948_v39, %v7177_v1  ;;  %v1887_v28 = vsel %vm1885_vm4, %v1882_v47, %v1884_v36  ;;  %2294 = vmatprep.subr.bf16.mxu1 %v2179_v3  ;;  %v5612_v47 = vld [vmem:[%s8661_s3 + $0x44] ss:$8 sps:$4 sm:$0xff]   ;;  %v5614_v6 = vld [vmem:[%s8661_s3 + $0x40] ss:$8 sps:$4 sm:$0xff]   ;;  %v5615_v22 = vld [vmem:[%s8661_s3 + $0x54] ss:$8 sps:$4 sm:$0xff]  }
 0x263   :  { %v2085_v41 = vadd.f32 %v7210_v57, %v2009_v24  ;;  %v1949_v10 = vsel %vm1885_vm4, %v1884_v36, %v8796_v60  ;;  %v2011_v48 = vadd.f32 %v1887_v28, %v7185_v43  ;;  %2295 = vmatpush1.bf16.msra.mxu1 %v2178_v33  ;;  %v5629_v20 = vld [vmem:[%s8662_s4 + $0x40] sm:$0xff]   ;;  %v5617_v55 = vld [vmem:[%s8661_s3 + $0x50] ss:$8 sps:$4 sm:$0xff]   ;;  %v5630_v15 = vld [vmem:[%s8662_s4 + $0x48] sm:$0xff]  }
 0x264   :  { %5881 = vtanh.f32 %v2084_v9  ;;  %v2086_v49 = vadd.f32 %v7201_v59, %v2010_v18  ;;  %v2088_v1 = vadd.f32 %v7201_v59, %v2012_v26  ;;  %v2013_v37 = vadd.f32 %v1949_v10, %v8797_v51  ;;  %v5618_v33 = vld [vmem:[%s8661_s3 + $0x64] ss:$8 sps:$4 sm:$0xff]   ;;  %v5620_v12 = vld [vmem:[%s8661_s3 + $0x60] ss:$8 sps:$4 sm:$0xff]   ;;  %v5631_v36 = vld [vmem:[%s8662_s4 + $0x50] ss:$0 sps:$4 sm:$0xff]  }
 0x265   :  { %5883 = vtanh.f32 %v2085_v41  ;;  %v2087_v7 = vadd.f32 %v7210_v57, %v2011_v48  ;;  %v2495_v3 = vsel %vm2493_vm5, %v5631_v36, 0  ;;  %v5632_v24 = vld [vmem:[%s8663_s5] ss:$8 sps:$4 sm:$0xff]   ;;  %v5634_v52 = vld [vmem:[%s8663_s5 + $0x4] ss:$8 sps:$4 sm:$0xff]  }
 0x266   :  { %v5874_v46 = vpop.eup %5873  ;;  %5885 = vtanh.f32 %v2086_v49  ;;  %v2089_v21 = vadd.f32 %v7210_v57, %v2013_v37  ;;  %v5637_v58 = vld [vmem:[%s8663_s5 + $0x5c] ss:$8 sps:$4 sm:$0xff]   ;;  %2920 = vmatprep.subr.bf16.mxu0 %v5634_v52  ;;  %v5638_v9 = vld [vmem:[%s8663_s5 + $0x10] ss:$8 sps:$4 sm:$0xff]   ;;  %v5647_v26 = vld [vmem:[%s8663_s5 + $0x20] ss:$8 sps:$4 sm:$0xff]  }
 0x267   :  { %v5876_v14 = vpop.eup %5875  ;;  %5887 = vtanh.f32 %v2088_v1  ;;  %v2180_v43 = vpack.c.bf16 %v5874_v46, %v5870_v2  ;;  %v5640_v39 = vld [vmem:[%s8663_s5 + $0x14] ss:$8 sps:$4 sm:$0xff]   ;;  %2921 = vmatpush1.bf16.msra.mxu0 %v5632_v24  ;;  %v5649_v18 = vld [vmem:[%s8663_s5 + $0x24] ss:$8 sps:$4 sm:$0xff]   ;;  %v5653_v41 = vld [vmem:[%s8663_s5 + $0x30] ss:$8 sps:$4 sm:$0xff]  }
 0x268   :  { %5889 = vtanh.f32 %v2087_v7  ;;  %v2181_v4 = vpack.c.bf16 %v5876_v14, %v5872_v40  ;;  %v5878_v63 = vpop.eup %5877  ;;  %2922 = vmatprep.subr.bf16.mxu0 %v5640_v39  ;;  %v5655_v28 = vld [vmem:[%s8663_s5 + $0x34] ss:$8 sps:$4 sm:$0xff]   ;;  %v5661_v60 = vld [vmem:[%s8663_s5 + $0x44] ss:$8 sps:$4 sm:$0xff]   ;;  %v5659_v10 = vld [vmem:[%s8663_s5 + $0x40] ss:$8 sps:$4 sm:$0xff]  }
 0x269   :  { %5891 = vtanh.f32 %v2089_v21  ;;  %v5880_v59 = vpop.eup %5879  ;;  %v5635_v40 = vld [vmem:[%s8663_s5 + $0x58] ss:$8 sps:$4 sm:$0xff]   ;;  %v5643_v7 = vld [vmem:[%s8663_s5 + $0x6c] ss:$8 sps:$4 sm:$0xff]   ;;  %v5641_v21 = vld [vmem:[%s8663_s5 + $0x68] ss:$8 sps:$4 sm:$0xff]  }
 0x26a   :  { %2296 = vmatprep.subr.bf16.mxu1 %v2181_v4  ;;  %v5098_v52 = vld [vmem:[%s8663_s5 + $0xa8] sm:$0x33] }
 0x26b   :  { %2297 = vmatpush1.bf16.msra.mxu1 %v2180_v43  ;;  %2923 = vmatpush1.bf16.msra.mxu0 %v5638_v9  ;;  %v5646_v43 = vld [vmem:[%s8663_s5 + $0x7c] ss:$8 sps:$4 sm:$0xff]   ;;  %v5110_v39 = vcombine.high %v5098_v52, %v5098_v52 }
 0x26c   :  { %2924 = vmatprep.subr.bf16.mxu0 %v5649_v18  ;;  %v5109_v18 = vcombine.low %v5098_v52, %v5098_v52 }
 0x26e   :  { %v5882_v16 = vpop.eup %5881 }
 0x26f   :  { %v5884_v8 = vpop.eup %5883  ;;  %v2182_v17 = vpack.c.bf16 %v5882_v16, %v5878_v63  ;;  %2925 = vmatpush1.bf16.msra.mxu0 %v5647_v26 }
 0x270   :  { %v5886_v45 = vpop.eup %5885  ;;  %v2183_v34 = vpack.c.bf16 %v5884_v8, %v5880_v59  ;;  %2926 = vmatprep.subr.bf16.mxu0 %v5655_v28  ;;  %v5644_v8 = vld [vmem:[%s8663_s5 + $0x78] ss:$8 sps:$4 sm:$0xff]   ;;  %v2695_v28 = vsel %vm2693_vm7, %v5109_v18, 0 }
 0x271   :  { %v5888_v13 = vpop.eup %5887 }
 0x272   :  { %v5890_v42 = vpop.eup %5889  ;;  %2298 = vmatprep.subr.bf16.mxu1 %v2183_v34  ;;  %v2184_v31 = vpack.c.bf16 %v5888_v13, %v5886_v45  ;;  %v5650_v34 = vld [vmem:[%s8663_s5 + $0x88] ss:$8 sps:$4 sm:$0xff]  }
 0x273   :  { %v5892_v57 = vpop.eup %5891  ;;  %2299 = vmatpush1.bf16.msra.mxu1 %v2182_v17  ;;  %2927 = vmatpush1.bf16.msra.mxu0 %v5653_v41  ;;  %v5652_v17 = vld [vmem:[%s8663_s5 + $0x8c] ss:$8 sps:$4 sm:$0xff]  }
 0x274   :  { %v2185_v0 = vpack.c.bf16 %v5892_v57, %v5890_v42  ;;  %2928 = vmatprep.subr.bf16.mxu0 %v5661_v60  ;;  %v5658_v42 = vld [vmem:[%s8663_s5 + $0x9c] ss:$8 sps:$4 sm:$0xff]  }
 0x275   :  { %v5668_v60 = vld [vmem:[%s8663_s5 + $0xb4] ss:$8 sps:$4 sm:$0xff]  }
 0x276   :  { %2300 = vmatprep.subr.bf16.mxu1 %v2185_v0 }
 0x277   :  { %2301 = vmatpush1.bf16.msra.mxu1 %v2184_v31  ;;  %2929 = vmatpush1.bf16.msra.mxu0 %v5659_v10  ;;  %v5677_v10 = vld [vmem:[%s8663_s5 + $0x10c] ss:$8 sps:$4 sm:$0xff]  }
 0x278   :  { %2497 = vmatprep.subr.bf16.mxu1 %v8798_v23 }
 0x27a   :  { %2303 = vmatmul.mubr.bf16.vlgmr.msra.gmra.mrb[128].mxu1 %v5600_v61 }
 0x27b   :  { %2312 = vmatprep.mubr.bf16.mxu1 %v5603_v56  ;;  %2498 = vmatpush1.bf16.msra.mxu1 %v5621_v53  ;;  %v5656_v56 = vld [vmem:[%s8663_s5 + $0x98] ss:$8 sps:$4 sm:$0xff]  }
 0x27c   :  { %2499 = vmatprep.subr.bf16.mxu1 %v8798_v23 }
 0x27f   :  { %2500 = vmatpush1.bf16.msra.mxu1 %v5622_v54 }
 0x280   :  { %2501 = vmatprep.subr.bf16.mxu1 %v8798_v23 }
 0x282   :  { %2313 = vmatmul.mubr.bf16.gmra.mrb[132].mxu1 %v5605_v32 }
 0x283   :  { %2322 = vmatprep.mubr.bf16.mxu1 %v5606_v35  ;;  %2502 = vmatpush1.bf16.msra.mxu1 %v5623_v29 }
 0x284   :  { %2503 = vmatprep.subr.bf16.mxu1 %v8798_v23 }
 0x287   :  { %2504 = vmatpush1.bf16.msra.mxu1 %v5624_v62 }
 0x288   :  { %2505 = vmatprep.subr.bf16.mxu1 %v8798_v23 }
 0x28a   :  { %2323 = vmatmul.mubr.bf16.gmra.mrb[136].mxu1 %v5608_v50 }
 0x28b   :  { %2332 = vmatprep.mubr.bf16.mxu1 %v5609_v5  ;;  %2506 = vmatpush1.bf16.msra.mxu1 %v5625_v27 }
 0x28c   :  { %2507 = vmatprep.subr.bf16.mxu1 %v8798_v23 }
 0x28f   :  { %2508 = vmatpush1.bf16.msra.mxu1 %v5626_v11 }
 0x290   :  { %2509 = vmatprep.subr.bf16.mxu1 %v8798_v23 }
 0x292   :  { %2333 = vmatmul.mubr.bf16.gmra.mrb[140].mxu1 %v5611_v19 }
 0x293   :  { %2342 = vmatprep.mubr.bf16.mxu1 %v5612_v47  ;;  %2510 = vmatpush1.bf16.msra.mxu1 %v5627_v44 }
 0x294   :  { %2511 = vmatprep.subr.bf16.mxu1 %v8798_v23 }
 0x297   :  { %2512 = vmatpush1.bf16.msra.mxu1 %v5628_v25 }
 0x298   :  { %2513 = vmatprep.subr.bf16.mxu1 %v8798_v23 }
 0x29a   :  { %2343 = vmatmul.mubr.bf16.gmra.mrb[144].mxu1 %v5614_v6 }
 0x29b   :  { %2352 = vmatprep.mubr.bf16.mxu1 %v5615_v22  ;;  %2514 = vmatpush1.bf16.msra.mxu1 %v5629_v20 }
 0x29c   :  { %2515 = vmatprep.subr.bf16.mxu1 %v8798_v23 }
 0x29f   :  { %2516 = vmatpush1.bf16.msra.mxu1 %v5630_v15 }
 0x2a0   :  { %2517 = vmatprep.subr.bf16.mxu1 %v8798_v23 }
 0x2a2   :  { %2353 = vmatmul.mubr.bf16.gmra.mrb[148].mxu1 %v5617_v55 }
 0x2a3   :  { %2362 = vmatprep.mubr.bf16.mxu1 %v5618_v33  ;;  %2518 = vmatpush1.bf16.msra.mxu1 %v2495_v3 }
 0x2a4   :  { %2700 = vmatprep.subr.bf16.mxu1 %v5637_v58  ;;  %v2603_v58 = vld [vmem:[%s8663_s5 + $0x50] sm:$0x33] }
 0x2a5   :  { %v5130_v9 = vcombine.high %v2603_v58, %v2603_v58  ;;  %v5129_v26 = vcombine.low %v2603_v58, %v2603_v58 }
 0x2a7   :  { %5131 = vmatprep.subr.msk.bf16.mxu0 %vm2693_vm7, %v5130_v9  ;;  %v2915_v41 = vsel %vm2693_vm7, %v5129_v26, 0 }
 0x2a8   :  { %2931 = vmatpush1.bf16.msra.mxu0 %v2915_v41 }
 0x2a9   :  { %3356 = vmatprep.subr.bf16.mxu0 %v5677_v10 }
 0x2aa   :  { %2363 = vmatmul.mubr.bf16.gmra.mrb[152].mxu1 %v5620_v12 }
 0x34d   :  { %v2304_v48 = vpop.f32.mrb[128].mxu1 }
 0x34e   :  { %v2306_v2 = vpop.f32.mrb[129].mxu1 }
 0x34f   :  { %v2308_v49 = vpop.f32.mrb[130].mxu1 }
 0x350   :  { %v2373_v1 = vpack.c.bf16 %v2308_v49, %v2304_v48  ;;  %v2310_v51 = vpop.f32.mrb[131].mxu1 }
 0x351   :  { %v2374_v37 = vpack.c.bf16 %v2310_v51, %v2306_v2 }
 0x353   :  { %5081 = vmatprep.mubr.msk.bf16.mxu1 %vm2471_vm6, %v2374_v37  ;;  %v5666_v37 = vld [vmem:[%s8663_s5 + $0xb0] ss:$8 sps:$4 sm:$0xff]  }
 0x354   :  { %2530 = vmatmul.mubr.bf16.vlgmr.msra.gmra.mrb[156].mxu1 %v2373_v1 }
 0x355   :  { %v2314_v46 = vpop.f32.mrb[132].mxu1  ;;  %2701 = vmatpush1.bf16.msra.mxu1 %v5635_v40  ;;  %v5675_v40 = vld [vmem:[%s8663_s5 + $0x108] ss:$8 sps:$4 sm:$0xff]  }
 0x356   :  { %v2316_v14 = vpop.f32.mrb[133].mxu1  ;;  %2702 = vmatprep.subr.bf16.mxu1 %v5643_v7  ;;  %v5671_v7 = vld [vmem:[%s8663_s5 + $0xc4] ss:$8 sps:$4 sm:$0xff]  }
 0x357   :  { %v2318_v4 = vpop.f32.mrb[134].mxu1 }
 0x358   :  { %v2375_v63 = vpack.c.bf16 %v2318_v4, %v2314_v46  ;;  %v2320_v59 = vpop.f32.mrb[135].mxu1  ;;  %v5683_v46 = vld [vmem:[%s8663_s5 + $0x11c] ss:$8 sps:$4 sm:$0xff]  }
 0x359   :  { %v2376_v16 = vpack.c.bf16 %v2320_v59, %v2316_v14  ;;  %2703 = vmatpush1.bf16.msra.mxu1 %v5641_v21  ;;  %v5669_v21 = vld [vmem:[%s8663_s5 + $0xc0] ss:$8 sps:$4 sm:$0xff]   ;;  %v5674_v4 = vld [vmem:[%s8663_s5 + $0xd4] ss:$8 sps:$4 sm:$0xff]  }
 0x35a   :  { %2704 = vmatprep.subr.bf16.mxu1 %v5646_v43  ;;  %v5681_v14 = vld [vmem:[%s8663_s5 + $0x118] ss:$8 sps:$4 sm:$0xff]  }
 0x35b   :  { %5082 = vmatprep.mubr.msk.bf16.mxu1 %vm2471_vm6, %v2376_v16 }
 0x35c   :  { %2538 = vmatmul.mubr.bf16.gmra.mrb[160].mxu1 %v2375_v63  ;;  %v5686_v63 = vld [vmem:[%s8663_s5 + $0x12c] ss:$8 sps:$4 sm:$0xff]  }
 0x35d   :  { %v2324_v45 = vpop.f32.mrb[136].mxu1  ;;  %2705 = vmatpush1.bf16.msra.mxu1 %v5644_v8 }
 0x35e   :  { %v2326_v13 = vpop.f32.mrb[137].mxu1  ;;  %2706 = vmatprep.subr.bf16.mxu1 %v5652_v17 }
 0x35f   :  { %v2328_v31 = vpop.f32.mrb[138].mxu1 }
 0x360   :  { %v2377_v57 = vpack.c.bf16 %v2328_v31, %v2324_v45  ;;  %v2330_v0 = vpop.f32.mrb[139].mxu1  ;;  %v5672_v45 = vld [vmem:[%s8663_s5 + $0xd0] ss:$8 sps:$4 sm:$0xff]   ;;  %v5678_v31 = vld [vmem:[%s8663_s5 + $0xe0] ss:$8 sps:$4 sm:$0xff]  }
 0x361   :  { %v2378_v61 = vpack.c.bf16 %v2330_v0, %v2326_v13  ;;  %2707 = vmatpush1.bf16.msra.mxu1 %v5650_v34  ;;  %v5684_v34 = vld [vmem:[%s8663_s5 + $0x128] ss:$8 sps:$4 sm:$0xff]   ;;  %v5680_v13 = vld [vmem:[%s8663_s5 + $0xe4] ss:$8 sps:$4 sm:$0xff]   ;;  %v5692_v0 = vld [vmem:[%s8663_s5 + $0xf4] ss:$8 sps:$4 sm:$0xff]  }
 0x362   :  { %2708 = vmatprep.subr.bf16.mxu1 %v5658_v42  ;;  %v5689_v42 = vld [vmem:[%s8663_s5 + $0x13c] ss:$8 sps:$4 sm:$0xff]  }
 0x363   :  { %5083 = vmatprep.mubr.msk.bf16.mxu1 %vm2471_vm6, %v2378_v61 }
 0x364   :  { %2546 = vmatmul.mubr.bf16.gmra.mrb[164].mxu1 %v2377_v57  ;;  %v5687_v57 = vld [vmem:[%s8663_s5 + $0x138] ss:$8 sps:$4 sm:$0xff]  }
 0x365   :  { %v2334_v53 = vpop.f32.mrb[140].mxu1  ;;  %2709 = vmatpush1.bf16.msra.mxu1 %v5656_v56  ;;  %v5695_v56 = vld [vmem:[%s8663_s5 + $0x14c] ss:$8 sps:$4 sm:$0xff]  }
 0x366   :  { %v2336_v54 = vpop.f32.mrb[141].mxu1  ;;  %5111 = vmatprep.subr.msk.bf16.mxu1 %vm2693_vm7, %v5110_v39 }
 0x367   :  { %v2338_v32 = vpop.f32.mrb[142].mxu1 }
 0x368   :  { %v2379_v35 = vpack.c.bf16 %v2338_v32, %v2334_v53  ;;  %v2340_v29 = vpop.f32.mrb[143].mxu1  ;;  %v5149_v53 = vld [vmem:[%s8663_s5 + $0x100] sm:$0x33]  ;;  %v5180_v32 = vld [vmem:[%s8663_s5 + $0x158] sm:$0x33] }
 0x369   :  { %v2380_v62 = vpack.c.bf16 %v2340_v29, %v2336_v54  ;;  %2711 = vmatpush1.bf16.msra.mxu1 %v2695_v28 }
 0x36a   :  { %3096 = vmatprep.subr.bf16.mxu1 %v5668_v60 }
 0x36b   :  { %5084 = vmatprep.mubr.msk.bf16.mxu1 %vm2471_vm6, %v2380_v62 }
 0x36c   :  { %2554 = vmatmul.mubr.bf16.gmra.mrb[168].mxu1 %v2379_v35 }
 0x36d   :  { %v2344_v50 = vpop.f32.mrb[144].mxu1 }
 0x36e   :  { %v2346_v5 = vpop.f32.mrb[145].mxu1 }
 0x36f   :  { %v2348_v27 = vpop.f32.mrb[146].mxu1 }
 0x370   :  { %v2381_v11 = vpack.c.bf16 %v2348_v27, %v2344_v50  ;;  %v2350_v19 = vpop.f32.mrb[147].mxu1  ;;  %v5690_v50 = vld [vmem:[%s8663_s5 + $0xf0] ss:$8 sps:$4 sm:$0xff]   ;;  %v5161_v27 = vcombine.high %v5149_v53, %v5149_v53 }
 0x371   :  { %v2382_v47 = vpack.c.bf16 %v2350_v19, %v2346_v5  ;;  %v5693_v5 = vld [vmem:[%s8663_s5 + $0x148] ss:$8 sps:$4 sm:$0xff]   ;;  %v5160_v19 = vcombine.low %v5149_v53, %v5149_v53 }
 0x373   :  { %5085 = vmatprep.mubr.msk.bf16.mxu1 %vm2471_vm6, %v2382_v47  ;;  %v5191_v47 = vcombine.low %v5180_v32, %v5180_v32 }
 0x374   :  { %2562 = vmatmul.mubr.bf16.gmra.mrb[172].mxu1 %v2381_v11  ;;  %v5192_v11 = vcombine.high %v5180_v32, %v5180_v32 }
 0x375   :  { %v2354_v44 = vpop.f32.mrb[148].mxu1 }
 0x376   :  { %v2356_v25 = vpop.f32.mrb[149].mxu1 }
 0x377   :  { %v2358_v6 = vpop.f32.mrb[150].mxu1 }
 0x378   :  { %v2383_v22 = vpack.c.bf16 %v2358_v6, %v2354_v44  ;;  %v2360_v20 = vpop.f32.mrb[151].mxu1  ;;  %v3351_v6 = vsel %vm2693_vm7, %v5191_v47, 0 }
 0x379   :  { %v2384_v55 = vpack.c.bf16 %v2360_v20, %v2356_v25  ;;  %v3091_v25 = vsel %vm2693_vm7, %v5160_v19, 0 }
 0x37b   :  { %5086 = vmatprep.mubr.msk.bf16.mxu1 %vm2471_vm6, %v2384_v55 }
 0x37c   :  { %2570 = vmatmul.mubr.bf16.gmra.mrb[176].mxu1 %v2383_v22  ;;  %v5702_v22 = vld [vmem:[%s8663_s5 + $0x164] ss:$8 sps:$4 sm:$0xff]  }
 0x37d   :  { %v2364_v33 = vpop.f32.mrb[152].mxu1 }
 0x37e   :  { %v2366_v12 = vpop.f32.mrb[153].mxu1 }
 0x37f   :  { %v2368_v15 = vpop.f32.mrb[154].mxu1 }
 0x380   :  { %v2385_v36 = vpack.c.bf16 %v2368_v15, %v2364_v33  ;;  %v2370_v3 = vpop.f32.mrb[155].mxu1 }
 0x381   :  { %v2386_v24 = vpack.c.bf16 %v2370_v3, %v2366_v12 }
 0x383   :  { %5087 = vmatprep.mubr.msk.bf16.mxu1 %vm2471_vm6, %v2386_v24 }
 0x384   :  { %2578 = vmatmul.mubr.bf16.gmra.mrb[180].mxu1 %v2385_v36 }
 0x385   :  { %2732 = vmatprep.mubr.bf16.mxu1 %v8798_v23 }
 0x427   :  { %v2531_v48 = vpop.f32.mrb[156].mxu1 }
 0x428   :  { %v2533_v2 = vpop.f32.mrb[157].mxu1 }
 0x429   :  { %v2534_v49 = vpop.f32.mrb[158].mxu1  ;;  %v5700_v2 = vld [vmem:[%s8663_s5 + $0x160] ss:$8 sps:$4 sm:$0xff]  }
 0x42a   :  { %v7637_v1 = vpack.c.bf16 %v2534_v49, %v2531_v48  ;;  %v2536_v51 = vpop.f32.mrb[159].mxu1  ;;  %v5705_v49 = vld [vmem:[%s8663_s5 + $0x174] ss:$8 sps:$4 sm:$0xff]  }
 0x42b   :  { %v5703_v51 = vld [vmem:[%s8663_s5 + $0x170] ss:$8 sps:$4 sm:$0xff]  }
 0x42c   :  { %5112 = vmatmul.mubr.msk.bf16.vlgmr.msra.gmra.mrb[184].mxu1 %vm2671_vm8, %v7637_v1  ;;  %5132 = vmatmul.mubr.msk.bf16.vlgmr.msra.gmra.mrb[192].mxu0 %vm2671_vm8, %v7637_v1 }
 0x42d   :  { %2742 = vmatprep.mubr.bf16.mxu1 %v8798_v23  ;;  %2962 = vmatprep.mubr.bf16.mxu0 %v8798_v23 }
 0x42e   :  { %3097 = vmatpush1.bf16.msra.mxu1 %v5666_v37  ;;  %3357 = vmatpush1.bf16.msra.mxu0 %v5675_v40  ;;  %v5708_v37 = vld [vmem:[%s8663_s5 + $0x184] ss:$8 sps:$4 sm:$0xff]   ;;  %v5706_v40 = vld [vmem:[%s8663_s5 + $0x180] ss:$8 sps:$4 sm:$0xff]  }
 0x42f   :  { %v2539_v43 = vpop.f32.mrb[160].mxu1  ;;  %3098 = vmatprep.subr.bf16.mxu1 %v5671_v7  ;;  %3358 = vmatprep.subr.bf16.mxu0 %v5683_v46  ;;  %v5711_v7 = vld [vmem:[%s8663_s5 + $0x194] ss:$8 sps:$4 sm:$0xff]   ;;  %v5709_v46 = vld [vmem:[%s8663_s5 + $0x190] ss:$8 sps:$4 sm:$0xff]  }
 0x430   :  { %v2541_v59 = vpop.f32.mrb[161].mxu1 }
 0x431   :  { %v2542_v16 = vpop.f32.mrb[162].mxu1 }
 0x432   :  { %v7669_v8 = vpack.c.bf16 %v2542_v16, %v2539_v43  ;;  %v2544_v17 = vpop.f32.mrb[163].mxu1  ;;  %3099 = vmatpush1.bf16.msra.mxu1 %v5669_v21  ;;  %3359 = vmatpush1.bf16.msra.mxu0 %v5681_v14  ;;  %v5714_v21 = vld [vmem:[%s8663_s5 + $0x1a4] ss:$8 sps:$4 sm:$0xff]   ;;  %v5211_v14 = vld [vmem:[%s8663_s5 + $0x1b0] sm:$0x33] }
 0x433   :  { %3100 = vmatprep.subr.bf16.mxu1 %v5674_v4  ;;  %3360 = vmatprep.subr.bf16.mxu0 %v5686_v63  ;;  %v5712_v43 = vld [vmem:[%s8663_s5 + $0x1a0] ss:$8 sps:$4 sm:$0xff]   ;;  %v5223_v4 = vcombine.high %v5211_v14, %v5211_v14  ;;  %v5222_v63 = vcombine.low %v5211_v14, %v5211_v14 }
 0x434   :  { %5113 = vmatmul.mubr.msk.bf16.gmra.mrb[188].mxu1 %vm2671_vm8, %v7669_v8  ;;  %5133 = vmatmul.mubr.msk.bf16.gmra.mrb[196].mxu0 %vm2671_vm8, %v7669_v8 }
 0x435   :  { %2752 = vmatprep.mubr.bf16.mxu1 %v8798_v23  ;;  %2972 = vmatprep.mubr.bf16.mxu0 %v8798_v23  ;;  %v3611_v59 = vsel %vm2693_vm7, %v5222_v63, 0 }
 0x436   :  { %3101 = vmatpush1.bf16.msra.mxu1 %v5672_v45  ;;  %3361 = vmatpush1.bf16.msra.mxu0 %v5684_v34 }
 0x437   :  { %v2547_v61 = vpop.f32.mrb[164].mxu1  ;;  %3102 = vmatprep.subr.bf16.mxu1 %v5680_v13  ;;  %3362 = vmatprep.subr.bf16.mxu0 %v5689_v42 }
 0x438   :  { %v2549_v54 = vpop.f32.mrb[165].mxu1 }
 0x439   :  { %v2550_v35 = vpop.f32.mrb[166].mxu1 }
 0x43a   :  { %v7707_v29 = vpack.c.bf16 %v2550_v35, %v2547_v61  ;;  %v2552_v62 = vpop.f32.mrb[167].mxu1  ;;  %3103 = vmatpush1.bf16.msra.mxu1 %v5678_v31  ;;  %3363 = vmatpush1.bf16.msra.mxu0 %v5687_v57 }
 0x43b   :  { %3104 = vmatprep.subr.bf16.mxu1 %v5692_v0  ;;  %3364 = vmatprep.subr.bf16.mxu0 %v5695_v56 }
 0x43c   :  { %5114 = vmatmul.mubr.msk.bf16.gmra.mrb[192].mxu1 %vm2671_vm8, %v7707_v29  ;;  %5134 = vmatmul.mubr.msk.bf16.gmra.mrb[200].mxu0 %vm2671_vm8, %v7707_v29 }
 0x43d   :  { %2762 = vmatprep.mubr.bf16.mxu1 %v8798_v23  ;;  %2982 = vmatprep.mubr.bf16.mxu0 %v8798_v23 }
 0x43e   :  { %3105 = vmatpush1.bf16.msra.mxu1 %v5690_v50  ;;  %3365 = vmatpush1.bf16.msra.mxu0 %v5693_v5 }
 0x43f   :  { %v2555_v44 = vpop.f32.mrb[168].mxu1  ;;  %5162 = vmatprep.subr.msk.bf16.mxu1 %vm2693_vm7, %v5161_v27  ;;  %5193 = vmatprep.subr.msk.bf16.mxu0 %vm2693_vm7, %v5192_v11 }
 0x440   :  { %v2557_v20 = vpop.f32.mrb[169].mxu1 }
 0x441   :  { %v2558_v55 = vpop.f32.mrb[170].mxu1 }
 0x442   :  { %v7728_v33 = vpack.c.bf16 %v2558_v55, %v2555_v44  ;;  %v2560_v12 = vpop.f32.mrb[171].mxu1  ;;  %3107 = vmatpush1.bf16.msra.mxu1 %v3091_v25  ;;  %3367 = vmatpush1.bf16.msra.mxu0 %v3351_v6 }
 0x443   :  { %3616 = vmatprep.subr.bf16.mxu1 %v5702_v22 }
 0x444   :  { %5115 = vmatmul.mubr.msk.bf16.gmra.mrb[196].mxu1 %vm2671_vm8, %v7728_v33  ;;  %5135 = vmatmul.mubr.msk.bf16.gmra.mrb[204].mxu0 %vm2671_vm8, %v7728_v33 }
 0x445   :  { %2772 = vmatprep.mubr.bf16.mxu1 %v8798_v23  ;;  %2992 = vmatprep.mubr.bf16.mxu0 %v8798_v23 }
 0x447   :  { %v2563_v15 = vpop.f32.mrb[172].mxu1 }
 0x448   :  { %v2565_v36 = vpop.f32.mrb[173].mxu1 }
 0x449   :  { %v2566_v3 = vpop.f32.mrb[174].mxu1 }
 0x44a   :  { %v7736_v24 = vpack.c.bf16 %v2566_v3, %v2563_v15  ;;  %v2568_v52 = vpop.f32.mrb[175].mxu1 }
 0x44c   :  { %5116 = vmatmul.mubr.msk.bf16.gmra.mrb[200].mxu1 %vm2671_vm8, %v7736_v24  ;;  %5136 = vmatmul.mubr.msk.bf16.gmra.mrb[208].mxu0 %vm2671_vm8, %v7736_v24 }
 0x44d   :  { %2782 = vmatprep.mubr.bf16.mxu1 %v8798_v23  ;;  %3002 = vmatprep.mubr.bf16.mxu0 %v8798_v23 }
 0x44f   :  { %v2571_v58 = vpop.f32.mrb[176].mxu1 }
 0x450   :  { %v2573_v39 = vpop.f32.mrb[177].mxu1 }
 0x451   :  { %v2574_v9 = vpop.f32.mrb[178].mxu1 }
 0x452   :  { %v7744_v18 = vpack.c.bf16 %v2574_v9, %v2571_v58  ;;  %v2576_v26 = vpop.f32.mrb[179].mxu1 }
 0x454   :  { %5117 = vmatmul.mubr.msk.bf16.gmra.mrb[204].mxu1 %vm2671_vm8, %v7744_v18  ;;  %5137 = vmatmul.mubr.msk.bf16.gmra.mrb[212].mxu0 %vm2671_vm8, %v7744_v18 }
 0x455   :  { %2792 = vmatprep.mubr.bf16.mxu1 %v8798_v23  ;;  %3012 = vmatprep.mubr.bf16.mxu0 %v8798_v23 }
 0x457   :  { %v2579_v28 = vpop.f32.mrb[180].mxu1 }
 0x458   :  { %v2581_v41 = vpop.f32.mrb[181].mxu1 }
 0x459   :  { %v2582_v60 = vpop.f32.mrb[182].mxu1 }
 0x45a   :  { %v7752_v10 = vpack.c.bf16 %v2582_v60, %v2579_v28  ;;  %v2584_v48 = vpop.f32.mrb[183].mxu1 }
 0x45c   :  { %5118 = vmatmul.mubr.msk.bf16.gmra.mrb[208].mxu1 %vm2671_vm8, %v7752_v10  ;;  %5138 = vmatmul.mubr.msk.bf16.gmra.mrb[216].mxu0 %vm2671_vm8, %v7752_v10 }
 0x45d   :  { %3128 = vmatprep.mubr.bf16.mxu1 %v8798_v23  ;;  %3388 = vmatprep.mubr.bf16.mxu0 %v8798_v23 }
 0x464   :  { %5163 = vmatmul.mubr.msk.bf16.vlgmr.msra.gmra.mrb[212].mxu1 %vm2671_vm8, %v7637_v1  ;;  %5194 = vmatmul.mubr.msk.bf16.vlgmr.msra.gmra.mrb[220].mxu0 %vm2671_vm8, %v7637_v1 }
 0x465   :  { %3138 = vmatprep.mubr.bf16.mxu1 %v8798_v23  ;;  %3398 = vmatprep.mubr.bf16.mxu0 %v8798_v23 }
 0x466   :  { %3617 = vmatpush1.bf16.msra.mxu1 %v5700_v2 }
 0x467   :  { %3618 = vmatprep.subr.bf16.mxu1 %v5705_v49 }
 0x46a   :  { %3619 = vmatpush1.bf16.msra.mxu1 %v5703_v51 }
 0x46b   :  { %3620 = vmatprep.subr.bf16.mxu1 %v5708_v37 }
 0x46c   :  { %5164 = vmatmul.mubr.msk.bf16.gmra.mrb[216].mxu1 %vm2671_vm8, %v7669_v8  ;;  %5195 = vmatmul.mubr.msk.bf16.gmra.mrb[224].mxu0 %vm2671_vm8, %v7669_v8 }
 0x46d   :  { %3148 = vmatprep.mubr.bf16.mxu1 %v8798_v23  ;;  %3408 = vmatprep.mubr.bf16.mxu0 %v8798_v23 }
 0x46e   :  { %3621 = vmatpush1.bf16.msra.mxu1 %v5706_v40 }
 0x46f   :  { %3622 = vmatprep.subr.bf16.mxu1 %v5711_v7 }
 0x472   :  { %3623 = vmatpush1.bf16.msra.mxu1 %v5709_v46 }
 0x473   :  { %3624 = vmatprep.subr.bf16.mxu1 %v5714_v21 }
 0x474   :  { %5165 = vmatmul.mubr.msk.bf16.gmra.mrb[220].mxu1 %vm2671_vm8, %v7707_v29  ;;  %5196 = vmatmul.mubr.msk.bf16.gmra.mrb[228].mxu0 %vm2671_vm8, %v7707_v29 }
 0x475   :  { %3158 = vmatprep.mubr.bf16.mxu1 %v8798_v23  ;;  %3418 = vmatprep.mubr.bf16.mxu0 %v8798_v23 }
 0x476   :  { %3625 = vmatpush1.bf16.msra.mxu1 %v5712_v43 }
 0x477   :  { %5224 = vmatprep.subr.msk.bf16.mxu1 %vm2693_vm7, %v5223_v4 }
 0x47a   :  { %3627 = vmatpush1.bf16.msra.mxu1 %v3611_v59 }
 0x47c   :  { %5166 = vmatmul.mubr.msk.bf16.gmra.mrb[224].mxu1 %vm2671_vm8, %v7728_v33  ;;  %5197 = vmatmul.mubr.msk.bf16.gmra.mrb[232].mxu0 %vm2671_vm8, %v7728_v33 }
 0x47d   :  { %3168 = vmatprep.mubr.bf16.mxu1 %v8798_v23  ;;  %3428 = vmatprep.mubr.bf16.mxu0 %v8798_v23 }
 0x484   :  { %5167 = vmatmul.mubr.msk.bf16.gmra.mrb[228].mxu1 %vm2671_vm8, %v7736_v24  ;;  %5198 = vmatmul.mubr.msk.bf16.gmra.mrb[236].mxu0 %vm2671_vm8, %v7736_v24 }
 0x485   :  { %3178 = vmatprep.mubr.bf16.mxu1 %v8798_v23  ;;  %3438 = vmatprep.mubr.bf16.mxu0 %v8798_v23 }
 0x48c   :  { %5168 = vmatmul.mubr.msk.bf16.gmra.mrb[232].mxu1 %vm2671_vm8, %v7744_v18  ;;  %5199 = vmatmul.mubr.msk.bf16.gmra.mrb[240].mxu0 %vm2671_vm8, %v7744_v18 }
 0x48d   :  { %3188 = vmatprep.mubr.bf16.mxu1 %v8798_v23  ;;  %3448 = vmatprep.mubr.bf16.mxu0 %v8798_v23 }
 0x494   :  { %5169 = vmatmul.mubr.msk.bf16.gmra.mrb[236].mxu1 %vm2671_vm8, %v7752_v10  ;;  %5200 = vmatmul.mubr.msk.bf16.gmra.mrb[244].mxu0 %vm2671_vm8, %v7752_v10 }
 0x495   :  { %3648 = vmatprep.mubr.bf16.mxu1 %v8798_v23  ;;  %3945 = vmatprep.mubr.bf16.mxu0 %v8798_v23 }
 0x49c   :  { %5225 = vmatmul.mubr.msk.bf16.vlgmr.msra.gmra.mrb[240].mxu1 %vm2671_vm8, %v7637_v1 }
 0x49d   :  { %3658 = vmatprep.mubr.bf16.mxu1 %v8798_v23 }
 0x4a4   :  { %5226 = vmatmul.mubr.msk.bf16.gmra.mrb[244].mxu1 %vm2671_vm8, %v7669_v8 }
 0x4a5   :  { %3668 = vmatprep.mubr.bf16.mxu1 %v8798_v23 }
 0x4ac   :  { %5227 = vmatmul.mubr.msk.bf16.gmra.mrb[248].mxu1 %vm2671_vm8, %v7707_v29 }
 0x4ad   :  { %3678 = vmatprep.mubr.bf16.mxu1 %v8798_v23 }
 0x4b4   :  { %5228 = vmatmul.mubr.msk.bf16.gmra.mrb[252].mxu1 %vm2671_vm8, %v7728_v33 }
 0x4b5   :  { %3688 = vmatprep.mubr.bf16.mxu1 %v8798_v23 }
 0x4bc   :  { %5229 = vmatmul.mubr.msk.bf16.gmra.mrb[0].mxu1 %vm2671_vm8, %v7736_v24 }
 0x4bd   :  { %3698 = vmatprep.mubr.bf16.mxu1 %v8798_v23 }
 0x4c4   :  { %5230 = vmatmul.mubr.msk.bf16.gmra.mrb[4].mxu1 %vm2671_vm8, %v7744_v18 }
 0x4c5   :  { %3708 = vmatprep.mubr.bf16.mxu1 %v8798_v23 }
 0x4cc   :  { %5231 = vmatmul.mubr.msk.bf16.gmra.mrb[8].mxu1 %vm2671_vm8, %v7752_v10 }
 0x4ff   :  { %v7854_v1 = vpop.f32.mrb[184].mxu1  ;;  %v2954_v16 = vpop.f32.mrb[192].mxu0 }
 0x500   :  { %v7856_v8 = vpop.f32.mrb[185].mxu1  ;;  %v2956_v17 = vpop.f32.mrb[193].mxu0  ;;  %v2803_v13 = vrot.slane %v7854_v1, 1 }
 0x501   :  { %v2738_v45 = vpop.f32.mrb[186].mxu1  ;;  %v2958_v34 = vpop.f32.mrb[194].mxu0  ;;  %v2804_v0 = vrot.slane %v7856_v8, 1 }
 0x502   :  { %v2805_v42 = vrot.slane %v2738_v45, 1  ;;  %v2740_v31 = vpop.f32.mrb[187].mxu1  ;;  %v2960_v57 = vpop.f32.mrb[195].mxu0 }
 0x503   :  { %v2806_v61 = vrot.slane %v2740_v31, 1 }
 0x504   :  { %v2855_v56 = vsel %vm503_vm1, %v2803_v13, %v2805_v42 }
 0x505   :  { %v7864_v53 = vadd.f32 %v2954_v16, %v2855_v56  ;;  %v2856_v54 = vsel %vm503_vm1, %v2804_v0, %v2806_v61 }
 0x506   :  { %v7870_v32 = vadd.f32 %v2956_v17, %v2856_v54 }
 0x507   :  { %v2744_v35 = vpop.f32.mrb[188].mxu1  ;;  %v2964_v29 = vpop.f32.mrb[196].mxu0 }
 0x508   :  { %v2807_v62 = vrot.slane %v2744_v35, 1  ;;  %v2746_v50 = vpop.f32.mrb[189].mxu1  ;;  %v2966_v5 = vpop.f32.mrb[197].mxu0 }
 0x509   :  { %v2808_v27 = vrot.slane %v2746_v50, 1  ;;  %v2748_v11 = vpop.f32.mrb[190].mxu1  ;;  %v2968_v19 = vpop.f32.mrb[198].mxu0 }
 0x50a   :  { %v2853_v47 = vsel %vm503_vm1, %v2805_v42, %v2807_v62  ;;  %v2809_v44 = vrot.slane %v2748_v11, 1  ;;  %v2750_v25 = vpop.f32.mrb[191].mxu1  ;;  %v2970_v6 = vpop.f32.mrb[199].mxu0 }
 0x50b   :  { %v7874_v22 = vadd.f32 %v2958_v34, %v2853_v47  ;;  %v2854_v20 = vsel %vm503_vm1, %v2806_v61, %v2808_v27  ;;  %v2810_v55 = vrot.slane %v2750_v25, 1 }
 0x50c   :  { %v7878_v33 = vadd.f32 %v2960_v57, %v2854_v20  ;;  %v2851_v12 = vsel %vm503_vm1, %v2807_v62, %v2809_v44 }
 0x50d   :  { %v7882_v15 = vadd.f32 %v2964_v29, %v2851_v12  ;;  %v2852_v36 = vsel %vm503_vm1, %v2808_v27, %v2810_v55 }
 0x50e   :  { %v7886_v3 = vadd.f32 %v2966_v5, %v2852_v36 }
 0x50f   :  { %v2754_v24 = vpop.f32.mrb[192].mxu1  ;;  %v2974_v52 = vpop.f32.mrb[200].mxu0 }
 0x510   :  { %v2811_v58 = vrot.slane %v2754_v24, 1  ;;  %v2756_v39 = vpop.f32.mrb[193].mxu1  ;;  %v2976_v9 = vpop.f32.mrb[201].mxu0 }
 0x511   :  { %v2812_v18 = vrot.slane %v2756_v39, 1  ;;  %v2758_v26 = vpop.f32.mrb[194].mxu1  ;;  %v2978_v28 = vpop.f32.mrb[202].mxu0 }
 0x512   :  { %v2849_v41 = vsel %vm503_vm1, %v2809_v44, %v2811_v58  ;;  %v2813_v60 = vrot.slane %v2758_v26, 1  ;;  %v2760_v10 = vpop.f32.mrb[195].mxu1  ;;  %v2980_v48 = vpop.f32.mrb[203].mxu0 }
 0x513   :  { %v7890_v2 = vadd.f32 %v2968_v19, %v2849_v41  ;;  %v2850_v49 = vsel %vm503_vm1, %v2810_v55, %v2812_v18  ;;  %v2814_v51 = vrot.slane %v2760_v10, 1 }
 0x514   :  { %v7894_v37 = vadd.f32 %v2970_v6, %v2850_v49  ;;  %v2847_v40 = vsel %vm503_vm1, %v2811_v58, %v2813_v60 }
 0x515   :  { %v7898_v7 = vadd.f32 %v2974_v52, %v2847_v40  ;;  %v2848_v46 = vsel %vm503_vm1, %v2812_v18, %v2814_v51 }
 0x516   :  { %v7902_v21 = vadd.f32 %v2976_v9, %v2848_v46 }
 0x517   :  { %v2764_v14 = vpop.f32.mrb[196].mxu1  ;;  %v2984_v43 = vpop.f32.mrb[204].mxu0 }
 0x518   :  { %v2815_v4 = vrot.slane %v2764_v14, 1  ;;  %v2766_v63 = vpop.f32.mrb[197].mxu1  ;;  %v2986_v59 = vpop.f32.mrb[205].mxu0 }
 0x519   :  { %v2816_v16 = vrot.slane %v2766_v63, 1  ;;  %v2768_v17 = vpop.f32.mrb[198].mxu1  ;;  %v2988_v45 = vpop.f32.mrb[206].mxu0 }
 0x51a   :  { %v2845_v34 = vsel %vm503_vm1, %v2813_v60, %v2815_v4  ;;  %v2817_v42 = vrot.slane %v2768_v17, 1  ;;  %v2770_v31 = vpop.f32.mrb[199].mxu1  ;;  %v2990_v57 = vpop.f32.mrb[207].mxu0 }
 0x51b   :  { %v7906_v61 = vadd.f32 %v2978_v28, %v2845_v34  ;;  %v2846_v56 = vsel %vm503_vm1, %v2814_v51, %v2816_v16  ;;  %v2818_v54 = vrot.slane %v2770_v31, 1 }
 0x51c   :  { %v7910_v35 = vadd.f32 %v2980_v48, %v2846_v56  ;;  %v2843_v29 = vsel %vm503_vm1, %v2815_v4, %v2817_v42 }
 0x51d   :  { %v7914_v62 = vadd.f32 %v2984_v43, %v2843_v29  ;;  %v2844_v50 = vsel %vm503_vm1, %v2816_v16, %v2818_v54 }
 0x51e   :  { %v7918_v5 = vadd.f32 %v2986_v59, %v2844_v50 }
 0x51f   :  { %v2774_v27 = vpop.f32.mrb[200].mxu1  ;;  %v2994_v11 = vpop.f32.mrb[208].mxu0 }
 0x520   :  { %v2819_v19 = vrot.slane %v2774_v27, 1  ;;  %v2776_v47 = vpop.f32.mrb[201].mxu1  ;;  %v2996_v44 = vpop.f32.mrb[209].mxu0 }
 0x521   :  { %v2820_v25 = vrot.slane %v2776_v47, 1  ;;  %v2778_v6 = vpop.f32.mrb[202].mxu1  ;;  %v2998_v20 = vpop.f32.mrb[210].mxu0 }
 0x522   :  { %v2841_v55 = vsel %vm503_vm1, %v2817_v42, %v2819_v19  ;;  %v2821_v12 = vrot.slane %v2778_v6, 1  ;;  %v2780_v36 = vpop.f32.mrb[203].mxu1  ;;  %v3000_v24 = vpop.f32.mrb[211].mxu0 }
 0x523   :  { %v7922_v52 = vadd.f32 %v2988_v45, %v2841_v55  ;;  %v2842_v58 = vsel %vm503_vm1, %v2818_v54, %v2820_v25  ;;  %v2822_v39 = vrot.slane %v2780_v36, 1 }
 0x524   :  { %v7926_v9 = vadd.f32 %v2990_v57, %v2842_v58  ;;  %v2839_v18 = vsel %vm503_vm1, %v2819_v19, %v2821_v12 }
 0x525   :  { %v7930_v26 = vadd.f32 %v2994_v11, %v2839_v18  ;;  %v2840_v28 = vsel %vm503_vm1, %v2820_v25, %v2822_v39 }
 0x526   :  { %v7934_v41 = vadd.f32 %v2996_v44, %v2840_v28 }
 0x527   :  { %v2784_v60 = vpop.f32.mrb[204].mxu1  ;;  %v3004_v10 = vpop.f32.mrb[212].mxu0 }
 0x528   :  { %v2823_v48 = vrot.slane %v2784_v60, 1  ;;  %v2786_v49 = vpop.f32.mrb[205].mxu1  ;;  %v3006_v51 = vpop.f32.mrb[213].mxu0 }
 0x529   :  { %v2824_v40 = vrot.slane %v2786_v49, 1  ;;  %v2788_v46 = vpop.f32.mrb[206].mxu1  ;;  %v3008_v14 = vpop.f32.mrb[214].mxu0 }
 0x52a   :  { %v2837_v43 = vsel %vm503_vm1, %v2821_v12, %v2823_v48  ;;  %v2825_v4 = vrot.slane %v2788_v46, 1  ;;  %v2790_v63 = vpop.f32.mrb[207].mxu1  ;;  %v3010_v59 = vpop.f32.mrb[215].mxu0 }
 0x52b   :  { %v7938_v16 = vadd.f32 %v2998_v20, %v2837_v43  ;;  %v2838_v17 = vsel %vm503_vm1, %v2822_v39, %v2824_v40  ;;  %v2826_v45 = vrot.slane %v2790_v63, 1 }
 0x52c   :  { %v7942_v34 = vadd.f32 %v3000_v24, %v2838_v17  ;;  %v2835_v42 = vsel %vm503_vm1, %v2823_v48, %v2825_v4 }
 0x52d   :  { %v7946_v31 = vadd.f32 %v3004_v10, %v2835_v42  ;;  %v2836_v57 = vsel %vm503_vm1, %v2824_v40, %v2826_v45 }
 0x52e   :  { %v7950_v56 = vadd.f32 %v3006_v51, %v2836_v57 }
 0x52f   :  { %v2794_v54 = vpop.f32.mrb[208].mxu1  ;;  %v3014_v29 = vpop.f32.mrb[216].mxu0 }
 0x530   :  { %v2827_v50 = vrot.slane %v2794_v54, 1  ;;  %v2796_v27 = vpop.f32.mrb[209].mxu1  ;;  %v3016_v11 = vpop.f32.mrb[217].mxu0 }
 0x531   :  { %v2828_v19 = vrot.slane %v2796_v27, 1  ;;  %v2798_v47 = vpop.f32.mrb[210].mxu1  ;;  %v3018_v44 = vpop.f32.mrb[218].mxu0 }
 0x532   :  { %v2833_v25 = vsel %vm503_vm1, %v2825_v4, %v2827_v50  ;;  %v2829_v6 = vrot.slane %v2798_v47, 1  ;;  %v2800_v20 = vpop.f32.mrb[211].mxu1  ;;  %v3020_v55 = vpop.f32.mrb[219].mxu0 }
 0x533   :  { %v7954_v12 = vadd.f32 %v3008_v14, %v2833_v25  ;;  %v2834_v36 = vsel %vm503_vm1, %v2826_v45, %v2828_v19  ;;  %v2830_v24 = vrot.slane %v2800_v20, 1 }
 0x534   :  { %v7958_v58 = vadd.f32 %v3010_v59, %v2834_v36  ;;  %v2831_v39 = vsel %vm503_vm1, %v2827_v50, %v2829_v6  ;;  %v2857_v18 = vsel %vm503_vm1, %v2829_v6, %v2803_v13 }
 0x535   :  { %v7966_v28 = vadd.f32 %v3014_v29, %v2831_v39  ;;  %v7968_v60 = vadd.f32 %v3018_v44, %v2857_v18  ;;  %v2832_v10 = vsel %vm503_vm1, %v2828_v19, %v2830_v24  ;;  %v2858_v48 = vsel %vm503_vm1, %v2830_v24, %v2804_v0 }
 0x536   :  { %v7976_v49 = vadd.f32 %v3016_v11, %v2832_v10  ;;  %v7978_v51 = vadd.f32 %v3020_v55, %v2858_v48 }
 0x537   :  { %v7980_v1 = vpop.f32.mrb[212].mxu1  ;;  %v7982_v40 = vpop.f32.mrb[220].mxu0 }
 0x538   :  { %v7984_v13 = vpop.f32.mrb[213].mxu1  ;;  %v7986_v46 = vpop.f32.mrb[221].mxu0  ;;  %v3199_v14 = vrot.slane %v7980_v1, 2  ;;  %v3459_v43 = vrot.slane %v7982_v40, 3 }
 0x539   :  { %v3134_v8 = vpop.f32.mrb[214].mxu1  ;;  %v3394_v4 = vpop.f32.mrb[222].mxu0  ;;  %v3200_v0 = vrot.slane %v7984_v13, 2  ;;  %v3460_v63 = vrot.slane %v7986_v46, 3 }
 0x53a   :  { %v3201_v59 = vrot.slane %v3134_v8, 2  ;;  %v3461_v17 = vrot.slane %v3394_v4, 3  ;;  %v3136_v45 = vpop.f32.mrb[215].mxu1  ;;  %v3396_v42 = vpop.f32.mrb[223].mxu0 }
 0x53b   :  { %v3202_v57 = vrot.slane %v3136_v45, 2  ;;  %v3462_v54 = vrot.slane %v3396_v42, 3 }
 0x53c   :  { %v3251_v29 = vsel %vm1063_vm2, %v3199_v14, %v3201_v59  ;;  %v3511_v50 = vsel %vm1474_vm3, %v3459_v43, %v3461_v17 }
 0x53d   :  { %v3255_v27 = vadd.f32 %v3251_v29, %v7864_v53  ;;  %v3252_v11 = vsel %vm1063_vm2, %v3200_v0, %v3202_v57  ;;  %v3512_v19 = vsel %vm1474_vm3, %v3460_v63, %v3462_v54 }
 0x53e   :  { %v3256_v47 = vadd.f32 %v3252_v11, %v7870_v32 }
 0x53f   :  { %v8010_v44 = vadd.f32 %v3511_v50, %v3255_v27  ;;  %v3140_v25 = vpop.f32.mrb[216].mxu1  ;;  %v3400_v6 = vpop.f32.mrb[224].mxu0 }
 0x540   :  { %v8012_v20 = vadd.f32 %v3512_v19, %v3256_v47  ;;  %v3203_v55 = vrot.slane %v3140_v25, 2  ;;  %v3463_v53 = vrot.slane %v3400_v6, 3  ;;  %v3142_v36 = vpop.f32.mrb[217].mxu1  ;;  %v3402_v24 = vpop.f32.mrb[225].mxu0 }
 0x541   :  { %v3204_v39 = vrot.slane %v3142_v36, 2  ;;  %v3464_v18 = vrot.slane %v3402_v24, 3  ;;  %v3144_v10 = vpop.f32.mrb[218].mxu1  ;;  %v3404_v48 = vpop.f32.mrb[226].mxu0 }
 0x542   :  { %v3249_v8 = vsel %vm1063_vm2, %v3201_v59, %v3203_v55  ;;  %v3509_v32 = vsel %vm1474_vm3, %v3461_v17, %v3463_v53  ;;  %v3205_v4 = vrot.slane %v3144_v10, 2  ;;  %v3465_v45 = vrot.slane %v3404_v48, 3  ;;  %v3146_v42 = vpop.f32.mrb[219].mxu1  ;;  %v3406_v29 = vpop.f32.mrb[227].mxu0 }
 0x543   :  { %v3257_v50 = vadd.f32 %v3249_v8, %v7874_v22  ;;  %v3250_v27 = vsel %vm1063_vm2, %v3202_v57, %v3204_v39  ;;  %v3510_v11 = vsel %vm1474_vm3, %v3462_v54, %v3464_v18  ;;  %v3206_v19 = vrot.slane %v3146_v42, 2 }
 0x544   :  { %v3258_v47 = vadd.f32 %v3250_v27, %v7878_v33  ;;  %v3247_v59 = vsel %vm1063_vm2, %v3203_v55, %v3205_v4  ;;  %v3507_v17 = vsel %vm1474_vm3, %v3463_v53, %v3465_v45  ;;  %v3466_v25 = vrot.slane %v3406_v29, 3 }
 0x545   :  { %v8028_v6 = vadd.f32 %v3509_v32, %v3257_v50  ;;  %v3259_v22 = vadd.f32 %v3247_v59, %v7882_v15  ;;  %v3248_v57 = vsel %vm1063_vm2, %v3204_v39, %v3206_v19 }
 0x546   :  { %v8033_v36 = vadd.f32 %v3510_v11, %v3258_v47  ;;  %v3260_v54 = vadd.f32 %v3248_v57, %v7886_v3  ;;  %v3508_v33 = vsel %vm1474_vm3, %v3464_v18, %v3466_v25 }
 0x547   :  { %v8038_v24 = vadd.f32 %v3507_v17, %v3259_v22  ;;  %v3150_v55 = vpop.f32.mrb[220].mxu1  ;;  %v3410_v10 = vpop.f32.mrb[228].mxu0 }
 0x548   :  { %v8040_v53 = vadd.f32 %v3508_v33, %v3260_v54  ;;  %v3207_v48 = vrot.slane %v3150_v55, 2  ;;  %v3467_v8 = vrot.slane %v3410_v10, 3  ;;  %v3152_v32 = vpop.f32.mrb[221].mxu1  ;;  %v3412_v15 = vpop.f32.mrb[229].mxu0 }
 0x549   :  { %v3208_v42 = vrot.slane %v3152_v32, 2  ;;  %v3468_v29 = vrot.slane %v3412_v15, 3  ;;  %v3154_v39 = vpop.f32.mrb[222].mxu1  ;;  %v3414_v50 = vpop.f32.mrb[230].mxu0 }
 0x54a   :  { %v3245_v3 = vsel %vm1063_vm2, %v3205_v4, %v3207_v48  ;;  %v3505_v18 = vsel %vm1474_vm3, %v3465_v45, %v3467_v8  ;;  %v3209_v27 = vrot.slane %v3154_v39, 2  ;;  %v3469_v11 = vrot.slane %v3414_v50, 3  ;;  %v3156_v47 = vpop.f32.mrb[223].mxu1  ;;  %v3416_v59 = vpop.f32.mrb[231].mxu0 }
 0x54b   :  { %v3261_v17 = vadd.f32 %v3245_v3, %v7890_v2  ;;  %v3246_v22 = vsel %vm1063_vm2, %v3206_v19, %v3208_v42  ;;  %v3506_v57 = vsel %vm1474_vm3, %v3466_v25, %v3468_v29  ;;  %v3210_v54 = vrot.slane %v3156_v47, 2 }
 0x54c   :  { %v3262_v33 = vadd.f32 %v3246_v22, %v7894_v37  ;;  %v3243_v4 = vsel %vm1063_vm2, %v3207_v48, %v3209_v27  ;;  %v3503_v45 = vsel %vm1474_vm3, %v3467_v8, %v3469_v11  ;;  %v3470_v55 = vrot.slane %v3416_v59, 3 }
 0x54d   :  { %v8056_v10 = vadd.f32 %v3505_v18, %v3261_v17  ;;  %v3263_v2 = vadd.f32 %v3243_v4, %v7898_v7  ;;  %v3244_v19 = vsel %vm1063_vm2, %v3208_v42, %v3210_v54 }
 0x54e   :  { %v8061_v32 = vadd.f32 %v3506_v57, %v3262_v33  ;;  %v3264_v25 = vadd.f32 %v3244_v19, %v7902_v21  ;;  %v3504_v37 = vsel %vm1474_vm3, %v3468_v29, %v3470_v55 }
 0x54f   :  { %v8066_v15 = vadd.f32 %v3503_v45, %v3263_v2  ;;  %v3160_v48 = vpop.f32.mrb[224].mxu1  ;;  %v3420_v39 = vpop.f32.mrb[232].mxu0 }
 0x550   :  { %v8068_v8 = vadd.f32 %v3504_v37, %v3264_v25  ;;  %v3211_v50 = vrot.slane %v3160_v48, 2  ;;  %v3471_v3 = vrot.slane %v3420_v39, 3  ;;  %v3162_v18 = vpop.f32.mrb[225].mxu1  ;;  %v3422_v7 = vpop.f32.mrb[233].mxu0 }
 0x551   :  { %v3212_v47 = vrot.slane %v3162_v18, 2  ;;  %v3472_v59 = vrot.slane %v3422_v7, 3  ;;  %v3164_v42 = vpop.f32.mrb[226].mxu1  ;;  %v3424_v17 = vpop.f32.mrb[234].mxu0 }
 0x552   :  { %v3241_v21 = vsel %vm1063_vm2, %v3209_v27, %v3211_v50  ;;  %v3501_v29 = vsel %vm1474_vm3, %v3469_v11, %v3471_v3  ;;  %v3213_v22 = vrot.slane %v3164_v42, 2  ;;  %v3473_v57 = vrot.slane %v3424_v17, 3  ;;  %v3166_v33 = vpop.f32.mrb[227].mxu1  ;;  %v3426_v4 = vpop.f32.mrb[235].mxu0 }
 0x553   :  { %v3265_v45 = vadd.f32 %v3241_v21, %v7906_v61  ;;  %v3242_v2 = vsel %vm1063_vm2, %v3210_v54, %v3212_v47  ;;  %v3502_v19 = vsel %vm1474_vm3, %v3470_v55, %v3472_v59  ;;  %v3214_v25 = vrot.slane %v3166_v33, 2 }
 0x554   :  { %v3266_v37 = vadd.f32 %v3242_v2, %v7910_v35  ;;  %v3239_v27 = vsel %vm1063_vm2, %v3211_v50, %v3213_v22  ;;  %v3499_v11 = vsel %vm1474_vm3, %v3471_v3, %v3473_v57  ;;  %v3474_v48 = vrot.slane %v3426_v4, 3 }
 0x555   :  { %v8084_v39 = vadd.f32 %v3501_v29, %v3265_v45  ;;  %v3267_v61 = vadd.f32 %v3239_v27, %v7914_v62  ;;  %v3240_v54 = vsel %vm1063_vm2, %v3212_v47, %v3214_v25 }
 0x556   :  { %v8089_v18 = vadd.f32 %v3502_v19, %v3266_v37  ;;  %v3268_v55 = vadd.f32 %v3240_v54, %v7918_v5  ;;  %v3500_v35 = vsel %vm1474_vm3, %v3472_v59, %v3474_v48 }
 0x557   :  { %v8094_v7 = vadd.f32 %v3499_v11, %v3267_v61  ;;  %v3170_v50 = vpop.f32.mrb[228].mxu1  ;;  %v3430_v42 = vpop.f32.mrb[236].mxu0 }
 0x558   :  { %v8096_v3 = vadd.f32 %v3500_v35, %v3268_v55  ;;  %v3215_v17 = vrot.slane %v3170_v50, 2  ;;  %v3475_v21 = vrot.slane %v3430_v42, 3  ;;  %v3172_v29 = vpop.f32.mrb[229].mxu1  ;;  %v3432_v62 = vpop.f32.mrb[237].mxu0 }
 0x559   :  { %v3216_v33 = vrot.slane %v3172_v29, 2  ;;  %v3476_v4 = vrot.slane %v3432_v62, 3  ;;  %v3174_v47 = vpop.f32.mrb[230].mxu1  ;;  %v3434_v45 = vpop.f32.mrb[238].mxu0 }
 0x55a   :  { %v3237_v5 = vsel %vm1063_vm2, %v3213_v22, %v3215_v17  ;;  %v3497_v59 = vsel %vm1474_vm3, %v3473_v57, %v3475_v21  ;;  %v3217_v2 = vrot.slane %v3174_v47, 2  ;;  %v3477_v19 = vrot.slane %v3434_v45, 3  ;;  %v3176_v37 = vpop.f32.mrb[231].mxu1  ;;  %v3436_v27 = vpop.f32.mrb[239].mxu0 }
 0x55b   :  { %v3269_v11 = vadd.f32 %v3237_v5, %v7922_v52  ;;  %v3238_v61 = vsel %vm1063_vm2, %v3214_v25, %v3216_v33  ;;  %v3498_v54 = vsel %vm1474_vm3, %v3474_v48, %v3476_v4  ;;  %v3218_v55 = vrot.slane %v3176_v37, 2 }
 0x55c   :  { %v3270_v35 = vadd.f32 %v3238_v61, %v7926_v9  ;;  %v3235_v22 = vsel %vm1063_vm2, %v3215_v17, %v3217_v2  ;;  %v3495_v57 = vsel %vm1474_vm3, %v3475_v21, %v3477_v19  ;;  %v3478_v50 = vrot.slane %v3436_v27, 3 }
 0x55d   :  { %v8112_v42 = vadd.f32 %v3497_v59, %v3269_v11  ;;  %v3271_v52 = vadd.f32 %v3235_v22, %v7930_v26  ;;  %v3236_v25 = vsel %vm1063_vm2, %v3216_v33, %v3218_v55 }
 0x55e   :  { %v8117_v29 = vadd.f32 %v3498_v54, %v3270_v35  ;;  %v3272_v48 = vadd.f32 %v3236_v25, %v7934_v41  ;;  %v3496_v9 = vsel %vm1474_vm3, %v3476_v4, %v3478_v50 }
 0x55f   :  { %v8122_v62 = vadd.f32 %v3495_v57, %v3271_v52  ;;  %v3180_v17 = vpop.f32.mrb[232].mxu1  ;;  %v3440_v47 = vpop.f32.mrb[240].mxu0 }
 0x560   :  { %v8124_v21 = vadd.f32 %v3496_v9, %v3272_v48  ;;  %v3219_v45 = vrot.slane %v3180_v17, 2  ;;  %v3479_v5 = vrot.slane %v3440_v47, 3  ;;  %v3182_v59 = vpop.f32.mrb[233].mxu1  ;;  %v3442_v26 = vpop.f32.mrb[241].mxu0 }
 0x561   :  { %v3220_v37 = vrot.slane %v3182_v59, 2  ;;  %v3480_v27 = vrot.slane %v3442_v26, 3  ;;  %v3184_v33 = vpop.f32.mrb[234].mxu1  ;;  %v3444_v11 = vpop.f32.mrb[242].mxu0 }
 0x562   :  { %v3233_v41 = vsel %vm1063_vm2, %v3217_v2, %v3219_v45  ;;  %v3493_v4 = vsel %vm1474_vm3, %v3477_v19, %v3479_v5  ;;  %v3221_v61 = vrot.slane %v3184_v33, 2  ;;  %v3481_v54 = vrot.slane %v3444_v11, 3  ;;  %v3186_v35 = vpop.f32.mrb[235].mxu1  ;;  %v3446_v22 = vpop.f32.mrb[243].mxu0 }
 0x563   :  { %v3273_v57 = vadd.f32 %v3233_v41, %v7938_v16  ;;  %v3234_v52 = vsel %vm1063_vm2, %v3218_v55, %v3220_v37  ;;  %v3494_v25 = vsel %vm1474_vm3, %v3478_v50, %v3480_v27  ;;  %v3222_v48 = vrot.slane %v3186_v35, 2 }
 0x564   :  { %v3274_v9 = vadd.f32 %v3234_v52, %v7942_v34  ;;  %v3231_v2 = vsel %vm1063_vm2, %v3219_v45, %v3221_v61  ;;  %v3491_v19 = vsel %vm1474_vm3, %v3479_v5, %v3481_v54  ;;  %v3482_v17 = vrot.slane %v3446_v22, 3 }
 0x565   :  { %v8140_v47 = vadd.f32 %v3493_v4, %v3273_v57  ;;  %v3275_v16 = vadd.f32 %v3231_v2, %v7946_v31  ;;  %v3232_v55 = vsel %vm1063_vm2, %v3220_v37, %v3222_v48 }
 0x566   :  { %v8145_v59 = vadd.f32 %v3494_v25, %v3274_v9  ;;  %v3276_v50 = vadd.f32 %v3232_v55, %v7950_v56  ;;  %v3492_v34 = vsel %vm1474_vm3, %v3480_v27, %v3482_v17 }
 0x567   :  { %v8150_v26 = vadd.f32 %v3491_v19, %v3275_v16  ;;  %v3190_v45 = vpop.f32.mrb[236].mxu1  ;;  %v3450_v33 = vpop.f32.mrb[244].mxu0 }
 0x568   :  { %v8152_v5 = vadd.f32 %v3492_v34, %v3276_v50  ;;  %v3223_v11 = vrot.slane %v3190_v45, 2  ;;  %v3483_v41 = vrot.slane %v3450_v33, 3  ;;  %v3192_v4 = vpop.f32.mrb[237].mxu1  ;;  %v3452_v31 = vpop.f32.mrb[245].mxu0 }
 0x569   :  { %v3224_v35 = vrot.slane %v3192_v4, 2  ;;  %v3484_v22 = vrot.slane %v3452_v31, 3  ;;  %v3194_v37 = vpop.f32.mrb[238].mxu1  ;;  %v3454_v57 = vpop.f32.mrb[246].mxu0 }
 0x56a   :  { %v3229_v56 = vsel %vm1063_vm2, %v3221_v61, %v3223_v11  ;;  %v3489_v27 = vsel %vm1474_vm3, %v3481_v54, %v3483_v41  ;;  %v3225_v52 = vrot.slane %v3194_v37, 2  ;;  %v3485_v25 = vrot.slane %v3454_v57, 3  ;;  %v3196_v9 = vpop.f32.mrb[239].mxu1  ;;  %v3456_v2 = vpop.f32.mrb[247].mxu0  ;;  %v3803_v57 = vld [vmem:[%s8666_s6] sm:$0x3] }
 0x56b   :  { %v3277_v19 = vadd.f32 %v3229_v56, %v7954_v12  ;;  %v3230_v16 = vsel %vm1063_vm2, %v3222_v48, %v3224_v35  ;;  %v3490_v55 = vsel %vm1474_vm3, %v3482_v17, %v3484_v22  ;;  %v3226_v50 = vrot.slane %v3196_v9, 2 }
 0x56c   :  { %v3278_v34 = vadd.f32 %v3230_v16, %v7958_v58  ;;  %v3227_v61 = vsel %vm1063_vm2, %v3223_v11, %v3225_v52  ;;  %v3253_v54 = vsel %vm1063_vm2, %v3225_v52, %v3199_v14  ;;  %v3487_v12 = vsel %vm1474_vm3, %v3483_v41, %v3485_v25 }
 0x56d   :  { %v8172_v45 = vadd.f32 %v3489_v27, %v3277_v19  ;;  %v3279_v48 = vadd.f32 %v3227_v61, %v7966_v28  ;;  %v3281_v17 = vadd.f32 %v3253_v54, %v7968_v60  ;;  %v3513_v58 = vsel %vm1474_vm3, %v3485_v25, %v3459_v43 }
 0x56e   :  { %v8180_v33 = vadd.f32 %v3490_v55, %v3278_v34  ;;  %v3228_v1 = vsel %vm1063_vm2, %v3224_v35, %v3226_v50  ;;  %v3254_v14 = vsel %vm1063_vm2, %v3226_v50, %v3200_v0  ;;  %v3486_v11 = vrot.slane %v3456_v2, 3 }
 0x56f   :  { %v8188_v41 = vadd.f32 %v3487_v12, %v3279_v48  ;;  %v8190_v28 = vadd.f32 %v3513_v58, %v3281_v17  ;;  %v3280_v60 = vadd.f32 %v3228_v1, %v7976_v49  ;;  %v3282_v40 = vadd.f32 %v3254_v14, %v7978_v51  ;;  %v8194_v43 = vpop.f32.mrb[240].mxu1 }
 0x570   :  { %v3488_v4 = vsel %vm1474_vm3, %v3484_v22, %v3486_v11  ;;  %v3514_v13 = vsel %vm1474_vm3, %v3486_v11, %v3460_v63  ;;  %v8202_v0 = vpop.f32.mrb[241].mxu1  ;;  %v3719_v49 = vrot.slane %v8194_v43, 4  ;;  %v8799_v52 = vsub.s32 0, %v6345_v38  ;;  %v5759_v38 = vld [vmem:[%s8668_s12 + $0x20] sm:$0xff]  }
 0x571   :  { %v8204_v31 = vadd.f32 %v3488_v4, %v3280_v60  ;;  %v8206_v35 = vadd.f32 %v3514_v13, %v3282_v40  ;;  %v3654_v37 = vpop.f32.mrb[242].mxu1  ;;  %v3720_v46 = vrot.slane %v8202_v0, 4  ;;  %v8229_v19 = vrot.slane %v3803_v57, %v2022_v30 }
 0x572   :  { %v3721_v51 = vrot.slane %v3654_v37, 4  ;;  %v3656_v22 = vpop.f32.mrb[243].mxu1  ;;  %v8220_v25 = vrot.slane %v3803_v57, %v8799_v52 }
 0x573   :  { %v3722_v56 = vrot.slane %v3656_v22, 4 }
 0x574   :  { %v3771_v63 = vsel %vm1885_vm4, %v3719_v49, %v3721_v51 }
 0x575   :  { %v3775_v27 = vadd.f32 %v3771_v63, %v8010_v44  ;;  %v3772_v9 = vsel %vm1885_vm4, %v3720_v46, %v3722_v56 }
 0x576   :  { %v3776_v2 = vadd.f32 %v3772_v9, %v8012_v20 }
 0x577   :  { %v3660_v16 = vpop.f32.mrb[244].mxu1  ;;  %v3815_v44 = vadd.f32 %v8220_v25, %v3775_v27 }
 0x578   :  { %v3723_v55 = vrot.slane %v3660_v16, 4  ;;  %v3662_v50 = vpop.f32.mrb[245].mxu1  ;;  %v3816_v54 = vadd.f32 %v8229_v19, %v3776_v2 }
 0x579   :  { %v3724_v34 = vrot.slane %v3662_v50, 4  ;;  %v3664_v61 = vpop.f32.mrb[246].mxu1  ;;  %5893 = vtanh.f32 %v3815_v44 }
 0x57a   :  { %v3769_v12 = vsel %vm1885_vm4, %v3721_v51, %v3723_v55  ;;  %v3725_v48 = vrot.slane %v3664_v61, 4  ;;  %v3666_v17 = vpop.f32.mrb[247].mxu1  ;;  %5895 = vtanh.f32 %v3816_v54 }
 0x57b   :  { %v3777_v20 = vadd.f32 %v3769_v12, %v8028_v6  ;;  %v3770_v30 = vsel %vm1885_vm4, %v3722_v56, %v3724_v34  ;;  %v3726_v58 = vrot.slane %v3666_v17, 4 }
 0x57c   :  { %v3778_v1 = vadd.f32 %v3770_v30, %v8033_v36  ;;  %v3767_v14 = vsel %vm1885_vm4, %v3723_v55, %v3725_v48 }
 0x57d   :  { %v3817_v11 = vadd.f32 %v8220_v25, %v3777_v20  ;;  %v3779_v60 = vadd.f32 %v3767_v14, %v8038_v24  ;;  %v3768_v40 = vsel %vm1885_vm4, %v3724_v34, %v3726_v58 }
 0x57e   :  { %v3818_v6 = vadd.f32 %v8229_v19, %v3778_v1  ;;  %v3780_v4 = vadd.f32 %v3768_v40, %v8040_v53 }
 0x57f   :  { %5897 = vtanh.f32 %v3817_v11  ;;  %v3670_v13 = vpop.f32.mrb[248].mxu1  ;;  %v3819_v51 = vadd.f32 %v8220_v25, %v3779_v60 }
 0x580   :  { %5899 = vtanh.f32 %v3818_v6  ;;  %v3727_v36 = vrot.slane %v3670_v13, 4  ;;  %v3672_v37 = vpop.f32.mrb[249].mxu1  ;;  %v3820_v56 = vadd.f32 %v8229_v19, %v3780_v4 }
 0x581   :  { %v3728_v57 = vrot.slane %v3672_v37, 4  ;;  %v3674_v22 = vpop.f32.mrb[250].mxu1  ;;  %5901 = vtanh.f32 %v3819_v51 }
 0x582   :  { %v3765_v24 = vsel %vm1885_vm4, %v3725_v48, %v3727_v36  ;;  %v3729_v63 = vrot.slane %v3674_v22, 4  ;;  %v3676_v27 = vpop.f32.mrb[251].mxu1  ;;  %5903 = vtanh.f32 %v3820_v56 }
 0x583   :  { %v3781_v52 = vadd.f32 %v3765_v24, %v8056_v10  ;;  %v3766_v53 = vsel %vm1885_vm4, %v3726_v58, %v3728_v57  ;;  %v3730_v9 = vrot.slane %v3676_v27, 4  ;;  %v5894_v61 = vpop.eup %5893 }
 0x584   :  { %v3782_v2 = vadd.f32 %v3766_v53, %v8061_v32  ;;  %v3763_v16 = vsel %vm1885_vm4, %v3727_v36, %v3729_v63  ;;  %v5896_v32 = vpop.eup %5895 }
 0x585   :  { %v3821_v55 = vadd.f32 %v8220_v25, %v3781_v52  ;;  %v3783_v50 = vadd.f32 %v3763_v16, %v8066_v15  ;;  %v3764_v44 = vsel %vm1885_vm4, %v3728_v57, %v3730_v9 }
 0x586   :  { %v3822_v10 = vadd.f32 %v8229_v19, %v3782_v2  ;;  %v3784_v34 = vadd.f32 %v3764_v44, %v8068_v8 }
 0x587   :  { %5905 = vtanh.f32 %v3821_v55  ;;  %v3680_v54 = vpop.f32.mrb[252].mxu1  ;;  %v3823_v20 = vadd.f32 %v8220_v25, %v3783_v50 }
 0x588   :  { %5907 = vtanh.f32 %v3822_v10  ;;  %v3731_v12 = vrot.slane %v3680_v54, 4  ;;  %v3682_v48 = vpop.f32.mrb[253].mxu1  ;;  %v3824_v1 = vadd.f32 %v8229_v19, %v3784_v34 }
 0x589   :  { %v5898_v17 = vpop.eup %5897  ;;  %v3732_v30 = vrot.slane %v3682_v48, 4  ;;  %v3684_v15 = vpop.f32.mrb[254].mxu1  ;;  %5909 = vtanh.f32 %v3823_v20 }
 0x58a   :  { %v5900_v58 = vpop.eup %5899  ;;  %v3761_v14 = vsel %vm1885_vm4, %v3729_v63, %v3731_v12  ;;  %v3733_v11 = vrot.slane %v3684_v15, 4  ;;  %v3686_v8 = vpop.f32.mrb[255].mxu1  ;;  %v3871_v60 = vpack.c.bf16 %v5898_v17, %v5894_v61  ;;  %5911 = vtanh.f32 %v3824_v1 }
 0x58b   :  { %v3785_v40 = vadd.f32 %v3761_v14, %v8084_v39  ;;  %v3762_v6 = vsel %vm1885_vm4, %v3730_v9, %v3732_v30  ;;  %v3734_v4 = vrot.slane %v3686_v8, 4  ;;  %v3872_v13 = vpack.c.bf16 %v5900_v58, %v5896_v32  ;;  %v5902_v24 = vpop.eup %5901 }
 0x58c   :  { %v3786_v36 = vadd.f32 %v3762_v6, %v8089_v18  ;;  %v3759_v37 = vsel %vm1885_vm4, %v3731_v12, %v3733_v11  ;;  %v5904_v63 = vpop.eup %5903 }
 0x58d   :  { %v3825_v51 = vadd.f32 %v8220_v25, %v3785_v40  ;;  %v3787_v57 = vadd.f32 %v3759_v37, %v8094_v7  ;;  %v3760_v22 = vsel %vm1885_vm4, %v3732_v30, %v3734_v4  ;;  %3913 = vmatprep.subr.bf16.mxu0 %v3872_v13 }
 0x58e   :  { %v3826_v39 = vadd.f32 %v8229_v19, %v3786_v36  ;;  %v3788_v56 = vadd.f32 %v3760_v22, %v8096_v3  ;;  %3914 = vmatpush1.bf16.msra.mxu0 %v3871_v60 }
 0x58f   :  { %5913 = vtanh.f32 %v3825_v51  ;;  %v3690_v18 = vpop.f32.mrb[0].mxu1  ;;  %v3827_v7 = vadd.f32 %v8220_v25, %v3787_v57 }
 0x590   :  { %5915 = vtanh.f32 %v3826_v39  ;;  %v3735_v27 = vrot.slane %v3690_v18, 4  ;;  %v3692_v52 = vpop.f32.mrb[1].mxu1  ;;  %v3828_v55 = vadd.f32 %v8229_v19, %v3788_v56 }
 0x591   :  { %v5906_v53 = vpop.eup %5905  ;;  %v3736_v9 = vrot.slane %v3692_v52, 4  ;;  %v3694_v2 = vpop.f32.mrb[2].mxu1  ;;  %5917 = vtanh.f32 %v3827_v7 }
 0x592   :  { %v5908_v16 = vpop.eup %5907  ;;  %v3757_v50 = vsel %vm1885_vm4, %v3733_v11, %v3735_v27  ;;  %v3737_v3 = vrot.slane %v3694_v2, 4  ;;  %v3696_v44 = vpop.f32.mrb[3].mxu1  ;;  %v3873_v10 = vpack.c.bf16 %v5906_v53, %v5902_v24  ;;  %5919 = vtanh.f32 %v3828_v55 }
 0x593   :  { %v3789_v34 = vadd.f32 %v3757_v50, %v8112_v42  ;;  %v3758_v61 = vsel %vm1885_vm4, %v3734_v4, %v3736_v9  ;;  %v3738_v54 = vrot.slane %v3696_v44, 4  ;;  %v3874_v32 = vpack.c.bf16 %v5908_v16, %v5904_v63  ;;  %v5910_v58 = vpop.eup %5909 }
 0x594   :  { %v3790_v12 = vadd.f32 %v3758_v61, %v8117_v29  ;;  %v3755_v48 = vsel %vm1885_vm4, %v3735_v27, %v3737_v3  ;;  %v5912_v1 = vpop.eup %5911 }
 0x595   :  { %v3829_v17 = vadd.f32 %v8220_v25, %v3789_v34  ;;  %v3791_v20 = vadd.f32 %v3755_v48, %v8122_v62  ;;  %v3756_v30 = vsel %vm1885_vm4, %v3736_v9, %v3738_v54  ;;  %3915 = vmatprep.subr.bf16.mxu0 %v3874_v32 }
 0x596   :  { %v3830_v42 = vadd.f32 %v8229_v19, %v3790_v12  ;;  %v3792_v15 = vadd.f32 %v3756_v30, %v8124_v21  ;;  %3916 = vmatpush1.bf16.msra.mxu0 %v3873_v10 }
 0x597   :  { %5921 = vtanh.f32 %v3829_v17  ;;  %v3700_v29 = vpop.f32.mrb[4].mxu1  ;;  %v3831_v62 = vadd.f32 %v8220_v25, %v3791_v20 }
 0x598   :  { %5923 = vtanh.f32 %v3830_v42  ;;  %v3739_v14 = vrot.slane %v3700_v29, 4  ;;  %v3702_v11 = vpop.f32.mrb[5].mxu1  ;;  %v3832_v4 = vadd.f32 %v8229_v19, %v3792_v15 }
 0x599   :  { %v5914_v8 = vpop.eup %5913  ;;  %v3740_v60 = vrot.slane %v3702_v11, 4  ;;  %v3704_v40 = vpop.f32.mrb[6].mxu1  ;;  %5925 = vtanh.f32 %v3831_v62 }
 0x59a   :  { %v5916_v6 = vpop.eup %5915  ;;  %v3753_v13 = vsel %vm1885_vm4, %v3737_v3, %v3739_v14  ;;  %v3741_v21 = vrot.slane %v3704_v40, 4  ;;  %v3706_v36 = vpop.f32.mrb[7].mxu1  ;;  %v3875_v37 = vpack.c.bf16 %v5914_v8, %v5910_v58  ;;  %5927 = vtanh.f32 %v3832_v4 }
 0x59b   :  { %v3793_v51 = vadd.f32 %v3753_v13, %v8140_v47  ;;  %v3754_v57 = vsel %vm1885_vm4, %v3738_v54, %v3740_v60  ;;  %v3742_v22 = vrot.slane %v3706_v36, 4  ;;  %v3876_v39 = vpack.c.bf16 %v5916_v6, %v5912_v1  ;;  %v5918_v53 = vpop.eup %5917 }
 0x59c   :  { %v3794_v56 = vadd.f32 %v3754_v57, %v8145_v59  ;;  %v3751_v24 = vsel %vm1885_vm4, %v3739_v14, %v3741_v21  ;;  %v5920_v7 = vpop.eup %5919  ;;  %v5717_v57 = vld [vmem:[%s8664_s7] sm:$0xff]  }
 0x59d   :  { %v3833_v18 = vadd.f32 %v8220_v25, %v3793_v51  ;;  %v3795_v63 = vadd.f32 %v3751_v24, %v8150_v26  ;;  %v3752_v27 = vsel %vm1885_vm4, %v3740_v60, %v3742_v22  ;;  %3917 = vmatprep.subr.bf16.mxu0 %v3876_v39  ;;  %v5721_v39 = vld [vmem:[%s8665_s8 + $0x8] sm:$0xff]   ;;  %v5722_v24 = vld [vmem:[%s8665_s8 + $0x10] sm:$0xff]  }
 0x59e   :  { %v3834_v47 = vadd.f32 %v8229_v19, %v3794_v56  ;;  %v3796_v52 = vadd.f32 %v3752_v27, %v8152_v5  ;;  %3918 = vmatpush1.bf16.msra.mxu0 %v3875_v37  ;;  %v5719_v56 = vld [vmem:[%s8664_s7 + $0x8] sm:$0xff]   ;;  %v5724_v27 = vld [vmem:[%s8665_s8 + $0x20] sm:$0xff]  }
 0x59f   :  { %5929 = vtanh.f32 %v3833_v18  ;;  %v3710_v59 = vpop.f32.mrb[8].mxu1  ;;  %v3835_v9 = vadd.f32 %v8220_v25, %v3795_v63  ;;  %v5723_v18 = vld [vmem:[%s8665_s8 + $0x18] sm:$0xff]   ;;  %v5718_v63 = vld [vmem:[%s8664_s7 + $0x10] ss:$0 sps:$4 sm:$0xff]  }
 0x5a0   :  { %5931 = vtanh.f32 %v3834_v47  ;;  %v3743_v2 = vrot.slane %v3710_v59, 4  ;;  %v3712_v16 = vpop.f32.mrb[9].mxu1  ;;  %v3836_v44 = vadd.f32 %v8229_v19, %v3796_v52  ;;  %v5725_v47 = vld [vmem:[%s8665_s8 + $0x28] sm:$0xff]   ;;  %v5726_v52 = vld [vmem:[%s8665_s8 + $0x30] sm:$0xff]   ;;  %v5728_v59 = vld [vmem:[%s8665_s8 + $0x40] sm:$0xff]  }
 0x5a1   :  { %v5922_v26 = vpop.eup %5921  ;;  %v3744_v55 = vrot.slane %v3712_v16, 4  ;;  %v3714_v50 = vpop.f32.mrb[10].mxu1  ;;  %5933 = vtanh.f32 %v3835_v9  ;;  %v5957_v9 = vmov 0.0   ;;  %v5731_v16 = vld [vmem:[%s8667_s9 + $0x30] sm:$0xff]  }
 0x5a2   :  { %v5924_v3 = vpop.eup %5923  ;;  %v3749_v10 = vsel %vm1885_vm4, %v3741_v21, %v3743_v2  ;;  %v3745_v5 = vrot.slane %v3714_v50, 4  ;;  %v3716_v34 = vpop.f32.mrb[11].mxu1  ;;  %v3877_v61 = vpack.c.bf16 %v5922_v26, %v5918_v53  ;;  %5935 = vtanh.f32 %v3836_v44  ;;  %v5727_v53 = vld [vmem:[%s8665_s8 + $0x38] sm:$0xff]   ;;  %5403 = vmatprep.subr.bf16.mxu1 %v5957_v9  ;;  %v5735_v26 = vld [vmem:[%s8667_s9 + $0x40] sm:$0xff]   ;;  %5413 = vmatprep.mubr.msk.bf16.mxu1 %vm5958_vm10, %v5957_v9 }
 0x5a3   :  { %v3797_v54 = vadd.f32 %v3749_v10, %v8172_v45  ;;  %v3750_v32 = vsel %vm1885_vm4, %v3742_v22, %v3744_v55  ;;  %v3746_v12 = vrot.slane %v3716_v34, 4  ;;  %v3878_v48 = vpack.c.bf16 %v5924_v3, %v5920_v7  ;;  %v5926_v29 = vpop.eup %5925  ;;  %v5720_v22 = vld [vmem:[%s8665_s8] sm:$0xff]   ;;  %v5729_v7 = vld [vmem:[%s8665_s8 + $0x48] sm:$0xff]  }
 0x5a4   :  { %v3798_v17 = vadd.f32 %v3750_v32, %v8180_v33  ;;  %v3747_v20 = vsel %vm1885_vm4, %v3743_v2, %v3745_v5  ;;  %v3773_v30 = vsel %vm1885_vm4, %v3745_v5, %v3719_v49  ;;  %v5928_v14 = vpop.eup %5927  ;;  %v5730_v2 = vld [vmem:[%s8667_s9 + $0x28] sm:$0xff]   ;;  %v5733_v34 = vld [vmem:[%s8667_s9] sm:$0xff]  }
 0x5a5   :  { %v3837_v42 = vadd.f32 %v8220_v25, %v3797_v54  ;;  %v3799_v45 = vadd.f32 %v3747_v20, %v8188_v41  ;;  %v3801_v15 = vadd.f32 %v3773_v30, %v8190_v28  ;;  %v3748_v58 = vsel %vm1885_vm4, %v3744_v55, %v3746_v12  ;;  %3919 = vmatprep.subr.bf16.mxu0 %v3878_v48  ;;  %v5734_v54 = vld [vmem:[%s8667_s9 + $0x8] sm:$0xff]   ;;  %v5736_v30 = vld [vmem:[%s8667_s9 + $0x10] sm:$0xff]  }
 0x5a6   :  { %v3838_v33 = vadd.f32 %v8229_v19, %v3798_v17  ;;  %v3774_v43 = vsel %vm1885_vm4, %v3746_v12, %v3720_v46  ;;  %v3800_v49 = vadd.f32 %v3748_v58, %v8204_v31  ;;  %3920 = vmatpush1.bf16.msra.mxu0 %v3877_v61  ;;  %5404 = vmatpush3.bf16.msra.mxu1 %v5730_v2 }
 0x5a7   :  { %5937 = vtanh.f32 %v3837_v42  ;;  %v3839_v41 = vadd.f32 %v8220_v25, %v3799_v45  ;;  %v3841_v28 = vadd.f32 %v8220_v25, %v3801_v15  ;;  %v3802_v1 = vadd.f32 %v3774_v43, %v8206_v35  ;;  %5405 = vmatprep.subr.bf16.mxu1 %v5957_v9  ;;  %v5737_v45 = vld [vmem:[%s8667_s9 + $0x18] sm:$0xff]  }
 0x5a8   :  { %5939 = vtanh.f32 %v3838_v33  ;;  %v3840_v11 = vadd.f32 %v8229_v19, %v3800_v49 }
 0x5a9   :  { %v5930_v8 = vpop.eup %5929  ;;  %5941 = vtanh.f32 %v3839_v41  ;;  %v3842_v0 = vadd.f32 %v8229_v19, %v3802_v1  ;;  %v5739_v41 = vld [vmem:[%s8667_s9 + $0x20] sm:$0xff]  }
 0x5aa   :  { %v5932_v46 = vpop.eup %5931  ;;  %5943 = vtanh.f32 %v3841_v28  ;;  %v3879_v31 = vpack.c.bf16 %v5930_v8, %v5926_v29  ;;  %5406 = vmatpush3.bf16.msra.mxu1 %v5731_v16  ;;  %v5738_v29 = vld [vmem:[%s8667_s9 + $0x48] sm:$0xff]   ;;  %v5741_v8 = vld [vmem:[%s8667_s9 + $0x78] sm:$0xff]  }
 0x5ab   :  { %5945 = vtanh.f32 %v3840_v11  ;;  %v3880_v62 = vpack.c.bf16 %v5932_v46, %v5928_v14  ;;  %v5934_v60 = vpop.eup %5933  ;;  %5407 = vmatprep.subr.bf16.mxu1 %v5957_v9  ;;  %v5740_v11 = vld [vmem:[%s8667_s9 + $0x50] sm:$0xff]  }
 0x5ac   :  { %5947 = vtanh.f32 %v3842_v0  ;;  %v5936_v25 = vpop.eup %5935 }
 0x5ad   :  { %3921 = vmatprep.subr.bf16.mxu0 %v3880_v62  ;;  %v5743_v62 = vld [vmem:[%s8667_s9 + $0x80] sm:$0xff]  }
 0x5ae   :  { %3922 = vmatpush1.bf16.msra.mxu0 %v3879_v31  ;;  %v5742_v31 = vld [vmem:[%s8667_s9 + $0x58] sm:$0xff]  }
 0x5b1   :  { %v5938_v40 = vpop.eup %5937 }
 0x5b2   :  { %v5940_v35 = vpop.eup %5939  ;;  %v3881_v6 = vpack.c.bf16 %v5938_v40, %v5934_v60 }
 0x5b3   :  { %v5942_v4 = vpop.eup %5941  ;;  %v3882_v13 = vpack.c.bf16 %v5940_v35, %v5936_v25  ;;  %v5744_v35 = vld [vmem:[%s8667_s9 + $0x60] sm:$0xff]  }
 0x5b4   :  { %v5944_v21 = vpop.eup %5943 }
 0x5b5   :  { %v5946_v36 = vpop.eup %5945  ;;  %3923 = vmatprep.subr.bf16.mxu0 %v3882_v13  ;;  %v3883_v37 = vpack.c.bf16 %v5944_v21, %v5942_v4  ;;  %v5746_v21 = vld [vmem:[%s8667_s9 + $0x68] sm:$0xff]  }
 0x5b6   :  { %v5948_v19 = vpop.eup %5947  ;;  %3924 = vmatpush1.bf16.msra.mxu0 %v3881_v6  ;;  %v5745_v6 = vld [vmem:[%s8667_s9 + $0x88] sm:$0xff]  }
 0x5b7   :  { %v3884_v51 = vpack.c.bf16 %v5948_v19, %v5946_v36  ;;  %v5747_v36 = vld [vmem:[%s8667_s9 + $0x90] sm:$0xff]  }
 0x5b9   :  { %3925 = vmatprep.subr.bf16.mxu0 %v3884_v51 }
 0x5ba   :  { %3926 = vmatpush1.bf16.msra.mxu0 %v3883_v37 }
 0x5bb   :  { %4069 = vmatprep.subr.bf16.mxu0 %v8798_v23 }
 0x5bd   :  { %5235 = vmatmul.mubr.msk.bf16.vlgmr.msra.gmra.mrb[248].mxu0 %vm3903_vm9, %v5717_v57  ;;  %v5748_v57 = vld [vmem:[%s8667_s9 + $0x70] sm:$0xff]  }
 0x5be   :  { %3955 = vmatprep.mubr.bf16.mxu0 %v8798_v23  ;;  %4070 = vmatpush1.bf16.msra.mxu0 %v5720_v22  ;;  %v5749_v22 = vld [vmem:[%s8667_s9 + $0x98] sm:$0xff]  }
 0x5bf   :  { %4071 = vmatprep.subr.bf16.mxu0 %v8798_v23 }
 0x5c2   :  { %4072 = vmatpush1.bf16.msra.mxu0 %v5721_v39 }
 0x5c3   :  { %4073 = vmatprep.subr.bf16.mxu0 %v8798_v23 }
 0x5c5   :  { %5236 = vmatmul.mubr.msk.bf16.gmra.mrb[252].mxu0 %vm3903_vm9, %v5719_v56 }
 0x5c6   :  { %3965 = vmatprep.mubr.bf16.mxu0 %v8798_v23  ;;  %4074 = vmatpush1.bf16.msra.mxu0 %v5722_v24  ;;  %v5750_v24 = vld [vmem:[%s8667_s9 + $0xa0] sm:$0xff]  }
 0x5c7   :  { %4075 = vmatprep.subr.bf16.mxu0 %v8798_v23 }
 0x5ca   :  { %4076 = vmatpush1.bf16.msra.mxu0 %v5723_v18  ;;  %v5751_v18 = vld [vmem:[%s8667_s9 + $0xa8] sm:$0xff]  }
 0x5cb   :  { %4077 = vmatprep.subr.bf16.mxu0 %v8798_v23 }
 0x5cd   :  { %5237 = vmatmul.mubr.msk.bf16.gmra.mrb[0].mxu0 %vm3903_vm9, %v5718_v63  ;;  %v5752_v63 = vld [vmem:[%s8667_s9 + $0xb0] sm:$0xff]  }
 0x5ce   :  { %4078 = vmatpush1.bf16.msra.mxu0 %v5724_v27  ;;  %v5753_v27 = vld [vmem:[%s8667_s9 + $0xb8] sm:$0xff]  }
 0x5cf   :  { %4079 = vmatprep.subr.bf16.mxu0 %v8798_v23 }
 0x5d2   :  { %4080 = vmatpush1.bf16.msra.mxu0 %v5725_v47  ;;  %v5754_v47 = vld [vmem:[%s8667_s9 + $0xc0] sm:$0xff]  }
 0x5d3   :  { %4081 = vmatprep.subr.bf16.mxu0 %v8798_v23 }
 0x5d6   :  { %4082 = vmatpush1.bf16.msra.mxu0 %v5726_v52  ;;  %v5755_v52 = vld [vmem:[%s8668_s12] sm:$0xff]  }
 0x5d7   :  { %4083 = vmatprep.subr.bf16.mxu0 %v8798_v23 }
 0x5da   :  { %4084 = vmatpush1.bf16.msra.mxu0 %v5727_v53  ;;  %v5756_v53 = vld [vmem:[%s8668_s12 + $0x8] sm:$0xff]  }
 0x5db   :  { %4085 = vmatprep.subr.bf16.mxu0 %v8798_v23 }
 0x5de   :  { %4086 = vmatpush1.bf16.msra.mxu0 %v5728_v59  ;;  %v5757_v59 = vld [vmem:[%s8668_s12 + $0x10] sm:$0xff]  }
 0x5df   :  { %4087 = vmatprep.subr.bf16.mxu0 %v8798_v23  ;;  %v5732_v23 = vld [vmem:[%s8667_s9 + $0x38] sm:$0xff]  }
 0x5e0   :  { %5408 = vmatpush3.bf16.msra.mxu1 %v5732_v23 }
 0x5e1   :  { %5409 = vmatprep.subr.bf16.mxu1 %v5957_v9 }
 0x5e2   :  { %4088 = vmatpush1.bf16.msra.mxu0 %v5729_v7  ;;  %v5758_v7 = vld [vmem:[%s8668_s12 + $0x18] sm:$0xff]  }
 0x5e3   :  { %5425 = vmatprep.subr.bf16.mxu0 %v5957_v9 }
 0x5e4   :  { %5410 = vmatpush3.bf16.msra.mxu1 %v5735_v26 }
 0x5e5   :  { %5411 = vmatprep.subr.bf16.mxu1 %v5957_v9 }
 0x5e8   :  { %5412 = vmatpush3.bf16.msra.mxu1 %v5738_v29 }
 0x5e9   :  { %5447 = vmatprep.subr.bf16.mxu1 %v5957_v9 }
 0x690   :  { %v3947_v55 = vpop.f32.mrb[248].mxu0 }
 0x691   :  { %v3949_v50 = vpop.f32.mrb[249].mxu0 }
 0x692   :  { %v3951_v3 = vpop.f32.mrb[250].mxu0 }
 0x693   :  { %v3974_v44 = vpack.c.bf16 %v3951_v3, %v3947_v55  ;;  %v3953_v10 = vpop.f32.mrb[251].mxu0 }
 0x694   :  { %v3975_v5 = vpack.c.bf16 %v3953_v10, %v3949_v50 }
 0x696   :  { %5248 = vmatprep.mubr.msk.bf16.mxu0 %vm195_vm0, %v3975_v5 }
 0x697   :  { %4102 = vmatmul.mubr.bf16.vlgmr.msra.gmra.mrb[4].mxu0 %v3974_v44 }
 0x698   :  { %v3957_v61 = vpop.f32.mrb[252].mxu0  ;;  %5426 = vmatpush3.bf16.msra.mxu0 %v5733_v34 }
 0x699   :  { %v3959_v32 = vpop.f32.mrb[253].mxu0  ;;  %5427 = vmatprep.subr.bf16.mxu0 %v5957_v9 }
 0x69a   :  { %v3961_v12 = vpop.f32.mrb[254].mxu0 }
 0x69b   :  { %v3976_v48 = vpack.c.bf16 %v3961_v12, %v3957_v61  ;;  %v3963_v17 = vpop.f32.mrb[255].mxu0 }
 0x69c   :  { %v3977_v20 = vpack.c.bf16 %v3963_v17, %v3959_v32  ;;  %5428 = vmatpush3.bf16.msra.mxu0 %v5734_v54 }
 0x69d   :  { %5429 = vmatprep.subr.bf16.mxu0 %v5957_v9 }
 0x69e   :  { %5249 = vmatprep.mubr.msk.bf16.mxu0 %vm195_vm0, %v3977_v20 }
 0x69f   :  { %4110 = vmatmul.mubr.bf16.gmra.mrb[8].mxu0 %v3976_v48 }
 0x6a0   :  { %v3967_v42 = vpop.f32.mrb[0].mxu0  ;;  %5430 = vmatpush3.bf16.msra.mxu0 %v5736_v30 }
 0x6a1   :  { %v3969_v15 = vpop.f32.mrb[1].mxu0  ;;  %5431 = vmatprep.subr.bf16.mxu0 %v5957_v9  ;;  %v3978_v43 = vpack.c.bf16 %v3967_v42, %v3967_v42 }
 0x6a2   :  { %v3979_v58 = vpack.c.bf16 %v3969_v15, %v3969_v15  ;;  %v3971_v33 = vpop.f32.mrb[2].mxu0 }
 0x6a3   :  { %v3972_v49 = vpop.f32.mrb[3].mxu0 }
 0x6a4   :  { %5250 = vmatprep.mubr.msk.bf16.mxu0 %vm195_vm0, %v3979_v58  ;;  %5432 = vmatpush3.bf16.msra.mxu0 %v5737_v45 }
 0x6a5   :  { %5433 = vmatprep.subr.bf16.mxu0 %v5957_v9 }
 0x6a7   :  { %4118 = vmatmul.mubr.bf16.gmra.mrb[12].mxu0 %v3978_v43 }
 0x6a8   :  { %5435 = vmatprep.mubr.msk.bf16.mxu0 %vm5958_vm10, %v5957_v9  ;;  %5434 = vmatpush3.bf16.msra.mxu0 %v5739_v41 }
 0x6a9   :  { %5469 = vmatprep.subr.bf16.mxu0 %v5957_v9 }
 0x76a   :  { %v4103_v28 = vpop.f32.mrb[4].mxu0 }
 0x76b   :  { %v4105_v1 = vpop.f32.mrb[5].mxu0 }
 0x76c   :  { %v4106_v14 = vpop.f32.mrb[6].mxu0 }
 0x76d   :  { %v8450_v0 = vpack.c.bf16 %v4106_v14, %v4103_v28  ;;  %v4108_v46 = vpop.f32.mrb[7].mxu0 }
 0x76f   :  { %5414 = vmatmul.mubr.msk.bf16.vlgmr.msra.gmra.mrb[12].mxu1 %vm4179_vm11, %v8450_v0  ;;  %5436 = vmatmul.mubr.msk.bf16.vlgmr.msra.gmra.mrb[16].mxu0 %vm4179_vm11, %v8450_v0 }
 0x770   :  { %5448 = vmatpush3.bf16.msra.mxu1 %v5740_v11  ;;  %5470 = vmatpush3.bf16.msra.mxu0 %v5741_v8 }
 0x771   :  { %5417 = vmatprep.mubr.msk.bf16.mxu1 %vm5958_vm10, %v5957_v9  ;;  %5439 = vmatprep.mubr.msk.bf16.mxu0 %vm5958_vm10, %v5957_v9 }
 0x772   :  { %v4111_v60 = vpop.f32.mrb[8].mxu0  ;;  %5449 = vmatprep.subr.bf16.mxu1 %v5957_v9  ;;  %5471 = vmatprep.subr.bf16.mxu0 %v5957_v9 }
 0x773   :  { %v4113_v25 = vpop.f32.mrb[9].mxu0 }
 0x774   :  { %v4114_v40 = vpop.f32.mrb[10].mxu0  ;;  %5450 = vmatpush3.bf16.msra.mxu1 %v5742_v31  ;;  %5472 = vmatpush3.bf16.msra.mxu0 %v5743_v62 }
 0x775   :  { %v4126_v4 = vpack.c.bf16 %v4114_v40, %v4111_v60  ;;  %v4116_v13 = vpop.f32.mrb[11].mxu0  ;;  %5451 = vmatprep.subr.bf16.mxu1 %v5957_v9  ;;  %5473 = vmatprep.subr.bf16.mxu0 %v5957_v9 }
 0x777   :  { %5418 = vmatmul.mubr.msk.bf16.gmra.mrb[16].mxu1 %vm4179_vm11, %v4126_v4  ;;  %5440 = vmatmul.mubr.msk.bf16.gmra.mrb[20].mxu0 %vm4179_vm11, %v4126_v4 }
 0x778   :  { %5452 = vmatpush3.bf16.msra.mxu1 %v5744_v35  ;;  %5474 = vmatpush3.bf16.msra.mxu0 %v5745_v6 }
 0x779   :  { %5421 = vmatprep.mubr.msk.bf16.mxu1 %vm5958_vm10, %v5957_v9  ;;  %5443 = vmatprep.mubr.msk.bf16.mxu0 %vm5958_vm10, %v5957_v9 }
 0x77a   :  { %v4119_v37 = vpop.f32.mrb[12].mxu0  ;;  %5453 = vmatprep.subr.bf16.mxu1 %v5957_v9  ;;  %5475 = vmatprep.subr.bf16.mxu0 %v5957_v9 }
 0x77b   :  { %v4121_v19 = vpop.f32.mrb[13].mxu0  ;;  %v4127_v39 = vpack.c.bf16 %v4119_v37, %v4119_v37 }
 0x77c   :  { %v4122_v51 = vpop.f32.mrb[14].mxu0  ;;  %5454 = vmatpush3.bf16.msra.mxu1 %v5746_v21  ;;  %5476 = vmatpush3.bf16.msra.mxu0 %v5747_v36 }
 0x77d   :  { %v4123_v56 = vpop.f32.mrb[15].mxu0  ;;  %5455 = vmatprep.subr.bf16.mxu1 %v5957_v9  ;;  %5477 = vmatprep.subr.bf16.mxu0 %v5957_v9 }
 0x77f   :  { %5422 = vmatmul.mubr.msk.bf16.gmra.mrb[20].mxu1 %vm4179_vm11, %v4127_v39  ;;  %5444 = vmatmul.mubr.msk.bf16.gmra.mrb[24].mxu0 %vm4179_vm11, %v4127_v39 }
 0x780   :  { %5456 = vmatpush3.bf16.msra.mxu1 %v5748_v57  ;;  %5478 = vmatpush3.bf16.msra.mxu0 %v5749_v22 }
 0x781   :  { %5457 = vmatprep.mubr.msk.bf16.mxu1 %vm5958_vm10, %v5957_v9  ;;  %5479 = vmatprep.mubr.msk.bf16.mxu0 %vm5958_vm10, %v5957_v9 }
 0x782   :  { %5491 = vmatprep.subr.bf16.mxu1 %v5957_v9  ;;  %5513 = vmatprep.subr.bf16.mxu0 %v5957_v9 }
 0x787   :  { %5458 = vmatmul.mubr.msk.bf16.vlgmr.msra.gmra.mrb[24].mxu1 %vm4179_vm11, %v8450_v0  ;;  %5480 = vmatmul.mubr.msk.bf16.vlgmr.msra.gmra.mrb[28].mxu0 %vm4179_vm11, %v8450_v0 }
 0x788   :  { %5492 = vmatpush3.bf16.msra.mxu1 %v5750_v24  ;;  %5461 = vmatprep.mubr.msk.bf16.mxu1 %vm5958_vm10, %v5957_v9 }
 0x789   :  { %5483 = vmatprep.mubr.msk.bf16.mxu0 %vm5958_vm10, %v5957_v9  ;;  %5493 = vmatprep.subr.bf16.mxu1 %v5957_v9 }
 0x78c   :  { %5494 = vmatpush3.bf16.msra.mxu1 %v5751_v18 }
 0x78d   :  { %5495 = vmatprep.subr.bf16.mxu1 %v5957_v9 }
 0x78f   :  { %5462 = vmatmul.mubr.msk.bf16.gmra.mrb[28].mxu1 %vm4179_vm11, %v4126_v4  ;;  %5484 = vmatmul.mubr.msk.bf16.gmra.mrb[32].mxu0 %vm4179_vm11, %v4126_v4 }
 0x790   :  { %5496 = vmatpush3.bf16.msra.mxu1 %v5752_v63  ;;  %5465 = vmatprep.mubr.msk.bf16.mxu1 %vm5958_vm10, %v5957_v9 }
 0x791   :  { %5487 = vmatprep.mubr.msk.bf16.mxu0 %vm5958_vm10, %v5957_v9  ;;  %5497 = vmatprep.subr.bf16.mxu1 %v5957_v9 }
 0x794   :  { %5498 = vmatpush3.bf16.msra.mxu1 %v5753_v27 }
 0x795   :  { %5499 = vmatprep.subr.bf16.mxu1 %v5957_v9 }
 0x797   :  { %5466 = vmatmul.mubr.msk.bf16.gmra.mrb[32].mxu1 %vm4179_vm11, %v4127_v39  ;;  %5488 = vmatmul.mubr.msk.bf16.gmra.mrb[36].mxu0 %vm4179_vm11, %v4127_v39 }
 0x798   :  { %5500 = vmatpush3.bf16.msra.mxu1 %v5754_v47  ;;  %5501 = vmatprep.mubr.msk.bf16.mxu1 %vm5958_vm10, %v5957_v9 }
 0x799   :  { %5519 = vmatprep.mubr.msk.bf16.mxu0 %vm5958_vm10, %v5957_v9  ;;  %5523 = vmatprep.subr.bf16.mxu1 %v5957_v9 }
 0x79f   :  { %5502 = vmatmul.mubr.msk.bf16.vlgmr.msra.gmra.mrb[36].mxu1 %vm4179_vm11, %v8450_v0 }
 0x7a0   :  { %5505 = vmatprep.mubr.msk.bf16.mxu1 %vm5958_vm10, %v5957_v9  ;;  %5524 = vmatpush3.bf16.msra.mxu1 %v5755_v52 }
 0x7a1   :  { %5525 = vmatprep.subr.bf16.mxu1 %v5957_v9 }
 0x7a4   :  { %5526 = vmatpush3.bf16.msra.mxu1 %v5756_v53 }
 0x7a5   :  { %5527 = vmatprep.subr.bf16.mxu1 %v5957_v9 }
 0x7a7   :  { %5506 = vmatmul.mubr.msk.bf16.gmra.mrb[40].mxu1 %vm4179_vm11, %v4126_v4 }
 0x7a8   :  { %5509 = vmatprep.mubr.msk.bf16.mxu1 %vm5958_vm10, %v5957_v9  ;;  %5528 = vmatpush3.bf16.msra.mxu1 %v5757_v59 }
 0x7a9   :  { %5529 = vmatprep.subr.bf16.mxu1 %v5957_v9 }
 0x7ac   :  { %5530 = vmatpush3.bf16.msra.mxu1 %v5758_v7 }
 0x7ad   :  { %5531 = vmatprep.subr.bf16.mxu1 %v5957_v9 }
 0x7af   :  { %5510 = vmatmul.mubr.msk.bf16.gmra.mrb[44].mxu1 %vm4179_vm11, %v4127_v39 }
 0x7b0   :  { %5539 = vmatprep.mubr.msk.bf16.mxu1 %vm5958_vm10, %v5957_v9  ;;  %5532 = vmatpush3.bf16.msra.mxu1 %v5759_v38 }
 0x7b1   :  { %5533 = vmatprep.subr.bf16.mxu1 %v5957_v9 }
 0x842   :  { %v4223_v2 = vpop.f32.mrb[12].mxu1  ;;  %v4319_v16 = vpop.f32.mrb[16].mxu0 }
 0x843   :  { %v5415_v23 = vpop.f32.mrb[13].mxu1  ;;  %v5437_v26 = vpop.f32.mrb[17].mxu0  ;;  %v4245_v3 = vrot.slane %v4223_v2, 1 }
 0x844   :  { %v4226_v55 = vpop.f32.mrb[14].mxu1  ;;  %v4322_v50 = vpop.f32.mrb[18].mxu0 }
 0x845   :  { %v4246_v44 = vrot.slane %v4226_v55, 1  ;;  %v5416_v10 = vpop.f32.mrb[15].mxu1  ;;  %v5438_v5 = vpop.f32.mrb[19].mxu0 }
 0x847   :  { %v4253_v34 = vsel %vm503_vm1, %v4245_v3, %v4246_v44 }
 0x848   :  { %v4320_v61 = vadd.f32 %v4319_v16, %v4253_v34 }
 0x84a   :  { %v4231_v54 = vpop.f32.mrb[16].mxu1  ;;  %v4327_v32 = vpop.f32.mrb[20].mxu0 }
 0x84b   :  { %v4247_v12 = vrot.slane %v4231_v54, 1  ;;  %v5419_v48 = vpop.f32.mrb[17].mxu1  ;;  %v5441_v17 = vpop.f32.mrb[21].mxu0 }
 0x84c   :  { %v4234_v20 = vpop.f32.mrb[18].mxu1  ;;  %v4330_v30 = vpop.f32.mrb[22].mxu0 }
 0x84d   :  { %v4252_v42 = vsel %vm503_vm1, %v4246_v44, %v4247_v12  ;;  %v4248_v45 = vrot.slane %v4234_v20, 1  ;;  %v5420_v15 = vpop.f32.mrb[19].mxu1  ;;  %v5442_v58 = vpop.f32.mrb[23].mxu0 }
 0x84e   :  { %v4323_v33 = vadd.f32 %v4322_v50, %v4252_v42 }
 0x84f   :  { %v4251_v43 = vsel %vm503_vm1, %v4247_v12, %v4248_v45 }
 0x850   :  { %v4328_v49 = vadd.f32 %v4327_v32, %v4251_v43 }
 0x852   :  { %v4239_v29 = vpop.f32.mrb[20].mxu1  ;;  %v4335_v41 = vpop.f32.mrb[24].mxu0 }
 0x853   :  { %v4249_v28 = vrot.slane %v4239_v29, 1  ;;  %v5423_v1 = vpop.f32.mrb[21].mxu1  ;;  %v5445_v14 = vpop.f32.mrb[25].mxu0 }
 0x854   :  { %v4242_v11 = vpop.f32.mrb[22].mxu1  ;;  %v4338_v8 = vpop.f32.mrb[26].mxu0 }
 0x855   :  { %v4250_v0 = vsel %vm503_vm1, %v4248_v45, %v4249_v28  ;;  %v4254_v46 = vsel %vm503_vm1, %v4249_v28, %v4245_v3  ;;  %v5424_v31 = vpop.f32.mrb[23].mxu1  ;;  %v5446_v62 = vpop.f32.mrb[27].mxu0 }
 0x856   :  { %v4331_v60 = vadd.f32 %v4330_v30, %v4250_v0  ;;  %v4336_v25 = vadd.f32 %v4335_v41, %v4254_v46 }
 0x85a   :  { %v4416_v40 = vpop.f32.mrb[24].mxu1  ;;  %v4528_v35 = vpop.f32.mrb[28].mxu0 }
 0x85b   :  { %v5459_v6 = vpop.f32.mrb[25].mxu1  ;;  %v5481_v4 = vpop.f32.mrb[29].mxu0  ;;  %v4438_v36 = vrot.slane %v4416_v40, 2  ;;  %v4550_v37 = vrot.slane %v4528_v35, 3 }
 0x85c   :  { %v4419_v13 = vpop.f32.mrb[26].mxu1  ;;  %v4531_v21 = vpop.f32.mrb[30].mxu0 }
 0x85d   :  { %v4439_v19 = vrot.slane %v4419_v13, 2  ;;  %v4551_v51 = vrot.slane %v4531_v21, 3  ;;  %v5460_v57 = vpop.f32.mrb[27].mxu1  ;;  %v5482_v22 = vpop.f32.mrb[31].mxu0 }
 0x85f   :  { %v4446_v39 = vsel %vm1063_vm2, %v4438_v36, %v4439_v19  ;;  %v4558_v56 = vsel %vm1474_vm3, %v4550_v37, %v4551_v51 }
 0x860   :  { %v4448_v24 = vadd.f32 %v4446_v39, %v4320_v61 }
 0x862   :  { %v4560_v18 = vadd.f32 %v4558_v56, %v4448_v24  ;;  %v4424_v63 = vpop.f32.mrb[28].mxu1  ;;  %v4536_v27 = vpop.f32.mrb[32].mxu0 }
 0x863   :  { %v4440_v47 = vrot.slane %v4424_v63, 2  ;;  %v4552_v52 = vrot.slane %v4536_v27, 3  ;;  %v5463_v53 = vpop.f32.mrb[29].mxu1  ;;  %v5485_v59 = vpop.f32.mrb[33].mxu0 }
 0x864   :  { %v4427_v7 = vpop.f32.mrb[30].mxu1  ;;  %v4539_v2 = vpop.f32.mrb[34].mxu0 }
 0x865   :  { %v4445_v16 = vsel %vm1063_vm2, %v4439_v19, %v4440_v47  ;;  %v4557_v23 = vsel %vm1474_vm3, %v4551_v51, %v4552_v52  ;;  %v4441_v26 = vrot.slane %v4427_v7, 2  ;;  %v4553_v55 = vrot.slane %v4539_v2, 3  ;;  %v5464_v50 = vpop.f32.mrb[31].mxu1  ;;  %v5486_v3 = vpop.f32.mrb[35].mxu0  ;;  %v4677_v2 = vld [vmem:[%s8669_s11] sm:$0xf] }
 0x866   :  { %v4449_v44 = vadd.f32 %v4445_v16, %v4323_v33  ;;  %v5760_v16 = vld [vmem:[%s8668_s12 + $0x28] sm:$0xff]   ;;  %v5331_v50 = vld [vmem:[%s8670_s10] ss:$0 sm:$0xff] }
 0x867   :  { %v4444_v10 = vsel %vm1063_vm2, %v4440_v47, %v4441_v26  ;;  %v4556_v5 = vsel %vm1474_vm3, %v4552_v52, %v4553_v55  ;;  %5534 = vmatpush3.bf16.msra.mxu1 %v5760_v16 }
 0x868   :  { %v4561_v34 = vadd.f32 %v4557_v23, %v4449_v44  ;;  %v4450_v61 = vadd.f32 %v4444_v10, %v4328_v49  ;;  %5535 = vmatprep.subr.bf16.mxu1 %v5957_v9  ;;  %v5761_v23 = vld [vmem:[%s8668_s12 + $0x30] sm:$0xff]  }
 0x86a   :  { %v4562_v54 = vadd.f32 %v4556_v5, %v4450_v61  ;;  %v4432_v32 = vpop.f32.mrb[32].mxu1  ;;  %v4544_v12 = vpop.f32.mrb[36].mxu0 }
 0x86b   :  { %v4442_v48 = vrot.slane %v4432_v32, 2  ;;  %v4554_v17 = vrot.slane %v4544_v12, 3  ;;  %v5467_v20 = vpop.f32.mrb[33].mxu1  ;;  %v5489_v30 = vpop.f32.mrb[37].mxu0  ;;  %5536 = vmatpush3.bf16.msra.mxu1 %v5761_v23  ;;  %v5763_v32 = vld [vmem:[%s8671_s14] sm:$0xff]   ;;  %v5764_v12 = vld [vmem:[%s8671_s14 + $0x8] sm:$0xff]  }
 0x86c   :  { %v4435_v42 = vpop.f32.mrb[34].mxu1  ;;  %v4547_v45 = vpop.f32.mrb[38].mxu0  ;;  %5537 = vmatprep.subr.bf16.mxu1 %v5957_v9 }
 0x86d   :  { %v4443_v15 = vsel %vm1063_vm2, %v4441_v26, %v4442_v48  ;;  %v4447_v58 = vsel %vm1063_vm2, %v4442_v48, %v4438_v36  ;;  %v4555_v33 = vsel %vm1474_vm3, %v4553_v55, %v4554_v17  ;;  %v4559_v43 = vsel %vm1474_vm3, %v4554_v17, %v4550_v37  ;;  %v5468_v49 = vpop.f32.mrb[35].mxu1  ;;  %v5490_v29 = vpop.f32.mrb[39].mxu0  ;;  %v5762_v26 = vld [vmem:[%s8668_s12 + $0x38] ss:$0 sps:$4 sm:$0xff]   ;;  %v5333_v48 = vld [vmem:[%s8672_s13] ss:$0 sm:$0xff] }
 0x86e   :  { %v4451_v41 = vadd.f32 %v4443_v15, %v4331_v60  ;;  %v4452_v28 = vadd.f32 %v4447_v58, %v4336_v25  ;;  %v4808_v55 = vsel %vm2493_vm5, %v5762_v26, 0 }
 0x86f   :  { %5538 = vmatpush3.bf16.msra.mxu1 %v4808_v55 }
 0x870   :  { %v4563_v1 = vadd.f32 %v4555_v33, %v4451_v41  ;;  %v4564_v14 = vadd.f32 %v4559_v43, %v4452_v28 }
 0x872   :  { %v4640_v11 = vpop.f32.mrb[36].mxu1 }
 0x873   :  { %v5503_v8 = vpop.f32.mrb[37].mxu1  ;;  %v4662_v46 = vrot.slane %v4640_v11, 4 }
 0x874   :  { %v4643_v0 = vpop.f32.mrb[38].mxu1 }
 0x875   :  { %v4663_v31 = vrot.slane %v4643_v0, 4  ;;  %v5504_v62 = vpop.f32.mrb[39].mxu1 }
 0x877   :  { %v4670_v40 = vsel %vm1885_vm4, %v4662_v46, %v4663_v31 }
 0x878   :  { %v4672_v35 = vadd.f32 %v4670_v40, %v4560_v18 }
 0x87a   :  { %v4648_v6 = vpop.f32.mrb[40].mxu1 }
 0x87b   :  { %v4664_v4 = vrot.slane %v4648_v6, 4  ;;  %v5507_v13 = vpop.f32.mrb[41].mxu1 }
 0x87c   :  { %v4651_v21 = vpop.f32.mrb[42].mxu1 }
 0x87d   :  { %v4669_v60 = vsel %vm1885_vm4, %v4663_v31, %v4664_v4  ;;  %v4665_v25 = vrot.slane %v4651_v21, 4  ;;  %v5508_v36 = vpop.f32.mrb[43].mxu1 }
 0x87e   :  { %v4673_v37 = vadd.f32 %v4669_v60, %v4561_v34 }
 0x87f   :  { %v4668_v19 = vsel %vm1885_vm4, %v4664_v4, %v4665_v25 }
 0x880   :  { %v4674_v51 = vadd.f32 %v4668_v19, %v4562_v54  ;;  %v4678_v57 = vpack.c.bf16 %v4673_v37, %v4672_v35 }
 0x882   :  { %v4656_v22 = vpop.f32.mrb[44].mxu1  ;;  %5514 = vmatpush3.bf16.msra.mxu0 %v4678_v57 }
 0x883   :  { %v4666_v39 = vrot.slane %v4656_v22, 4  ;;  %v5511_v56 = vpop.f32.mrb[45].mxu1  ;;  %5515 = vmatprep.subr.bf16.mxu0 %v5957_v9 }
 0x884   :  { %v4659_v24 = vpop.f32.mrb[46].mxu1 }
 0x885   :  { %v4667_v18 = vsel %vm1885_vm4, %v4665_v25, %v4666_v39  ;;  %v4671_v63 = vsel %vm1885_vm4, %v4666_v39, %v4662_v46  ;;  %v5512_v27 = vpop.f32.mrb[47].mxu1 }
 0x886   :  { %v4675_v47 = vadd.f32 %v4667_v18, %v4563_v1  ;;  %v4676_v52 = vadd.f32 %v4671_v63, %v4564_v14 }
 0x888   :  { %v4679_v53 = vpack.c.bf16 %v4675_v47, %v4674_v51  ;;  %v4680_v59 = vpack.c.bf16 %v4676_v52, %v4676_v52 }
 0x88a   :  { %5516 = vmatpush3.bf16.msra.mxu0 %v4679_v53  ;;  %v4692_v7 = vsel %vm2493_vm5, %v4680_v59, 0 }
 0x88b   :  { %5517 = vmatprep.subr.bf16.mxu0 %v5957_v9 }
 0x88e   :  { %5518 = vmatpush3.bf16.msra.mxu0 %v4692_v7 }
 0x88f   :  { %5543 = vmatprep.subr.bf16.mxu0 %v5957_v9 }
 0x891   :  { %5520 = vmatmul.mubr.msk.bf16.vlgmr.msra.gmra.mrb[40].mxu0 %vm2471_vm6, %v4677_v2 }
 0x892   :  { %5547 = vmatprep.mubr.msk.bf16.mxu0 %vm5958_vm10, %v5957_v9  ;;  %5544 = vmatpush3.bf16.msra.mxu0 %v5763_v32 }
 0x893   :  { %5545 = vmatprep.subr.bf16.mxu0 %v5957_v9  ;;  %v5343_v9 = vld [vmem:[%s8673_s15] ss:$0 sm:$0xff] }
 0x896   :  { %5546 = vmatpush3.bf16.msra.mxu0 %v5764_v12 }
 0x964   :  { %v4728_v3 = vpop.f32.mrb[40].mxu0 }
 0x965   :  { %v4729_v44 = vadd.f32 %v5331_v50, %v4728_v3  ;;  %v5521_v10 = vpop.f32.mrb[41].mxu0 }
 0x966   :  { %v4731_v5 = vpop.f32.mrb[42].mxu0 }
 0x967   :  { %5949 = vtanh.f32 %v4729_v44  ;;  %v5522_v34 = vpop.f32.mrb[43].mxu0 }
 0x971   :  { %v5950_v61 = vpop.eup %5949 }
 0x972   :  { %v4735_v54 = vpack.c.bf16 %v5950_v61, %v5950_v61 }
 0x974   :  { %5540 = vmatmul.mubr.msk.bf16.vlgmr.msra.gmra.mrb[48].mxu1 %vm4803_vm12, %v4735_v54 }
 0xa47   :  { %v4844_v17 = vpop.f32.mrb[48].mxu1 }
 0xa48   :  { %v4845_v20 = vadd.f32 %v5333_v48, %v4844_v17  ;;  %v5541_v30 = vpop.f32.mrb[49].mxu1 }
 0xa49   :  { %v4847_v42 = vpop.f32.mrb[50].mxu1 }
 0xa4a   :  { %5951 = vtanh.f32 %v4845_v20  ;;  %v5542_v45 = vpop.f32.mrb[51].mxu1 }
 0xa54   :  { %v5952_v15 = vpop.eup %5951 }
 0xa55   :  { %v4851_v58 = vpack.c.bf16 %v5952_v15, %v5952_v15 }
 0xa57   :  { %5548 = vmatmul.mubr.msk.bf16.vlgmr.msra.gmra.mrb[44].mxu0 %vm195_vm0, %v4851_v58 }
 0xb2a   :  { %v4912_v33 = vpop.f32.mrb[44].mxu0 }
 0xb2b   :  { %v4913_v43 = vadd.f32 %v5343_v9, %v4912_v33  ;;  %v5549_v49 = vpop.f32.mrb[45].mxu0 }
 0xb2c   :  { %v4915_v29 = vpop.f32.mrb[46].mxu0 }
 0xb2d   :  { %4919 = vst.msk [vmem:[%s8674_s16] sm:$0xff] %vm4918_vm13, %v4913_v43  ;;  %v5550_v41 = vpop.f32.mrb[47].mxu0 }

</bundles_post_ra>
